<compile_context>
chip_gen: v5e
topology: v5e:2x2
jax: 0.10.0
libtpu: 0.0.40
codegen_flags: <defaults>
</compile_context>

<pallas_src>
import functools

import jax
import jax.numpy as jnp
from jax import lax
from jax.experimental import pallas as pl
from jax.experimental.pallas import tpu as pltpu


def _round_up(x, m):
    return ((x + m - 1) // m) * m


_VMEM_TILE_BUDGET = 44 << 20        # conservative: fits v7x's 64 MiB/TC with headroom
_DEFAULT_RESIDENT_BYTES = 8 << 20   # keep contrast matrix fully VMEM-resident below this


def _vmem_need(tm, tk, d_pad, itemsize, resident_bytes):
    """Rough VMEM footprint: double-buffered input blocks + f32 tile temporaries."""
    fcol = resident_bytes if resident_bytes else 2 * d_pad * tk * itemsize
    return (2 * tm * d_pad * itemsize     # anchor-row block (double buffered)
            + fcol                         # contrast block / resident matrix
            + 8 * tm * tk * 4              # f32 full-tile temporaries (s, masks, e, ...)
            + tm * 128 * 4                 # merged stats scratch (lane padded)
            + 2 * 8 * 128 * 4)             # output block


def _select_tiles(n_pad, d_pad, itemsize, resident_bytes):
    """Pick (tm, tk).

    tm (anchor rows, resident across the k loop) sets arithmetic intensity, so
    prefer it large; but keep >= 2 row blocks when possible so both v7x
    TensorCores get whole row blocks.  tk is capped by the VMEM budget.
    """
    tm_cands = [t for t in (1024, 512, 256, 128) if t <= n_pad and n_pad % t == 0]
    tm_cands.sort(key=lambda t: (0 if (n_pad // t >= 2 and t >= 256) else 1, -t))
    tk_cands = [t for t in (512, 256, 128) if t <= n_pad and n_pad % t == 0]
    for min_tk in (256, 128):              # only drop to tk=128 as a last resort
        for tm in tm_cands:
            for tk in tk_cands:
                if tk < min_tk:
                    continue
                if _vmem_need(tm, tk, d_pad, itemsize, resident_bytes) <= _VMEM_TILE_BUDGET:
                    return tm, tk
    # TODO(synk): for very large D, add a 3rd grid axis over D with a (tm,tk)
    # f32 s-accumulator instead of holding all of d_pad per block.
    return tm_cands[-1], tk_cands[-1]


def _supcon_kernel(frow_ref, fcol_ref, grow_ref, gcol_ref, out_ref, stats_sc,
                   *, inv_temperature, temp_over_base, n_valid, tk,
                   has_pad_cols, col_resident):
    """Streaming SupCon: per row-block online LSE over column blocks."""
    i = pl.program_id(0)            # anchor-row block
    k = pl.program_id(1)            # contrast-column block (reduction axis)
    tm = frow_ref.shape[0]

    @pl.when(k == 0)
    def _():
        stats_sc[...] = jnp.zeros((tm, 4), jnp.float32)
        stats_sc[:, 0:1] = jnp.full((tm, 1), -jnp.inf, jnp.float32)   # running max

    # Contrast tile as (d_pad, tk): k-th slab of the VMEM-resident matrix, or the
    # streamed (double-buffered) block.  Pre-transposed in the wrapper so the MXU
    # gets a clean (M,K)x(K,N) feed without a per-tile XLU transpose.
    if col_resident:
        fcol = fcol_ref[k]
    else:
        fcol = fcol_ref[...]

    # Raw scaled logits anchor . contrast^T / T (MXU, f32 accumulation).
    s = lax.dot_general(
        frow_ref[...], fcol,
        dimension_numbers=(((1,), (0,)), ((), ())),
        preferred_element_type=jnp.float32) * inv_temperature          # [tm, tk]

    # Single combined denominator mask: off-diagonal (self-contrast removed) and,
    # only when padding exists (static), real (non-pad) columns.
    row_glob = i * tm + lax.broadcasted_iota(jnp.int32, (tm, tk), 0)
    col_glob = k * tk + lax.broadcasted_iota(jnp.int32, (tm, tk), 1)
    denom_mask = row_glob != col_glob
    if has_pad_cols:
        denom_mask = jnp.logical_and(denom_mask, col_glob < n_valid)

    # Positives: same group id AND in the denominator.  Padded anchors never
    # match a real column (gid = -1) and pad columns are excluded above, so
    # padded rows end with count == 0 -> loss exactly 0.
    pos = jnp.logical_and(grow_ref[...] == gcol_ref[...], denom_mask).astype(jnp.float32)

    stats = stats_sc[...]                    # [tm, 4] = (m, l, sum(mask*s), count)
    m_prev = stats[:, 0:1]
    l_prev = stats[:, 1:2]

    # Online LSE.  NOTE: m intentionally includes the self-contrast diagonal and
    # the zero-valued pad columns -- LSE stays exact for any m >= max of the kept
    # terms, and it mirrors the PyTorch full-row max.  Do not "fix" this.
    m_new = jnp.maximum(m_prev, jnp.max(s, axis=1, keepdims=True))
    alpha = jnp.exp(m_prev - m_new)                                    # 0 on first tile
    e = jnp.where(denom_mask, jnp.exp(s - m_new), 0.0)
    l_new = alpha * l_prev + jnp.sum(e, axis=1, keepdims=True)
    # sum(mask*log_prob) = sum(mask*raw_logits) - count * log_sum_exp(off-diag),
    # so only [tm, 1] running stats are ever stored.
    smr_new = stats[:, 2:3] + jnp.sum(pos * s, axis=1, keepdims=True)
    cnt_new = stats[:, 3:4] + jnp.sum(pos, axis=1, keepdims=True)

    stats_sc[:, 0:1] = m_new
    stats_sc[:, 1:2] = l_new
    stats_sc[:, 2:3] = smr_new
    stats_sc[:, 3:4] = cnt_new

    @pl.when(k == pl.num_programs(1) - 1)
    def _():
        log_denom = m_new + jnp.log(l_new)                             # [tm, 1]
        mean_log_prob = jnp.where(
            cnt_new > 0.5,
            (smr_new - cnt_new * log_denom) / jnp.maximum(cnt_new, 1.0),
            0.0)                                                       # matches torch clamp
        loss_rows = (-temp_over_base) * mean_log_prob                  # [tm, 1]
        # Per-row-block partial sum written as a tiny lane-dense (8, 128) slab
        # (padded / positive-free rows contribute exactly 0, so summing is safe).
        block_sum = jnp.sum(loss_rows)
        out_ref[...] = jnp.broadcast_to(block_sum, (8, 128)).astype(jnp.float32)


def supcon_loss_pallas(features, labels=None, mask=None,
                       temperature=0.07, contrast_mode='all',
                       base_temperature=0.07, matmul_dtype=jnp.bfloat16,
                       max_resident_bytes=_DEFAULT_RESIDENT_BYTES,
                       tile_hint=None):
    """JAX/Pallas equivalent of SupConLoss.forward (contrast_mode='all').

    Precision note: bf16 MXU operands (default) are fine for unit-norm features
    at T=0.07, but the 1/T ~ 14x amplification of quantization error means very
    small temperatures (or exact parity) should use matmul_dtype=jnp.float32
    (much slower on v5e).
    """
    features = jnp.asarray(features)
    if features.ndim < 3:
        raise ValueError('`features` needs to be [bsz, n_views, ...]')
    if features.ndim > 3:
        features = features.reshape(features.shape[0], features.shape[1], -1)
    if contrast_mode != 'all':
        # TODO(synk): contrast_mode='one' (single anchor view) not wired into the kernel.
        raise ValueError(f'Unsupported mode: {contrast_mode}')

    bsz, n_views, dim = features.shape
    if labels is not None and mask is not None:
        raise ValueError('Cannot define both `labels` and `mask`')
    if mask is not None:
        # TODO(synk): explicit (possibly asymmetric) bsz x bsz `mask` not wired into
        # the streaming kernel; pass `labels` instead.
        raise NotImplementedError('explicit `mask` not supported; pass `labels`')
    if labels is None:
        gid = jnp.arange(bsz, dtype=jnp.int32)          # SimCLR: eye(bsz) positives
    else:
        labels = jnp.asarray(labels).reshape(-1)
        if labels.shape[0] != bsz:
            raise ValueError('Num of labels does not match num of features')
        gid = labels.astype(jnp.int32)

    n_total = n_views * bsz
    # contrast_feature = cat(unbind(features, dim=1), dim=0) -> view-major [N, D]
    contrast_feature = jnp.transpose(features, (1, 0, 2)).reshape(n_total, dim)
    gid_full = jnp.tile(gid, (n_views,))                # length-N group ids

    # Pad to MXU-friendly shapes: 256 rounding avoids half-filling the 256^2 MXU
    # of v6e/v7x.  Padded feature rows are zero; padded group ids are -1.
    n_pad = _round_up(n_total, 256)
    d_pad = _round_up(dim, 128)
    itemsize = jnp.dtype(matmul_dtype).itemsize

    resident_full = n_pad * d_pad * itemsize
    col_resident = resident_full <= max_resident_bytes
    resident_budget = 2 * resident_full if col_resident else 0   # count double-buffer conservatively

    if tile_hint is not None:
        tm, tk = tile_hint
    else:
        tm, tk = _select_tiles(n_pad, d_pad, itemsize, resident_budget)
    assert n_pad % tm == 0 and n_pad % tk == 0, (n_pad, tm, tk)

    f = jnp.zeros((n_pad, d_pad), matmul_dtype)
    f = f.at[:n_total, :dim].set(contrast_feature.astype(matmul_dtype))
    gid_pad = jnp.full((n_pad,), -1, dtype=jnp.int32).at[:n_total].set(gid_full)
    g_row = gid_pad.reshape(n_pad, 1)
    g_col = gid_pad.reshape(1, n_pad)

    n_k = n_pad // tk
    if col_resident:
        # Whole contrast matrix resident in VMEM as (n_k, d_pad, tk): no per-row-
        # block HBM re-streaming; the k-th slab is read in-kernel with ref[k].
        f_contrast = f.reshape(n_k, tk, d_pad).transpose(0, 2, 1)
        fcol_spec = pl.BlockSpec((n_k, d_pad, tk), lambda i, k: (0, 0, 0))
    else:
        # Streamed, pre-transposed to (d_pad, n_pad) so the contraction is
        # (M,K)x(K,N) with no per-tile XLU transpose of the RHS.
        f_contrast = f.T
        fcol_spec = pl.BlockSpec((d_pad, tk), lambda i, k: (0, k))

    kernel = functools.partial(
        _supcon_kernel,
        inv_temperature=float(1.0 / temperature),
        temp_over_base=float(temperature / base_temperature),
        n_valid=n_total, tk=tk,
        has_pad_cols=(n_total < n_pad),
        col_resident=col_resident)

    n_row_blocks = n_pad // tm
    grid = (n_row_blocks, n_k)
    vmem_limit = _vmem_need(tm, tk, d_pad, itemsize, resident_budget) + (12 << 20)
    vmem_limit = int(min(max(vmem_limit, 32 << 20), 60 << 20))   # stay inside v7x's 64 MiB/TC

    out = pl.pallas_call(
        kernel,
        out_shape=jax.ShapeDtypeStruct((n_row_blocks * 8, 128), jnp.float32),
        grid_spec=pltpu.PrefetchScalarGridSpec(
            num_scalar_prefetch=0,
            grid=grid,
            in_specs=[
                pl.BlockSpec((tm, d_pad), lambda i, k: (i, 0)),   # anchor rows
                fcol_spec,                                        # contrast columns
                pl.BlockSpec((tm, 1), lambda i, k: (i, 0)),       # row group ids
                pl.BlockSpec((1, tk), lambda i, k: (0, k)),       # col group ids
            ],
            out_specs=pl.BlockSpec((8, 128), lambda i, k: (i, 0)),
            scratch_shapes=[pltpu.VMEM((tm, 4), jnp.float32)],    # merged m/l/sum(mask*s)/count
        ),
        compiler_params=pltpu.CompilerParams(
            dimension_semantics=("parallel", "arbitrary"),
            vmem_limit_bytes=vmem_limit),
    )(f, f_contrast, g_row, g_col)

    # loss.view(anchor_count, batch_size).mean() == mean over all N anchors;
    # padded anchors contribute exactly 0 to the per-block partial sums.
    return jnp.sum(out[::8, 0]) / jnp.float32(n_total)


def supcon_loss_ref(features, labels=None, temperature=0.07, base_temperature=0.07):
    """Pure-JAX reference mirroring the PyTorch module (contrast_mode='all')."""
    bsz, n_views, dim = features.shape
    if labels is None:
        mask = jnp.eye(bsz, dtype=jnp.float32)
    else:
        labels = labels.reshape(-1, 1)
        mask = (labels == labels.T).astype(jnp.float32)
    contrast_feature = jnp.transpose(features, (1, 0, 2)).reshape(n_views * bsz, dim)
    anchor_feature = contrast_feature
    adc = jnp.matmul(anchor_feature, contrast_feature.T) / temperature
    logits = adc - jnp.max(adc, axis=1, keepdims=True)
    mask = jnp.tile(mask, (n_views, n_views))
    n = n_views * bsz
    logits_mask = 1.0 - jnp.eye(n, dtype=jnp.float32)
    mask = mask * logits_mask
    exp_logits = jnp.exp(logits) * logits_mask
    log_prob = logits - jnp.log(jnp.sum(exp_logits, axis=1, keepdims=True))
    mask_pos_pairs = jnp.sum(mask, axis=1)
    mask_pos_pairs = jnp.where(mask_pos_pairs < 1e-6, 1.0, mask_pos_pairs)
    mean_log_prob_pos = jnp.sum(mask * log_prob, axis=1) / mask_pos_pairs
    loss = -(temperature / base_temperature) * mean_log_prob_pos
    return jnp.mean(loss.reshape(n_views, bsz))


if __name__ == "__main__":
    key = jax.random.PRNGKey(0)
    k_feat, k_lab = jax.random.split(key)

    bsz, n_views, dim = 8, 2, 32
    feats = jax.random.normal(k_feat, (bsz, n_views, dim), dtype=jnp.float32)
    feats = feats / jnp.linalg.norm(feats, axis=-1, keepdims=True)   # typical SupCon usage
    labels = jax.random.randint(k_lab, (bsz,), 0, 3)

    ref_sup = supcon_loss_ref(feats, labels=labels)
    ref_simclr = supcon_loss_ref(feats, labels=None)

    # 1) Supervised path, f32 MXU operands, VMEM-resident contrast matrix (tight check).
    loss_f32 = jax.block_until_ready(
        supcon_loss_pallas(feats, labels=labels, matmul_dtype=jnp.float32))
    assert jnp.allclose(loss_f32, ref_sup, rtol=1e-3, atol=1e-3), (loss_f32, ref_sup)

    # 2) Supervised path, default bf16 MXU operands (looser: 1/T amplifies bf16 error).
    loss_bf16 = jax.block_until_ready(supcon_loss_pallas(feats, labels=labels))
    assert jnp.allclose(loss_bf16, ref_sup, rtol=5e-2, atol=5e-2), (loss_bf16, ref_sup)

    # 3) Unsupervised (SimCLR) path: labels=None, mask=None -> eye(bsz) positives.
    loss_simclr = jax.block_until_ready(supcon_loss_pallas(feats))
    assert jnp.allclose(loss_simclr, ref_simclr, rtol=5e-2, atol=5e-2), (loss_simclr, ref_simclr)

    # 4) Streamed-contrast path with a forced multi-block grid: exercises the
    #    online-LSE accumulation across column blocks and multiple row blocks.
    loss_stream = jax.block_until_ready(
        supcon_loss_pallas(feats, labels=labels, matmul_dtype=jnp.float32,
                           max_resident_bytes=0, tile_hint=(128, 128)))
    assert jnp.allclose(loss_stream, ref_sup, rtol=1e-3, atol=1e-3), (loss_stream, ref_sup)

    print("KERNEL_OK")
</pallas_src>

<mosaic_0001>
module attributes {stable_mosaic.version = 11 : i64} {
  func.func @_supcon_kernel(%arg0: i32, %arg1: i32, %arg2: memref<256x128xf32, #tpu.memory_space<vmem>>, %arg3: memref<1x128x256xf32, #tpu.memory_space<vmem>>, %arg4: memref<256x1xi32, #tpu.memory_space<vmem>>, %arg5: memref<1x256xi32, #tpu.memory_space<vmem>>, %arg6: memref<8x128xf32, #tpu.memory_space<vmem>>, %arg7: memref<256x4xf32, #tpu.memory_space<vmem>>) attributes {dimension_semantics = [#tpu.dimension_semantics<parallel>, #tpu.dimension_semantics<arbitrary>], iteration_bounds = array<i64: 1, 1>, scalar_prefetch = 0 : i64, scratch_operands = 1 : i64, tpu.core_type = #tpu.core_type<tc>, window_params = [{transform_indices = @transform_0, window_bounds = array<i64: 256, 128>}, {pipeline_mode = #tpu.pipeline_mode<synchronous>, transform_indices = @transform_1, window_bounds = array<i64: 1, 128, 256>}, {transform_indices = @transform_2, window_bounds = array<i64: 256, 1>}, {transform_indices = @transform_3, window_bounds = array<i64: 1, 256>}, {transform_indices = @transform_4, window_bounds = array<i64: 8, 128>}]} {
    %c0_i32 = arith.constant 0 : i32
    %0 = arith.cmpi eq, %arg1, %c0_i32 : i32
    %1 = arith.extui %0 : i1 to i32
    %c0_i32_0 = arith.constant 0 : i32
    %2 = arith.cmpi ne, %1, %c0_i32_0 : i32
    scf.if %2 {
      %cst_24 = arith.constant 0.000000e+00 : f32
      %63 = vector.broadcast %cst_24 : f32 to vector<256x4xf32>
      %c0_25 = arith.constant 0 : index
      %c0_26 = arith.constant 0 : index
      %64 = vector.load %arg7[%c0_25, %c0_26] : memref<256x4xf32, #tpu.memory_space<vmem>>, vector<256x4xf32>
      tpu.vector_store %arg7[%c0_25, %c0_26], %63 {strides = array<i32>} : memref<256x4xf32, #tpu.memory_space<vmem>>, vector<256x4xf32>,
      %cst_27 = arith.constant 0xFF800000 : f32
      %65 = vector.broadcast %cst_27 : f32 to vector<256x1xf32>
      %c0_28 = arith.constant 0 : index
      %c0_29 = arith.constant 0 : index
      %66 = vector.load %arg7[%c0_28, %c0_29] : memref<256x4xf32, #tpu.memory_space<vmem>>, vector<256x1xf32>
      tpu.vector_store %arg7[%c0_28, %c0_29], %65 {strides = array<i32>} : memref<256x4xf32, #tpu.memory_space<vmem>>, vector<256x1xf32>,
    } else {
    }
    %3 = arith.index_cast %arg1 : i32 to index
    %c0 = arith.constant 0 : index
    %c0_1 = arith.constant 0 : index
    %4 = vector.load %arg3[%3, %c0, %c0_1] : memref<1x128x256xf32, #tpu.memory_space<vmem>>, vector<1x128x256xf32>
    %5 = vector.shape_cast %4 : vector<1x128x256xf32> to vector<128x256xf32>
    %c0_2 = arith.constant 0 : index
    %c0_3 = arith.constant 0 : index
    %6 = vector.load %arg2[%c0_2, %c0_3] : memref<256x128xf32, #tpu.memory_space<vmem>>, vector<256x128xf32>
    %cst = arith.constant dense<0.000000e+00> : vector<256x256xf32>
    %7 = tpu.matmul %6, %5, %cst {dimension_numbers = #tpu.dot_dimension_numbers<[1], [0], [0], [1], [0, 0, 1, 1], [], []>} : vector<256x128xf32>, vector<128x256xf32>, vector<256x256xf32> -> vector<256x256xf32>
    %cst_4 = arith.constant 14.2857141 : f32
    %8 = vector.broadcast %cst_4 : f32 to vector<256x256xf32>
    %9 = arith.mulf %7, %8 : vector<256x256xf32>
    %c256_i32 = arith.constant 256 : i32
    %10 = arith.muli %arg0, %c256_i32 : i32
    %11 = tpu.iota {dimensions = array<i32: 0>} : vector<256x256xi32>
    %12 = vector.broadcast %10 : i32 to vector<256x256xi32>
    %13 = arith.addi %12, %11 : vector<256x256xi32>
    %c256_i32_5 = arith.constant 256 : i32
    %14 = arith.muli %arg1, %c256_i32_5 : i32
    %15 = tpu.iota {dimensions = array<i32: 1>} : vector<256x256xi32>
    %16 = vector.broadcast %14 : i32 to vector<256x256xi32>
    %17 = arith.addi %16, %15 : vector<256x256xi32>
    %18 = arith.cmpi ne, %13, %17 : vector<256x256xi32>
    %c16_i32 = arith.constant 16 : i32
    %19 = vector.broadcast %c16_i32 : i32 to vector<256x256xi32>
    %20 = arith.cmpi slt, %17, %19 : vector<256x256xi32>
    %21 = arith.andi %18, %20 : vector<256x256xi1>
    %c0_6 = arith.constant 0 : index
    %c0_7 = arith.constant 0 : index
    %22 = vector.load %arg4[%c0_6, %c0_7] : memref<256x1xi32, #tpu.memory_space<vmem>>, vector<256x1xi32>
    %c0_8 = arith.constant 0 : index
    %c0_9 = arith.constant 0 : index
    %23 = vector.load %arg5[%c0_8, %c0_9] : memref<1x256xi32, #tpu.memory_space<vmem>>, vector<1x256xi32>
    %24 = vector.broadcast %22 : vector<256x1xi32> to vector<256x256xi32>
    %25 = vector.broadcast %23 : vector<1x256xi32> to vector<256x256xi32>
    %26 = arith.cmpi eq, %24, %25 : vector<256x256xi32>
    %27 = arith.andi %26, %21 : vector<256x256xi1>
    %28 = arith.extui %27 : vector<256x256xi1> to vector<256x256xi32>
    %29 = arith.sitofp %28 : vector<256x256xi32> to vector<256x256xf32>
    %c0_10 = arith.constant 0 : index
    %c0_11 = arith.constant 0 : index
    %30 = vector.load %arg7[%c0_10, %c0_11] : memref<256x4xf32, #tpu.memory_space<vmem>>, vector<256x4xf32>
    %31 = vector.extract_strided_slice %30 {offsets = [0, 0], sizes = [256, 1], strides = [1, 1]} : vector<256x4xf32> to vector<256x1xf32>
    %32 = vector.extract_strided_slice %30 {offsets = [0, 1], sizes = [256, 1], strides = [1, 1]} : vector<256x4xf32> to vector<256x1xf32>
    %cst_12 = arith.constant dense<0xFF800000> : vector<256xf32>
    %33 = vector.multi_reduction <maximumf>, %9, %cst_12 [1] : vector<256x256xf32> to vector<256xf32>
    %34 = vector.shape_cast %33 : vector<256xf32> to vector<256x1xf32>
    %35 = arith.maximumf %31, %34 : vector<256x1xf32>
    %36 = arith.subf %31, %35 : vector<256x1xf32>
    %37 = math.exp %36 : vector<256x1xf32>
    %38 = vector.broadcast %35 : vector<256x1xf32> to vector<256x256xf32>
    %39 = arith.subf %9, %38 : vector<256x256xf32>
    %40 = math.exp %39 : vector<256x256xf32>
    %cst_13 = arith.constant 0.000000e+00 : f32
    %41 = vector.broadcast %cst_13 : f32 to vector<256x256xf32>
    %42 = arith.select %21, %40, %41 : vector<256x256xi1>, vector<256x256xf32>
    %43 = arith.mulf %37, %32 : vector<256x1xf32>
    %cst_14 = arith.constant dense<0.000000e+00> : vector<256xf32>
    %44 = vector.multi_reduction <add>, %42, %cst_14 [1] : vector<256x256xf32> to vector<256xf32>
    %45 = vector.shape_cast %44 : vector<256xf32> to vector<256x1xf32>
    %46 = arith.addf %43, %45 : vector<256x1xf32>
    %47 = vector.extract_strided_slice %30 {offsets = [0, 2], sizes = [256, 1], strides = [1, 1]} : vector<256x4xf32> to vector<256x1xf32>
    %48 = arith.mulf %29, %9 : vector<256x256xf32>
    %cst_15 = arith.constant dense<0.000000e+00> : vector<256xf32>
    %49 = vector.multi_reduction <add>, %48, %cst_15 [1] : vector<256x256xf32> to vector<256xf32>
    %50 = vector.shape_cast %49 : vector<256xf32> to vector<256x1xf32>
    %51 = arith.addf %47, %50 : vector<256x1xf32>
    %52 = vector.extract_strided_slice %30 {offsets = [0, 3], sizes = [256, 1], strides = [1, 1]} : vector<256x4xf32> to vector<256x1xf32>
    %cst_16 = arith.constant dense<0.000000e+00> : vector<256xf32>
    %53 = vector.multi_reduction <add>, %29, %cst_16 [1] : vector<256x256xf32> to vector<256xf32>
    %54 = vector.shape_cast %53 : vector<256xf32> to vector<256x1xf32>
    %55 = arith.addf %52, %54 : vector<256x1xf32>
    %c0_17 = arith.constant 0 : index
    %c0_18 = arith.constant 0 : index
    %56 = vector.load %arg7[%c0_17, %c0_18] : memref<256x4xf32, #tpu.memory_space<vmem>>, vector<256x1xf32>
    tpu.vector_store %arg7[%c0_17, %c0_18], %35 {strides = array<i32>} : memref<256x4xf32, #tpu.memory_space<vmem>>, vector<256x1xf32>,
    %c0_19 = arith.constant 0 : index
    %c1 = arith.constant 1 : index
    %57 = vector.load %arg7[%c0_19, %c1] : memref<256x4xf32, #tpu.memory_space<vmem>>, vector<256x1xf32>
    tpu.vector_store %arg7[%c0_19, %c1], %46 {strides = array<i32>} : memref<256x4xf32, #tpu.memory_space<vmem>>, vector<256x1xf32>,
    %c0_20 = arith.constant 0 : index
    %c2 = arith.constant 2 : index
    %58 = vector.load %arg7[%c0_20, %c2] : memref<256x4xf32, #tpu.memory_space<vmem>>, vector<256x1xf32>
    tpu.vector_store %arg7[%c0_20, %c2], %51 {strides = array<i32>} : memref<256x4xf32, #tpu.memory_space<vmem>>, vector<256x1xf32>,
    %c0_21 = arith.constant 0 : index
    %c3 = arith.constant 3 : index
    %59 = vector.load %arg7[%c0_21, %c3] : memref<256x4xf32, #tpu.memory_space<vmem>>, vector<256x1xf32>
    tpu.vector_store %arg7[%c0_21, %c3], %55 {strides = array<i32>} : memref<256x4xf32, #tpu.memory_space<vmem>>, vector<256x1xf32>,
    %c0_i32_22 = arith.constant 0 : i32
    %60 = arith.cmpi eq, %arg1, %c0_i32_22 : i32
    %61 = arith.extui %60 : i1 to i32
    %c0_i32_23 = arith.constant 0 : i32
    %62 = arith.cmpi ne, %61, %c0_i32_23 : i32
    scf.if %62 {
      %63 = math.log %46 : vector<256x1xf32>
      %64 = arith.addf %35, %63 : vector<256x1xf32>
      %cst_24 = arith.constant 5.000000e-01 : f32
      %65 = vector.broadcast %cst_24 : f32 to vector<256x1xf32>
      %66 = arith.cmpf ogt, %55, %65 : vector<256x1xf32>
      %67 = arith.mulf %55, %64 : vector<256x1xf32>
      %68 = arith.subf %51, %67 : vector<256x1xf32>
      %cst_25 = arith.constant 1.000000e+00 : f32
      %69 = vector.broadcast %cst_25 : f32 to vector<256x1xf32>
      %70 = arith.maximumf %55, %69 : vector<256x1xf32>
      %71 = arith.divf %68, %70 : vector<256x1xf32>
      %cst_26 = arith.constant 0.000000e+00 : f32
      %72 = vector.broadcast %cst_26 : f32 to vector<256x1xf32>
      %73 = arith.select %66, %71, %72 : vector<256x1xi1>, vector<256x1xf32>
      %cst_27 = arith.constant -1.000000e+00 : f32
      %74 = vector.broadcast %cst_27 : f32 to vector<256x1xf32>
      %75 = arith.mulf %74, %73 : vector<256x1xf32>
      %76 = vector.shape_cast %75 : vector<256x1xf32> to vector<1x256x1xf32>
      %cst_28 = arith.constant dense<0.000000e+00> : vector<1xf32>
      %77 = vector.multi_reduction <add>, %76, %cst_28 [1, 2] : vector<1x256x1xf32> to vector<1xf32>
      %78 = vector.shape_cast %77 : vector<1xf32> to vector<1x1x1xf32>
      %79 = vector.extract %78[0, 0, 0] : f32 from vector<1x1x1xf32>
      %80 = vector.broadcast %79 : f32 to vector<8x128xf32>
      %c0_29 = arith.constant 0 : index
      %c0_30 = arith.constant 0 : index
      %81 = vector.load %arg6[%c0_29, %c0_30] : memref<8x128xf32, #tpu.memory_space<vmem>>, vector<8x128xf32>
      tpu.vector_store %arg6[%c0_29, %c0_30], %80 {strides = array<i32>} : memref<8x128xf32, #tpu.memory_space<vmem>>, vector<8x128xf32>,
    } else {
    }
    return
  }
  func.func @transform_0(%arg0: i32, %arg1: i32) -> (i32, i32) {
    %c0_i32 = arith.constant 0 : i32
    %c0_i32_0 = arith.constant 0 : i32
    return %arg0, %c0_i32 : i32, i32
  }
  func.func @transform_1(%arg0: i32, %arg1: i32) -> (i32, i32, i32) {
    %c0_i32 = arith.constant 0 : i32
    %c0_i32_0 = arith.constant 0 : i32
    %c0_i32_1 = arith.constant 0 : i32
    %c0_i32_2 = arith.constant 0 : i32
    return %c0_i32, %c0_i32_0, %c0_i32_1 : i32, i32, i32
  }
  func.func @transform_2(%arg0: i32, %arg1: i32) -> (i32, i32) {
    %c0_i32 = arith.constant 0 : i32
    %c0_i32_0 = arith.constant 0 : i32
    return %arg0, %c0_i32 : i32, i32
  }
  func.func @transform_3(%arg0: i32, %arg1: i32) -> (i32, i32) {
    %c0_i32 = arith.constant 0 : i32
    %c0_i32_0 = arith.constant 0 : i32
    return %c0_i32, %arg1 : i32, i32
  }
  func.func @transform_4(%arg0: i32, %arg1: i32) -> (i32, i32) {
    %c0_i32 = arith.constant 0 : i32
    %c0_i32_0 = arith.constant 0 : i32
    return %arg0, %c0_i32 : i32, i32
  }
}

</mosaic_0001>

<bundles_post_ra>
// kernel: tpu_custom_call.1
= control target key start
LH: loop header
LB: loop body
LE: loop exit
PB: predicated region body
PF: predicated region fallthrough
CT: control target
= control target key end

     0   :  { %9 = vsyncpa [#allocation4], 0  ;;  %s8108_s0 = inlined_call_operand.vmem [shape: f32[256,128], index: 0, kind: input, shape index: {}]   ;;  %s8109_s1 = inlined_call_operand.hbm [shape: f32[1,128,256], index: 1, kind: input, shape index: {}]   ;;  %s8110_s2 = inlined_call_operand.vmem [shape: s32[256,1], index: 2, kind: input, shape index: {}]   ;;  %s8111_s3 = inlined_call_operand.vmem [shape: s32[1,256], index: 3, kind: input, shape index: {}]   ;;  %s8112_s4 = inlined_call_operand.hbm [shape: f32[8,128], index: 4, kind: output, shape index: {}]  }
   0x1   :  { %10 = vsyncpa [#allocation5], 0  ;;  %s17_s17 = sshll.u32 %s8109_s1, 4  ;;  %s4482_s18 = smov [#allocation3]   ;;  %s18_s17 = int_to_ptr.hbm [resolvable:$true] %s17_s17 }
   0x2   :  { %s19_s19 = sshll.u32 %s4482_s18, 4  ;;  %s4483_s20 = smov 256   ;;  %s20_s19 = int_to_ptr.vmem [resolvable:$true] %s19_s19 }
   0x3   :  { %s4484_s21 = smov 16  }
   0x4   :  { %25 = dma.hbm_to_vmem [thread:$0]  %s18_s17, 4096, %s20_s19, [#allocation4], %s4483_s20, %s4483_s20, %s4484_s21  }
   0x5   :  { %4478 = dma.done.wait [#allocation4], 4096  }
   0x6   :  { %4479 = vsyncadd [#allocation4], 4294963200  ;;  %v4485_v0 = vmov 0   ;;  %v669_v1 = vld [vmem:[%s8110_s2 + $0x20] sm:$0xff]  ;;  %v667_v2 = vld [vmem:[%s8110_s2 + $0x10] sm:$0xff]  ;;  %vm38_vm0 = vcmask 31744  }
   0x7   :  { %4173 = vset.pattern.permute.xlu2 %v4485_v0  ;;  %4172 = vset.pattern.permute.xlu1 %v4485_v0  ;;  %v665_v3 = vld [vmem:[%s8110_s2] sm:$0xff]  ;;  %v137_v4 = vld [vmem:[#allocation3 + $0xf0] sm:$0xff]  ;;  %v138_v5 = vld [vmem:[#allocation3 + $0xf8] sm:$0xff]  ;;  %v8113_v55 = vmov 0.0   ;;  %vm71_vm1 = vcmask 7168   ;;  %v4487_v56 = vmov -inf  }
   0x8   :  { %4171 = vset.pattern.permute.xlu0 %v4485_v0  ;;  %711 = vperm.xlu2 %4173, %v669_v1   ;;  %v135_v6 = vld [vmem:[#allocation3 + $0xe0] sm:$0xff]  ;;  %v136_v7 = vld [vmem:[#allocation3 + $0xe8] sm:$0xff]  ;;  %v133_v8 = vld [vmem:[#allocation3 + $0xd0] sm:$0xff]  ;;  %40 = vst.msk [vmem:[#allocation2 + $0x8] sm:$0xff] %vm38_vm0, %v8113_v55  ;;  %s4488_s6 = smov 127   ;;  %s4490_s16 = smov 3  }
   0x9   :  { %705 = vperm.xlu1 %4172, %v667_v2   ;;  %699 = vperm.xlu0 %4171, %v665_v3   ;;  %v134_v9 = vld [vmem:[#allocation3 + $0xd8] sm:$0xff]  ;;  %v131_v10 = vld [vmem:[#allocation3 + $0xc0] sm:$0xff]  ;;  %v132_v11 = vld [vmem:[#allocation3 + $0xc8] sm:$0xff]  ;;  %73 = vst.msk [vmem:[#allocation2 + $0x8] sm:$0xff] %vm71_vm1, %v4487_v56  ;;  %s4084_s19 = sshll.u32 %s8112_s4, 4  ;;  %s4492_s20 = smov [#allocation6]   ;;  %s4085_s19 = int_to_ptr.hbm [resolvable:$true] %s4084_s19 }
   0xa   :  { %171 = vmatpush.msra.mxu0 %v137_v4  ;;  %4126 = vmatpush.msra.mxu2 %v137_v4  ;;  %v670_v12 = vld [vmem:[%s8110_s2 + $0x28] sm:$0xff]  ;;  %v668_v13 = vld [vmem:[%s8110_s2 + $0x18] sm:$0xff]  ;;  %v129_v15 = vld [vmem:[#allocation3 + $0xb0] sm:$0xff]  ;;  %39 = vst.msk [vmem:[#allocation2] sm:$0xff] %vm38_vm0, %v8113_v55  ;;  %s4082_s21 = sshll.u32 %s4492_s20, 4  ;;  %s4083_s21 = int_to_ptr.vmem [resolvable:$true] %s4082_s21 }
   0xb   :  { %284 = vmatpush.msra.mxu1 %v138_v5  ;;  %4142 = vmatpush.msra.mxu3 %v138_v5  ;;  %v666_v14 = vld [vmem:[%s8110_s2 + $0x8] sm:$0xff]  ;;  %v130_v16 = vld [vmem:[#allocation3 + $0xb8] sm:$0xff]  ;;  %v127_v17 = vld [vmem:[#allocation3 + $0xa0] sm:$0xff]  ;;  %41 = vst.msk [vmem:[#allocation2 + $0x10] sm:$0xff] %vm38_vm0, %v8113_v55 }
   0xc   :  { %172 = vmatpush.msra.mxu0 %v135_v6  ;;  %4127 = vmatpush.msra.mxu2 %v135_v6  ;;  %v128_v18 = vld [vmem:[#allocation3 + $0xa8] sm:$0xff]  ;;  %v125_v19 = vld [vmem:[#allocation3 + $0x90] sm:$0xff]  ;;  %v126_v20 = vld [vmem:[#allocation3 + $0x98] sm:$0xff]  ;;  %42 = vst.msk [vmem:[#allocation2 + $0x18] sm:$0xff] %vm38_vm0, %v8113_v55 }
   0xd   :  { %285 = vmatpush.msra.mxu1 %v136_v7  ;;  %4143 = vmatpush.msra.mxu3 %v136_v7  ;;  %v123_v21 = vld [vmem:[#allocation3 + $0x80] sm:$0xff]  ;;  %v124_v22 = vld [vmem:[#allocation3 + $0x88] sm:$0xff]  ;;  %v672_v24 = vld [vmem:[%s8110_s2 + $0x38] sm:$0xff]  ;;  %43 = vst.msk [vmem:[#allocation2 + $0x20] sm:$0xff] %vm38_vm0, %v8113_v55 }
   0xe   :  { %173 = vmatpush.msra.mxu0 %v133_v8  ;;  %4128 = vmatpush.msra.mxu2 %v133_v8  ;;  %v673_v23 = vld [vmem:[%s8110_s2 + $0x40] sm:$0xff]  ;;  %v671_v25 = vld [vmem:[%s8110_s2 + $0x30] sm:$0xff]  ;;  %v122_v27 = vld [vmem:[#allocation3 + $0x78] sm:$0xff]  ;;  %44 = vst.msk [vmem:[#allocation2 + $0x28] sm:$0xff] %vm38_vm0, %v8113_v55 }
   0xf   :  { %286 = vmatpush.msra.mxu1 %v134_v9  ;;  %4144 = vmatpush.msra.mxu3 %v134_v9  ;;  %v121_v26 = vld [vmem:[#allocation3 + $0x70] sm:$0xff]  ;;  %v119_v28 = vld [vmem:[#allocation3 + $0x60] sm:$0xff]  ;;  %v120_v29 = vld [vmem:[#allocation3 + $0x68] sm:$0xff]  ;;  %45 = vst.msk [vmem:[#allocation2 + $0x30] sm:$0xff] %vm38_vm0, %v8113_v55 }
  0x10   :  { %174 = vmatpush.msra.mxu0 %v131_v10  ;;  %4129 = vmatpush.msra.mxu2 %v131_v10  ;;  %v117_v30 = vld [vmem:[#allocation3 + $0x50] sm:$0xff]  ;;  %v118_v31 = vld [vmem:[#allocation3 + $0x58] sm:$0xff]  ;;  %v115_v32 = vld [vmem:[#allocation3 + $0x40] sm:$0xff]  ;;  %46 = vst.msk [vmem:[#allocation2 + $0x38] sm:$0xff] %vm38_vm0, %v8113_v55 }
  0x11   :  { %287 = vmatpush.msra.mxu1 %v132_v11  ;;  %4145 = vmatpush.msra.mxu3 %v132_v11  ;;  %v116_v33 = vld [vmem:[#allocation3 + $0x48] sm:$0xff]  ;;  %v676_v34 = vld [vmem:[%s8110_s2 + $0x58] sm:$0xff]  ;;  %v675_v35 = vld [vmem:[%s8110_s2 + $0x50] sm:$0xff]  ;;  %47 = vst.msk [vmem:[#allocation2 + $0x40] sm:$0xff] %vm38_vm0, %v8113_v55 }
  0x12   :  { %714 = vperm.xlu2 %4173, %v670_v12   ;;  %708 = vperm.xlu1 %4172, %v668_v13   ;;  %v674_v36 = vld [vmem:[%s8110_s2 + $0x48] sm:$0xff]  ;;  %v113_v37 = vld [vmem:[#allocation3 + $0x30] sm:$0xff]  ;;  %v114_v38 = vld [vmem:[#allocation3 + $0x38] sm:$0xff]  ;;  %48 = vst.msk [vmem:[#allocation2 + $0x48] sm:$0xff] %vm38_vm0, %v8113_v55 }
  0x13   :  { %702 = vperm.xlu0 %4171, %v666_v14   ;;  %175 = vmatpush.msra.mxu0 %v129_v15  ;;  %v111_v39 = vld [vmem:[#allocation3 + $0x20] sm:$0xff]  ;;  %v112_v40 = vld [vmem:[#allocation3 + $0x28] sm:$0xff]  ;;  %v109_v41 = vld [vmem:[#allocation3 + $0x10] sm:$0xff]  ;;  %49 = vst.msk [vmem:[#allocation2 + $0x50] sm:$0xff] %vm38_vm0, %v8113_v55 }
  0x14   :  { %4130 = vmatpush.msra.mxu2 %v129_v15  ;;  %288 = vmatpush.msra.mxu1 %v130_v16  ;;  %v110_v42 = vld [vmem:[#allocation3 + $0x18] sm:$0xff]  ;;  %v107_v43 = vld [vmem:[#allocation3] sm:$0xff]  ;;  %v108_v44 = vld [vmem:[#allocation3 + $0x8] sm:$0xff]  ;;  %50 = vst.msk [vmem:[#allocation2 + $0x58] sm:$0xff] %vm38_vm0, %v8113_v55 }
  0x15   :  { %4146 = vmatpush.msra.mxu3 %v130_v16  ;;  %176 = vmatpush.msra.mxu0 %v127_v17  ;;  %v139_v45 = vld [vmem:[%s8108_s0] sm:$0xff]  ;;  %v679_v47 = vld [vmem:[%s8110_s2 + $0x70] sm:$0xff]  ;;  %v678_v48 = vld [vmem:[%s8110_s2 + $0x68] sm:$0xff]  ;;  %51 = vst.msk [vmem:[#allocation2 + $0x60] sm:$0xff] %vm38_vm0, %v8113_v55 }
  0x16   :  { %4131 = vmatpush.msra.mxu2 %v127_v17  ;;  %289 = vmatpush.msra.mxu1 %v128_v18  ;;  %v155_v46 = vld [vmem:[%s8108_s0 + $0x80] sm:$0xff]  ;;  %v140_v50 = vld [vmem:[%s8108_s0 + $0x8] sm:$0xff]  ;;  %v680_v54 = vld [vmem:[%s8110_s2 + $0x78] sm:$0xff]  ;;  %52 = vst.msk [vmem:[#allocation2 + $0x68] sm:$0xff] %vm38_vm0, %v8113_v55 }
  0x17   :  { %4147 = vmatpush.msra.mxu3 %v128_v18  ;;  %177 = vmatpush.msra.mxu0 %v125_v19  ;;  %v677_v49 = vld [vmem:[%s8110_s2 + $0x60] sm:$0xff]  ;;  %v156_v51 = vld [vmem:[%s8108_s0 + $0x88] sm:$0xff]  ;;  %v141_v57 = vld [vmem:[%s8108_s0 + $0x10] sm:$0xff]  ;;  %53 = vst.msk [vmem:[#allocation2 + $0x70] sm:$0xff] %vm38_vm0, %v8113_v55 }
  0x18   :  { %4132 = vmatpush.msra.mxu2 %v125_v19  ;;  %290 = vmatpush.msra.mxu1 %v126_v20  ;;  %v682_v52 = vld [vmem:[%s8110_s2 + $0x88] sm:$0xff]  ;;  %v681_v53 = vld [vmem:[%s8110_s2 + $0x80] sm:$0xff]  ;;  %v157_v58 = vld [vmem:[%s8108_s0 + $0x90] sm:$0xff]  ;;  %54 = vst.msk [vmem:[#allocation2 + $0x78] sm:$0xff] %vm38_vm0, %v8113_v55 }
  0x19   :  { %4148 = vmatpush.msra.mxu3 %v126_v20  ;;  %178 = vmatpush.msra.mxu0 %v123_v21  ;;  %v685_v59 = vld [vmem:[%s8110_s2 + $0xa0] sm:$0xff]  ;;  %v684_v60 = vld [vmem:[%s8110_s2 + $0x98] sm:$0xff]  ;;  %v683_v61 = vld [vmem:[%s8110_s2 + $0x90] sm:$0xff]  ;;  %55 = vst.msk [vmem:[#allocation2 + $0x80] sm:$0xff] %vm38_vm0, %v8113_v55 }
  0x1a   :  { %4133 = vmatpush.msra.mxu2 %v123_v21  ;;  %291 = vmatpush.msra.mxu1 %v124_v22  ;;  %v142_v62 = vld [vmem:[%s8108_s0 + $0x18] sm:$0xff]  ;;  %v687_v1 = vld [vmem:[%s8110_s2 + $0xb0] sm:$0xff]  ;;  %v686_v2 = vld [vmem:[%s8110_s2 + $0xa8] sm:$0xff]  ;;  %56 = vst.msk [vmem:[#allocation2 + $0x88] sm:$0xff] %vm38_vm0, %v8113_v55 }
  0x1b   :  { %4149 = vmatpush.msra.mxu3 %v124_v22  ;;  %723 = vperm.xlu2 %4173, %v673_v23   ;;  %v158_v63 = vld [vmem:[%s8108_s0 + $0x98] sm:$0xff]  ;;  %v143_v3 = vld [vmem:[%s8108_s0 + $0x20] sm:$0xff]  ;;  %57 = vst.msk [vmem:[#allocation2 + $0x90] sm:$0xff] %vm38_vm0, %v8113_v55  ;;  %v691_v5 = vld [vmem:[%s8110_s2 + $0xd0] sm:$0xff] }
  0x1c   :  { %720 = vperm.xlu1 %4172, %v672_v24   ;;  %717 = vperm.xlu0 %4171, %v671_v25   ;;  %v688_v0 = vld [vmem:[%s8110_s2 + $0xb8] sm:$0xff]  ;;  %v159_v4 = vld [vmem:[%s8108_s0 + $0xa0] sm:$0xff]  ;;  %58 = vst.msk [vmem:[#allocation2 + $0x98] sm:$0xff] %vm38_vm0, %v8113_v55  ;;  %v690_v6 = vld [vmem:[%s8110_s2 + $0xc8] sm:$0xff] }
  0x1d   :  { %179 = vmatpush.msra.mxu0 %v121_v26  ;;  %4134 = vmatpush.msra.mxu2 %v121_v26  ;;  %59 = vst.msk [vmem:[#allocation2 + $0xa0] sm:$0xff] %vm38_vm0, %v8113_v55  ;;  %v689_v7 = vld [vmem:[%s8110_s2 + $0xc0] sm:$0xff]  ;;  %v144_v8 = vld [vmem:[%s8108_s0 + $0x28] sm:$0xff]  ;;  %v692_v12 = vld [vmem:[%s8110_s2 + $0xd8] sm:$0xff] }
  0x1e   :  { %292 = vmatpush.msra.mxu1 %v122_v27  ;;  %4150 = vmatpush.msra.mxu3 %v122_v27  ;;  %60 = vst.msk [vmem:[#allocation2 + $0xa8] sm:$0xff] %vm38_vm0, %v8113_v55  ;;  %v160_v9 = vld [vmem:[%s8108_s0 + $0xa8] sm:$0xff]  ;;  %v693_v11 = vld [vmem:[%s8110_s2 + $0xe0] sm:$0xff]  ;;  %v145_v13 = vld [vmem:[%s8108_s0 + $0x30] sm:$0xff] }
  0x1f   :  { %180 = vmatpush.msra.mxu0 %v119_v28  ;;  %4135 = vmatpush.msra.mxu2 %v119_v28  ;;  %61 = vst.msk [vmem:[#allocation2 + $0xb0] sm:$0xff] %vm38_vm0, %v8113_v55  ;;  %v694_v10 = vld [vmem:[%s8110_s2 + $0xe8] sm:$0xff]  ;;  %v161_v14 = vld [vmem:[%s8108_s0 + $0xb0] sm:$0xff]  ;;  %v696_v15 = vld [vmem:[%s8110_s2 + $0xf8] sm:$0xff] }
  0x20   :  { %293 = vmatpush.msra.mxu1 %v120_v29  ;;  %4151 = vmatpush.msra.mxu3 %v120_v29  ;;  %62 = vst.msk [vmem:[#allocation2 + $0xb8] sm:$0xff] %vm38_vm0, %v8113_v55  ;;  %v4730_v16 = vld [vmem:[#allocation2 + $0x8] sm:$0xff]  ;;  %v695_v17 = vld [vmem:[%s8110_s2 + $0xf0] sm:$0xff]  ;;  %v146_v18 = vld [vmem:[%s8108_s0 + $0x38] sm:$0xff] }
  0x21   :  { %181 = vmatpush.msra.mxu0 %v117_v30  ;;  %4136 = vmatpush.msra.mxu2 %v117_v30  ;;  %63 = vst.msk [vmem:[#allocation2 + $0xc0] sm:$0xff] %vm38_vm0, %v8113_v55  ;;  %v162_v19 = vld [vmem:[%s8108_s0 + $0xb8] sm:$0xff]  ;;  %v147_v23 = vld [vmem:[%s8108_s0 + $0x40] sm:$0xff]  ;;  %v148_v28 = vld [vmem:[%s8108_s0 + $0x48] sm:$0xff] }
  0x22   :  { %294 = vmatpush.msra.mxu1 %v118_v31  ;;  %4152 = vmatpush.msra.mxu3 %v118_v31  ;;  %64 = vst.msk [vmem:[#allocation2 + $0xc8] sm:$0xff] %vm38_vm0, %v8113_v55  ;;  %v163_v24 = vld [vmem:[%s8108_s0 + $0xc0] sm:$0xff]  ;;  %v164_v29 = vld [vmem:[%s8108_s0 + $0xc8] sm:$0xff] }
  0x23   :  { %182 = vmatpush.msra.mxu0 %v115_v32  ;;  %4137 = vmatpush.msra.mxu2 %v115_v32  ;;  %65 = vst.msk [vmem:[#allocation2 + $0xd0] sm:$0xff] %vm38_vm0, %v8113_v55 }
  0x24   :  { %295 = vmatpush.msra.mxu1 %v116_v33  ;;  %4153 = vmatpush.msra.mxu3 %v116_v33  ;;  %66 = vst.msk [vmem:[#allocation2 + $0xd8] sm:$0xff] %vm38_vm0, %v8113_v55  ;;  %v149_v33 = vld [vmem:[%s8108_s0 + $0x50] sm:$0xff] }
  0x25   :  { %732 = vperm.xlu2 %4173, %v676_v34   ;;  %729 = vperm.xlu1 %4172, %v675_v35   ;;  %67 = vst.msk [vmem:[#allocation2 + $0xe0] sm:$0xff] %vm38_vm0, %v8113_v55  ;;  %v165_v34 = vld [vmem:[%s8108_s0 + $0xd0] sm:$0xff] }
  0x26   :  { %726 = vperm.xlu0 %4171, %v674_v36   ;;  %183 = vmatpush.msra.mxu0 %v113_v37  ;;  %68 = vst.msk [vmem:[#allocation2 + $0xe8] sm:$0xff] %vm38_vm0, %v8113_v55 }
  0x27   :  { %4138 = vmatpush.msra.mxu2 %v113_v37  ;;  %296 = vmatpush.msra.mxu1 %v114_v38  ;;  %69 = vst.msk [vmem:[#allocation2 + $0xf0] sm:$0xff] %vm38_vm0, %v8113_v55 }
  0x28   :  { %4154 = vmatpush.msra.mxu3 %v114_v38  ;;  %184 = vmatpush.msra.mxu0 %v111_v39  ;;  %70 = vst.msk [vmem:[#allocation2 + $0xf8] sm:$0xff] %vm38_vm0, %v8113_v55  ;;  %v150_v38 = vld [vmem:[%s8108_s0 + $0x58] sm:$0xff] }
  0x29   :  { %4139 = vmatpush.msra.mxu2 %v111_v39  ;;  %297 = vmatpush.msra.mxu1 %v112_v40  ;;  %72 = vst.msk [vmem:[#allocation2] sm:$0xff] %vm71_vm1, %v4487_v56  ;;  %v166_v39 = vld [vmem:[%s8108_s0 + $0xd8] sm:$0xff] }
  0x2a   :  { %4155 = vmatpush.msra.mxu3 %v112_v40  ;;  %185 = vmatpush.msra.mxu0 %v109_v41  ;;  %74 = vst.msk [vmem:[#allocation2 + $0x10] sm:$0xff] %vm71_vm1, %v4487_v56 }
  0x2b   :  { %4140 = vmatpush.msra.mxu2 %v109_v41  ;;  %298 = vmatpush.msra.mxu1 %v110_v42  ;;  %75 = vst.msk [vmem:[#allocation2 + $0x18] sm:$0xff] %vm71_vm1, %v4487_v56 }
  0x2c   :  { %4156 = vmatpush.msra.mxu3 %v110_v42  ;;  %186 = vmatpush.msra.mxu0 %v107_v43  ;;  %76 = vst.msk [vmem:[#allocation2 + $0x20] sm:$0xff] %vm71_vm1, %v4487_v56 }
  0x2d   :  { %4141 = vmatpush.msra.mxu2 %v107_v43  ;;  %299 = vmatpush.msra.mxu1 %v108_v44  ;;  %8343 = vst [vmem:[#allocation9_spill] sm:$0xff] %v4730_v16 }
  0x2e   :  { %4157 = vmatpush.msra.mxu3 %v108_v44  ;;  %187 = vmatmul.f32.vlgmr.msra.gmra.mxu0 %v139_v45  ;;  %77 = vst.msk [vmem:[#allocation2 + $0x28] sm:$0xff] %vm71_vm1, %v4487_v56 }
  0x2f   :  { %235 = vmatmul.f32.vlgmr.msra.gmra.mxu2 %v155_v46  ;;  %300 = vmatmul.f32.vlgmr.msra.gmra.mxu1 %v139_v45  ;;  %78 = vst.msk [vmem:[#allocation2 + $0x30] sm:$0xff] %vm71_vm1, %v4487_v56 }
  0x30   :  { %348 = vmatmul.f32.vlgmr.msra.gmra.mxu3 %v155_v46  ;;  %741 = vperm.xlu2 %4173, %v679_v47   ;;  %79 = vst.msk [vmem:[#allocation2 + $0x38] sm:$0xff] %vm71_vm1, %v4487_v56  ;;  %v4767_v22 = vld [vmem:[#allocation2] sm:$0xff] }
  0x31   :  { %738 = vperm.xlu1 %4172, %v678_v48   ;;  %735 = vperm.xlu0 %4171, %v677_v49   ;;  %80 = vst.msk [vmem:[#allocation2 + $0x40] sm:$0xff] %vm71_vm1, %v4487_v56  ;;  %v4761_v20 = vld [vmem:[#allocation2 + $0x10] sm:$0xff]  ;;  %v151_v46 = vld [vmem:[%s8108_s0 + $0x60] sm:$0xff] }
  0x32   :  { %81 = vst.msk [vmem:[#allocation2 + $0x48] sm:$0xff] %vm71_vm1, %v4487_v56  ;;  %v4801_v27 = vld [vmem:[#allocation2 + $0x18] sm:$0xff]  ;;  %v167_v47 = vld [vmem:[%s8108_s0 + $0xe0] sm:$0xff] }
  0x33   :  { %82 = vst.msk [vmem:[#allocation2 + $0x50] sm:$0xff] %vm71_vm1, %v4487_v56  ;;  %v4763_v21 = vld [vmem:[#allocation2 + $0x20] sm:$0xff] }
  0x34   :  { %83 = vst.msk [vmem:[#allocation2 + $0x58] sm:$0xff] %vm71_vm1, %v4487_v56 }
  0x35   :  { %84 = vst.msk [vmem:[#allocation2 + $0x60] sm:$0xff] %vm71_vm1, %v4487_v56  ;;  %v4795_v25 = vld [vmem:[#allocation2 + $0x28] sm:$0xff] }
  0x36   :  { %190 = vmatmul.f32.gmra.mxu0 %v140_v50  ;;  %85 = vst.msk [vmem:[#allocation2 + $0x68] sm:$0xff] %vm71_vm1, %v4487_v56  ;;  %v4835_v32 = vld [vmem:[#allocation2 + $0x30] sm:$0xff] }
  0x37   :  { %238 = vmatmul.f32.gmra.mxu2 %v156_v51  ;;  %303 = vmatmul.f32.gmra.mxu1 %v140_v50  ;;  %8344 = vst [vmem:[#allocation10_spill] sm:$0xff] %v4761_v20  ;;  %v4797_v26 = vld [vmem:[#allocation2 + $0x38] sm:$0xff] }
  0x38   :  { %351 = vmatmul.f32.gmra.mxu3 %v156_v51  ;;  %750 = vperm.xlu2 %4173, %v682_v52   ;;  %8345 = vst [vmem:[#allocation11_spill] sm:$0xff] %v4763_v21  ;;  %v4829_v30 = vld [vmem:[#allocation2 + $0x40] sm:$0xff] }
  0x39   :  { %747 = vperm.xlu1 %4172, %v681_v53   ;;  %744 = vperm.xlu0 %4171, %v680_v54   ;;  %86 = vst.msk [vmem:[#allocation2 + $0x70] sm:$0xff] %vm71_vm1, %v4487_v56  ;;  %v4855_v37 = vld [vmem:[#allocation2 + $0x48] sm:$0xff] }
  0x3a   :  { %8346 = vst [vmem:[#allocation12_spill] sm:$0xff] %v4767_v22  ;;  %v4831_v31 = vld [vmem:[#allocation2 + $0x50] sm:$0xff]  ;;  %v152_v53 = vld [vmem:[%s8108_s0 + $0x68] sm:$0xff] }
  0x3b   :  { %87 = vst.msk [vmem:[#allocation2 + $0x78] sm:$0xff] %vm71_vm1, %v4487_v56  ;;  %v4851_v35 = vld [vmem:[#allocation2 + $0x58] sm:$0xff]  ;;  %v168_v54 = vld [vmem:[%s8108_s0 + $0xe8] sm:$0xff] }
  0x3c   :  { %88 = vst.msk [vmem:[#allocation2 + $0x80] sm:$0xff] %vm71_vm1, %v4487_v56  ;;  %v4877_v44 = vld [vmem:[#allocation2 + $0x60] sm:$0xff] }
  0x3d   :  { %89 = vst.msk [vmem:[#allocation2 + $0x88] sm:$0xff] %vm71_vm1, %v4487_v56  ;;  %v4853_v36 = vld [vmem:[#allocation2 + $0x68] sm:$0xff] }
  0x3e   :  { %193 = vmatmul.f32.gmra.mxu0 %v141_v57  ;;  %90 = vst.msk [vmem:[#allocation2 + $0x90] sm:$0xff] %vm71_vm1, %v4487_v56 }
  0x3f   :  { %241 = vmatmul.f32.gmra.mxu2 %v157_v58  ;;  %306 = vmatmul.f32.gmra.mxu1 %v141_v57  ;;  %91 = vst.msk [vmem:[#allocation2 + $0x98] sm:$0xff] %vm71_vm1, %v4487_v56 }
  0x40   :  { %354 = vmatmul.f32.gmra.mxu3 %v157_v58  ;;  %759 = vperm.xlu2 %4173, %v685_v59   ;;  %92 = vst.msk [vmem:[#allocation2 + $0xa0] sm:$0xff] %vm71_vm1, %v4487_v56  ;;  %v4869_v40 = vld [vmem:[#allocation2 + $0x70] sm:$0xff] }
  0x41   :  { %756 = vperm.xlu1 %4172, %v684_v60   ;;  %753 = vperm.xlu0 %4171, %v683_v61   ;;  %93 = vst.msk [vmem:[#allocation2 + $0xa8] sm:$0xff] %vm71_vm1, %v4487_v56  ;;  %v153_v60 = vld [vmem:[%s8108_s0 + $0x70] sm:$0xff] }
  0x42   :  { %8347 = vst [vmem:[#allocation13_spill] sm:$0xff] %v4795_v25  ;;  %v4895_v49 = vld [vmem:[#allocation2 + $0x78] sm:$0xff]  ;;  %v169_v61 = vld [vmem:[%s8108_s0 + $0xf0] sm:$0xff] }
  0x43   :  { %8348 = vst [vmem:[#allocation14_spill] sm:$0xff] %v4797_v26  ;;  %v4871_v41 = vld [vmem:[#allocation2 + $0x80] sm:$0xff] }
  0x44   :  { %94 = vst.msk [vmem:[#allocation2 + $0xb0] sm:$0xff] %vm71_vm1, %v4487_v56  ;;  %v4893_v48 = vld [vmem:[#allocation2 + $0x88] sm:$0xff] }
  0x45   :  { %8349 = vst [vmem:[#allocation15_spill] sm:$0xff] %v4801_v27 }
  0x46   :  { %196 = vmatmul.f32.gmra.mxu0 %v142_v62  ;;  %95 = vst.msk [vmem:[#allocation2 + $0xb8] sm:$0xff] %vm71_vm1, %v4487_v56 }
  0x47   :  { %244 = vmatmul.f32.gmra.mxu2 %v158_v63  ;;  %309 = vmatmul.f32.gmra.mxu1 %v142_v62  ;;  %96 = vst.msk [vmem:[#allocation2 + $0xc0] sm:$0xff] %vm71_vm1, %v4487_v56 }
  0x48   :  { %357 = vmatmul.f32.gmra.mxu3 %v158_v63  ;;  %768 = vperm.xlu2 %4173, %v688_v0   ;;  %97 = vst.msk [vmem:[#allocation2 + $0xc8] sm:$0xff] %vm71_vm1, %v4487_v56  ;;  %v154_v63 = vld [vmem:[%s8108_s0 + $0x78] sm:$0xff] }
  0x49   :  { %765 = vperm.xlu1 %4172, %v687_v1   ;;  %762 = vperm.xlu0 %4171, %v686_v2   ;;  %98 = vst.msk [vmem:[#allocation2 + $0xd0] sm:$0xff] %vm71_vm1, %v4487_v56  ;;  %v170_v0 = vld [vmem:[%s8108_s0 + $0xf8] sm:$0xff] }
  0x4a   :  { %99 = vst.msk [vmem:[#allocation2 + $0xd8] sm:$0xff] %vm71_vm1, %v4487_v56 }
  0x4b   :  { %100 = vst.msk [vmem:[#allocation2 + $0xe0] sm:$0xff] %vm71_vm1, %v4487_v56 }
  0x4c   :  { %101 = vst.msk [vmem:[#allocation2 + $0xe8] sm:$0xff] %vm71_vm1, %v4487_v56 }
  0x4d   :  { %8350 = vst [vmem:[#allocation16_spill] sm:$0xff] %v4829_v30 }
  0x4e   :  { %199 = vmatmul.f32.gmra.mxu0 %v143_v3  ;;  %8351 = vst [vmem:[#allocation17_spill] sm:$0xff] %v4831_v31 }
  0x4f   :  { %247 = vmatmul.f32.gmra.mxu2 %v159_v4  ;;  %312 = vmatmul.f32.gmra.mxu1 %v143_v3  ;;  %102 = vst.msk [vmem:[#allocation2 + $0xf0] sm:$0xff] %vm71_vm1, %v4487_v56 }
  0x50   :  { %360 = vmatmul.f32.gmra.mxu3 %v159_v4  ;;  %777 = vperm.xlu2 %4173, %v691_v5   ;;  %8352 = vst [vmem:[#allocation18_spill] sm:$0xff] %v4835_v32 }
  0x51   :  { %774 = vperm.xlu1 %4172, %v690_v6   ;;  %771 = vperm.xlu0 %4171, %v689_v7   ;;  %103 = vst.msk [vmem:[#allocation2 + $0xf8] sm:$0xff] %vm71_vm1, %v4487_v56  ;;  %v4913_v56 = vld [vmem:[#allocation2 + $0xa0] sm:$0xff] }
  0x52   :  { %8353 = vst [vmem:[#allocation19_spill] sm:$0xff] %v4851_v35 }
  0x53   :  { %8354 = vst [vmem:[#allocation20_spill] sm:$0xff] %v4853_v36 }
  0x54   :  { %8355 = vst [vmem:[#allocation21_spill] sm:$0xff] %v4855_v37 }
  0x55   :  { %8356 = vst [vmem:[#allocation22_spill] sm:$0xff] %v4869_v40 }
  0x56   :  { %202 = vmatmul.f32.gmra.mxu0 %v144_v8  ;;  %8357 = vst [vmem:[#allocation23_spill] sm:$0xff] %v4871_v41 }
  0x57   :  { %250 = vmatmul.f32.gmra.mxu2 %v160_v9  ;;  %315 = vmatmul.f32.gmra.mxu1 %v144_v8  ;;  %8360 = vst [vmem:[#allocation26_spill] sm:$0xff] %v4877_v44 }
  0x58   :  { %363 = vmatmul.f32.gmra.mxu3 %v160_v9  ;;  %786 = vperm.xlu2 %4173, %v694_v10   ;;  %8362 = vst [vmem:[#allocation28_spill] sm:$0xff] %v4893_v48 }
  0x59   :  { %783 = vperm.xlu1 %4172, %v693_v11   ;;  %780 = vperm.xlu0 %4171, %v692_v12   ;;  %8363 = vst [vmem:[#allocation29_spill] sm:$0xff] %v4895_v49 }
  0x5a   :  { %8367 = vst [vmem:[#allocation33_spill] sm:$0xff] %v4913_v56 }
  0x5e   :  { %205 = vmatmul.f32.gmra.mxu0 %v145_v13 }
  0x5f   :  { %253 = vmatmul.f32.gmra.mxu2 %v161_v14  ;;  %318 = vmatmul.f32.gmra.mxu1 %v145_v13 }
  0x60   :  { %366 = vmatmul.f32.gmra.mxu3 %v161_v14  ;;  %1758 = vrot.lane.b32.xlu2 %v4730_v16, %s4488_s6 }
  0x61   :  { %792 = vperm.xlu1 %4172, %v696_v15   ;;  %789 = vperm.xlu0 %4171, %v695_v17  }
  0x62   :  { %v4875_v43 = vpop.permute.xlu2 %711 }
  0x63   :  { %8359 = vst [vmem:[#allocation25_spill] sm:$0xff] %v4875_v43 }
  0x66   :  { %208 = vmatmul.f32.gmra.mxu0 %v146_v18 }
  0x67   :  { %256 = vmatmul.f32.gmra.mxu2 %v162_v19  ;;  %321 = vmatmul.f32.gmra.mxu1 %v146_v18 }
  0x68   :  { %369 = vmatmul.f32.gmra.mxu3 %v162_v19  ;;  %1764 = vrot.lane.b32.xlu2 %v4763_v21, %s4488_s6 }
  0x69   :  { %1760 = vrot.lane.b32.xlu1 %v4761_v20, %s4488_s6  ;;  %1756 = vrot.lane.b32.xlu0 %v4767_v22, %s4488_s6 }
  0x6c   :  { %v4899_v51 = vpop.permute.xlu2 %714 }
  0x6d   :  { %8365 = vst [vmem:[#allocation31_spill] sm:$0xff] %v4899_v51 }
  0x6e   :  { %211 = vmatmul.f32.gmra.mxu0 %v147_v23 }
  0x6f   :  { %259 = vmatmul.f32.gmra.mxu2 %v163_v24  ;;  %324 = vmatmul.f32.gmra.mxu1 %v147_v23 }
  0x70   :  { %372 = vmatmul.f32.gmra.mxu3 %v163_v24  ;;  %1770 = vrot.lane.b32.xlu2 %v4797_v26, %s4488_s6 }
  0x71   :  { %1766 = vrot.lane.b32.xlu1 %v4795_v25, %s4488_s6  ;;  %1762 = vrot.lane.b32.xlu0 %v4801_v27, %s4488_s6 }
  0x75   :  { %v4919_v58 = vpop.permute.xlu2 %723 }
  0x76   :  { %214 = vmatmul.f32.gmra.mxu0 %v148_v28  ;;  %8369 = vst [vmem:[#allocation35_spill] sm:$0xff] %v4919_v58 }
  0x77   :  { %262 = vmatmul.f32.gmra.mxu2 %v164_v29  ;;  %327 = vmatmul.f32.gmra.mxu1 %v148_v28 }
  0x78   :  { %375 = vmatmul.f32.gmra.mxu3 %v164_v29  ;;  %1776 = vrot.lane.b32.xlu2 %v4831_v31, %s4488_s6 }
  0x79   :  { %1772 = vrot.lane.b32.xlu1 %v4829_v30, %s4488_s6  ;;  %1768 = vrot.lane.b32.xlu0 %v4835_v32, %s4488_s6 }
  0x7b   :  { %v4873_v42 = vpop.permute.xlu1 %705  ;;  %v4879_v45 = vpop.permute.xlu0 %699 }
  0x7c   :  { %8358 = vst [vmem:[#allocation24_spill] sm:$0xff] %v4873_v42 }
  0x7d   :  { %8361 = vst [vmem:[#allocation27_spill] sm:$0xff] %v4879_v45 }
  0x7e   :  { %217 = vmatmul.f32.gmra.mxu0 %v149_v33 }
  0x7f   :  { %265 = vmatmul.f32.gmra.mxu2 %v165_v34  ;;  %330 = vmatmul.f32.gmra.mxu1 %v149_v33  ;;  %v4937_v1 = vpop.permute.xlu2 %732 }
  0x80   :  { %378 = vmatmul.f32.gmra.mxu3 %v165_v34  ;;  %1782 = vrot.lane.b32.xlu2 %v4853_v36, %s4488_s6  ;;  %8372 = vst [vmem:[#allocation38_spill] sm:$0xff] %v4937_v1 }
  0x81   :  { %1778 = vrot.lane.b32.xlu1 %v4851_v35, %s4488_s6  ;;  %1774 = vrot.lane.b32.xlu0 %v4855_v37, %s4488_s6 }
  0x84   :  { %v4897_v50 = vpop.permute.xlu1 %708 }
  0x85   :  { %8364 = vst [vmem:[#allocation30_spill] sm:$0xff] %v4897_v50  ;;  %v4903_v52 = vpop.permute.xlu0 %702 }
  0x86   :  { %220 = vmatmul.f32.gmra.mxu0 %v150_v38  ;;  %8366 = vst [vmem:[#allocation32_spill] sm:$0xff] %v4903_v52 }
  0x87   :  { %268 = vmatmul.f32.gmra.mxu2 %v166_v39  ;;  %333 = vmatmul.f32.gmra.mxu1 %v150_v38 }
  0x88   :  { %381 = vmatmul.f32.gmra.mxu3 %v166_v39  ;;  %1788 = vrot.lane.b32.xlu2 %v4871_v41, %s4488_s6 }
  0x89   :  { %1784 = vrot.lane.b32.xlu1 %v4869_v40, %s4488_s6  ;;  %1780 = vrot.lane.b32.xlu0 %v4877_v44, %s4488_s6 }
  0x8a   :  { %v4947_v8 = vpop.permute.xlu2 %741 }
  0x8b   :  { %8376 = vst [vmem:[#allocation42_spill] sm:$0xff] %v4947_v8 }
  0x8e   :  { %223 = vmatmul.f32.gmra.mxu0 %v151_v46  ;;  %v4917_v57 = vpop.permute.xlu1 %720  ;;  %v4921_v59 = vpop.permute.xlu0 %717 }
  0x8f   :  { %271 = vmatmul.f32.gmra.mxu2 %v167_v47  ;;  %336 = vmatmul.f32.gmra.mxu1 %v151_v46  ;;  %8368 = vst [vmem:[#allocation34_spill] sm:$0xff] %v4917_v57 }
  0x90   :  { %384 = vmatmul.f32.gmra.mxu3 %v167_v47  ;;  %8370 = vst [vmem:[#allocation36_spill] sm:$0xff] %v4921_v59 }
  0x91   :  { %1790 = vrot.lane.b32.xlu1 %v4893_v48, %s4488_s6  ;;  %1786 = vrot.lane.b32.xlu0 %v4895_v49, %s4488_s6 }
  0x92   :  { %v4967_v29 = vpop.permute.xlu2 %750 }
  0x93   :  { %8381 = vst [vmem:[#allocation47_spill] sm:$0xff] %v4967_v29 }
  0x96   :  { %226 = vmatmul.f32.gmra.mxu0 %v152_v53 }
  0x97   :  { %274 = vmatmul.f32.gmra.mxu2 %v168_v54  ;;  %339 = vmatmul.f32.gmra.mxu1 %v152_v53  ;;  %v4929_v62 = vpop.permute.xlu1 %729 }
  0x98   :  { %387 = vmatmul.f32.gmra.mxu3 %v168_v54  ;;  %8371 = vst [vmem:[#allocation37_spill] sm:$0xff] %v4929_v62  ;;  %v4939_v2 = vpop.permute.xlu0 %726 }
  0x99   :  { %1796 = vrot.lane.b32.xlu1 %v4913_v56, %s4488_s6  ;;  %8373 = vst [vmem:[#allocation39_spill] sm:$0xff] %v4939_v2 }
  0x9e   :  { %229 = vmatmul.f32.gmra.mxu0 %v153_v60 }
  0x9f   :  { %277 = vmatmul.f32.gmra.mxu2 %v169_v61  ;;  %342 = vmatmul.f32.gmra.mxu1 %v153_v60 }
  0xa0   :  { %390 = vmatmul.f32.gmra.mxu3 %v169_v61 }
  0xa3   :  { %v4943_v6 = vpop.permute.xlu1 %738  ;;  %v4949_v9 = vpop.permute.xlu0 %735 }
  0xa4   :  { %8374 = vst [vmem:[#allocation40_spill] sm:$0xff] %v4943_v6 }
  0xa5   :  { %8377 = vst [vmem:[#allocation43_spill] sm:$0xff] %v4949_v9 }
  0xa6   :  { %232 = vmatmul.f32.gmra.mxu0 %v154_v63 }
  0xa7   :  { %280 = vmatmul.f32.gmra.mxu2 %v170_v0  ;;  %345 = vmatmul.f32.gmra.mxu1 %v154_v63 }
  0xa8   :  { %393 = vmatmul.f32.gmra.mxu3 %v170_v0 }
  0xab   :  { %v188_v3 = vpop.f32.mrf.mxu0  ;;  %v4963_v24 = vpop.permute.xlu1 %747 }
  0xac   :  { %v4941_v4 = vmul.f32 14.285714, %v188_v3  ;;  %v301_v5 = vpop.f32.mrf.mxu1  ;;  %8380 = vst [vmem:[#allocation46_spill] sm:$0xff] %v4963_v24  ;;  %v4969_v33 = vpop.permute.xlu0 %744 }
  0xad   :  { %v4945_v7 = vmul.f32 14.285714, %v301_v5  ;;  %8382 = vst [vmem:[#allocation48_spill] sm:$0xff] %v4969_v33  ;;  %v4985_v5 = vpop.permute.xlu2 %759 }
  0xae   :  { %8387 = vst [vmem:[#allocation53_spill] sm:$0xff] %v4985_v5  ;;  %v5007_v5 = vld [vmem:[#allocation2 + $0x90] sm:$0xff] }
  0xaf   :  { %8375 = vst [vmem:[#allocation41_spill] sm:$0xff] %v4945_v7  ;;  %v1084_v10 = vmax.f32 %v4941_v4, %v4945_v7 }
  0xb0   :  { %8396 = vst [vmem:[#allocation62_spill] sm:$0xff] %v5007_v5 }
  0xb1   :  { %1085 = vmax.xlane.f32.xlu2 %v1084_v10 }
  0xb2   :  { %v236_v11 = vpop.f32.mrf.mxu2 }
  0xb3   :  { %v4953_v12 = vmul.f32 14.285714, %v236_v11  ;;  %v349_v13 = vpop.f32.mrf.mxu3  ;;  %v191_v15 = vpop.f32.mrf.mxu0 }
  0xb4   :  { %v4955_v14 = vmul.f32 14.285714, %v349_v13  ;;  %v4957_v17 = vmul.f32 14.285714, %v191_v15  ;;  %v304_v18 = vpop.f32.mrf.mxu1  ;;  %v4983_v0 = vpop.permute.xlu1 %756 }
  0xb5   :  { %v4959_v19 = vmul.f32 14.285714, %v304_v18  ;;  %8386 = vst [vmem:[#allocation52_spill] sm:$0xff] %v4983_v0  ;;  %v4987_v11 = vpop.permute.xlu0 %753 }
  0xb6   :  { %8378 = vst [vmem:[#allocation44_spill] sm:$0xff] %v4955_v14  ;;  %v1132_v23 = vmax.f32 %v4953_v12, %v4955_v14 }
  0xb7   :  { %8379 = vst [vmem:[#allocation45_spill] sm:$0xff] %v4959_v19  ;;  %v1087_v28 = vmax.f32 %v4957_v17, %v4959_v19 }
  0xb8   :  { %8388 = vst [vmem:[#allocation54_spill] sm:$0xff] %v4987_v11  ;;  %v5019_v11 = vld [vmem:[#allocation2 + $0xb8] sm:$0xff] }
  0xb9   :  { %1133 = vmax.xlane.f32.xlu2 %v1132_v23  ;;  %8401 = vst [vmem:[#allocation67_spill] sm:$0xff] %v5019_v11 }
  0xba   :  { %v239_v34 = vpop.f32.mrf.mxu2 }
  0xbb   :  { %v352_v38 = vpop.f32.mrf.mxu3  ;;  %1088 = vmax.xlane.f32.xlu0 %v1087_v28  ;;  %v194_v39 = vpop.f32.mrf.mxu0  ;;  %v4973_v53 = vmul.f32 14.285714, %v239_v34 }
  0xbc   :  { %v4971_v46 = vmul.f32 14.285714, %v194_v39  ;;  %v307_v47 = vpop.f32.mrf.mxu1  ;;  %v4975_v54 = vmul.f32 14.285714, %v352_v38  ;;  %v4995_v38 = vpop.permute.xlu1 %765 }
  0xbd   :  { %8383 = vst [vmem:[#allocation49_spill] sm:$0xff] %v4973_v53  ;;  %v4977_v60 = vmul.f32 14.285714, %v307_v47  ;;  %v4997_v47 = vpop.permute.xlu2 %768 }
  0xbe   :  { %8384 = vst [vmem:[#allocation50_spill] sm:$0xff] %v4975_v54  ;;  %v1135_v63 = vmax.f32 %v4973_v53, %v4975_v54 }
  0xbf   :  { %8385 = vst [vmem:[#allocation51_spill] sm:$0xff] %v4977_v60  ;;  %v1090_v61 = vmax.f32 %v4971_v46, %v4977_v60 }
  0xc0   :  { %8391 = vst [vmem:[#allocation57_spill] sm:$0xff] %v4995_v38 }
  0xc1   :  { %8392 = vst [vmem:[#allocation58_spill] sm:$0xff] %v4997_v47 }
  0xc2   :  { %v242_v3 = vpop.f32.mrf.mxu2 }
  0xc3   :  { %v355_v10 = vpop.f32.mrf.mxu3  ;;  %1091 = vmax.xlane.f32.xlu1 %v1090_v61  ;;  %1136 = vmax.xlane.f32.xlu0 %v1135_v63  ;;  %v4989_v13 = vmul.f32 14.285714, %v242_v3  ;;  %v197_v18 = vpop.f32.mrf.mxu0  ;;  %v5001_v3 = vld [vmem:[#allocation2 + $0x98] sm:$0xff] }
  0xc4   :  { %v4991_v15 = vmul.f32 14.285714, %v355_v10  ;;  %v310_v23 = vpop.f32.mrf.mxu1  ;;  %v4999_v61 = vpop.permute.xlu0 %762  ;;  %8394 = vst [vmem:[#allocation60_spill] sm:$0xff] %v5001_v3  ;;  %v5047_v59 = vmul.f32 14.285714, %v197_v18 }
  0xc5   :  { %8389 = vst [vmem:[#allocation55_spill] sm:$0xff] %v4989_v13  ;;  %v5005_v0 = vpop.permute.xlu1 %774  ;;  %v5009_v38 = vpop.permute.xlu2 %777  ;;  %v5049_v57 = vmul.f32 14.285714, %v310_v23 }
  0xc6   :  { %8390 = vst [vmem:[#allocation56_spill] sm:$0xff] %v4991_v15  ;;  %v1138_v28 = vmax.f32 %v4989_v13, %v4991_v15 }
  0xc7   :  { %8393 = vst [vmem:[#allocation59_spill] sm:$0xff] %v4999_v61  ;;  %v1093_v51 = vmax.f32 %v5047_v59, %v5049_v57 }
  0xc8   :  { %8395 = vst [vmem:[#allocation61_spill] sm:$0xff] %v5005_v0 }
  0xc9   :  { %8397 = vst [vmem:[#allocation63_spill] sm:$0xff] %v5009_v38 }
  0xca   :  { %v245_v34 = vpop.f32.mrf.mxu2  ;;  %8408 = vst [vmem:[#allocation74_spill] sm:$0xff] %v5047_v59 }
  0xcb   :  { %v358_v39 = vpop.f32.mrf.mxu3  ;;  %1139 = vmax.xlane.f32.xlu1 %v1138_v28  ;;  %v200_v55 = vpop.f32.mrf.mxu0  ;;  %8409 = vst [vmem:[#allocation75_spill] sm:$0xff] %v5049_v57  ;;  %v5065_v23 = vmul.f32 14.285714, %v245_v34 }
  0xcc   :  { %v313_v63 = vpop.f32.mrf.mxu1  ;;  %v5011_v28 = vpop.permute.xlu0 %771 }
  0xcd   :  { %8398 = vst [vmem:[#allocation64_spill] sm:$0xff] %v5011_v28  ;;  %v5015_v24 = vpop.permute.xlu1 %783  ;;  %v5017_v29 = vpop.permute.xlu2 %786 }
  0xce   :  { %8399 = vst [vmem:[#allocation65_spill] sm:$0xff] %v5015_v24 }
  0xcf   :  { %8400 = vst [vmem:[#allocation66_spill] sm:$0xff] %v5017_v29 }
  0xd0   :  { %8414 = vst [vmem:[#allocation80_spill] sm:$0xff] %v5065_v23 }
  0xd1   :  { %1794 = vrot.lane.b32.xlu2 %v5001_v3, %s4488_s6 }
  0xd2   :  { %v248_v10 = vpop.f32.mrf.mxu2 }
  0xd3   :  { %v361_v14 = vpop.f32.mrf.mxu3  ;;  %v203_v47 = vpop.f32.mrf.mxu0 }
  0xd4   :  { %v316_v54 = vpop.f32.mrf.mxu1  ;;  %v5021_v0 = vpop.permute.xlu0 %780  ;;  %v5063_v18 = vmul.f32 14.285714, %v361_v14  ;;  %v5081_v34 = vmul.f32 14.285714, %v203_v47 }
  0xd5   :  { %8402 = vst [vmem:[#allocation68_spill] sm:$0xff] %v5021_v0  ;;  %v5029_v33 = vpop.permute.xlu1 %792  ;;  %v5031_v9 = vpop.permute.xlu2 %1758 }
  0xd6   :  { %8403 = vst [vmem:[#allocation69_spill] sm:$0xff] %v5029_v33 }
  0xd7   :  { %1792 = vrot.lane.b32.xlu0 %v5007_v5, %s4488_s6  ;;  %8404 = vst [vmem:[#allocation70_spill] sm:$0xff] %v5031_v9 }
  0xd8   :  { %8413 = vst [vmem:[#allocation79_spill] sm:$0xff] %v5063_v18 }
  0xd9   :  { %8418 = vst [vmem:[#allocation84_spill] sm:$0xff] %v5081_v34 }
  0xda   :  { %v251_v61 = vpop.f32.mrf.mxu2 }
  0xdb   :  { %v364_v15 = vpop.f32.mrf.mxu3  ;;  %v206_v6 = vpop.f32.mrf.mxu0  ;;  %v5095_v42 = vmul.f32 14.285714, %v251_v61 }
  0xdc   :  { %v319_v8 = vpop.f32.mrf.mxu1  ;;  %v5033_v24 = vpop.permute.xlu0 %789  ;;  %v5097_v45 = vmul.f32 14.285714, %v364_v15  ;;  %v5115_v61 = vmul.f32 14.285714, %v206_v6 }
  0xdd   :  { %8405 = vst [vmem:[#allocation71_spill] sm:$0xff] %v5033_v24  ;;  %v5043_v62 = vpop.permute.xlu1 %1760  ;;  %v5045_v58 = vpop.permute.xlu2 %1764 }
  0xde   :  { %8406 = vst [vmem:[#allocation72_spill] sm:$0xff] %v5043_v62  ;;  %v5061_v62 = vmul.f32 14.285714, %v248_v10 }
  0xdf   :  { %8407 = vst [vmem:[#allocation73_spill] sm:$0xff] %v5045_v58  ;;  %v5067_v58 = vmul.f32 14.285714, %v358_v39  ;;  %v5083_v39 = vmul.f32 14.285714, %v316_v54 }
  0xe0   :  { %8412 = vst [vmem:[#allocation78_spill] sm:$0xff] %v5061_v62 }
  0xe1   :  { %8415 = vst [vmem:[#allocation81_spill] sm:$0xff] %v5067_v58  ;;  %v1141_v57 = vmax.f32 %v5065_v23, %v5067_v58  ;;  %v1099_v58 = vmax.f32 %v5081_v34, %v5083_v39 }
  0xe2   :  { %v5025_v38 = vpop.f32.mrf.mxu2  ;;  %8419 = vst [vmem:[#allocation85_spill] sm:$0xff] %v5083_v39 }
  0xe3   :  { %v5027_v28 = vpop.f32.mrf.mxu3  ;;  %v5035_v29 = vpop.f32.mrf.mxu0  ;;  %8422 = vst [vmem:[#allocation88_spill] sm:$0xff] %v5095_v42 }
  0xe4   :  { %1802 = vrot.lane.b32.xlu1 %v5019_v11, %s4488_s6  ;;  %v5037_v1 = vpop.f32.mrf.mxu1  ;;  %v5051_v33 = vpop.permute.xlu0 %1756  ;;  %8423 = vst [vmem:[#allocation89_spill] sm:$0xff] %v5097_v45 }
  0xe5   :  { %8410 = vst [vmem:[#allocation76_spill] sm:$0xff] %v5051_v33  ;;  %v5059_v60 = vpop.permute.xlu1 %1766  ;;  %v1144_v33 = vmax.f32 %v5061_v62, %v5063_v18  ;;  %v5071_v7 = vpop.permute.xlu2 %1770 }
  0xe6   :  { %8411 = vst [vmem:[#allocation77_spill] sm:$0xff] %v5059_v60 }
  0xe7   :  { %8416 = vst [vmem:[#allocation82_spill] sm:$0xff] %v5071_v7  ;;  %v5087_v7 = vmul.f32 14.285714, %v200_v55  ;;  %v1147_v55 = vmax.f32 %v5095_v42, %v5097_v45 }
  0xe8   :  { %8427 = vst [vmem:[#allocation93_spill] sm:$0xff] %v5115_v61 }
  0xea   :  { %v5039_v0 = vpop.f32.mrf.mxu2 }
  0xeb   :  { %v5041_v2 = vpop.f32.mrf.mxu3  ;;  %v5053_v9 = vpop.f32.mrf.mxu0 }
  0xec   :  { %v5055_v24 = vpop.f32.mrf.mxu1  ;;  %v5073_v19 = vpop.permute.xlu0 %1762 }
  0xed   :  { %8417 = vst [vmem:[#allocation83_spill] sm:$0xff] %v5073_v19  ;;  %v5085_v18 = vpop.permute.xlu1 %1772  ;;  %v5089_v19 = vmul.f32 14.285714, %v313_v63 }
  0xee   :  { %8420 = vst [vmem:[#allocation86_spill] sm:$0xff] %v5085_v18 }
  0xef   :  { %8421 = vst [vmem:[#allocation87_spill] sm:$0xff] %v5089_v19 }
  0xf2   :  { %v260_v50 = vpop.f32.mrf.mxu2 }
  0xf3   :  { %v373_v43 = vpop.f32.mrf.mxu3  ;;  %v215_v60 = vpop.f32.mrf.mxu0  ;;  %v5129_v52 = vmul.f32 14.285714, %v260_v50 }
  0xf4   :  { %v5101_v54 = vpop.permute.xlu0 %1768  ;;  %v5131_v6 = vmul.f32 14.285714, %v373_v43 }
  0xf5   :  { %8425 = vst [vmem:[#allocation91_spill] sm:$0xff] %v5101_v54  ;;  %v5113_v15 = vpop.permute.xlu1 %1778 }
  0xf6   :  { %8426 = vst [vmem:[#allocation92_spill] sm:$0xff] %v5113_v15  ;;  %v1156_v15 = vmax.f32 %v5129_v52, %v5131_v6 }
  0xf7   :  { %8431 = vst [vmem:[#allocation97_spill] sm:$0xff] %v5129_v52 }
  0xf8   :  { %8432 = vst [vmem:[#allocation98_spill] sm:$0xff] %v5131_v6 }
  0xfa   :  { %1094 = vmax.xlane.f32.xlu2 %v1093_v51  ;;  %v328_v51 = vpop.f32.mrf.mxu1  ;;  %v5077_v10 = vpop.f32.mrf.mxu2 }
  0xfb   :  { %v5079_v14 = vpop.f32.mrf.mxu3  ;;  %v5105_v47 = vpop.f32.mrf.mxu0  ;;  %v5147_v43 = vmul.f32 14.285714, %v328_v51 }
  0xfc   :  { %v5123_v45 = vpop.permute.xlu0 %1774 }
  0xfd   :  { %8430 = vst [vmem:[#allocation96_spill] sm:$0xff] %v5123_v45 }
  0xfe   :  { %8438 = vst [vmem:[#allocation104_spill] sm:$0xff] %v5147_v43 }
 0x101   :  { %1145 = vmax.xlane.f32.xlu0 %v1144_v33  ;;  %v1096_v33 = vmax.f32 %v5087_v7, %v5089_v19 }
 0x102   :  { %1142 = vmax.xlane.f32.xlu2 %v1141_v57  ;;  %v5099_v57 = vpop.permute.xlu2 %1776  ;;  %v5107_v63 = vpop.f32.mrf.mxu1 }
 0x103   :  { %8424 = vst [vmem:[#allocation90_spill] sm:$0xff] %v5099_v57  ;;  %v5109_v18 = vpop.f32.mrf.mxu2  ;;  %v5111_v39 = vpop.f32.mrf.mxu3  ;;  %v5117_v57 = vmul.f32 14.285714, %v319_v8 }
 0x104   :  { %v5125_v19 = vpop.f32.mrf.mxu0  ;;  %v5133_v8 = vpop.permute.xlu1 %1784 }
 0x105   :  { %8428 = vst [vmem:[#allocation94_spill] sm:$0xff] %v5117_v57  ;;  %v5141_v45 = vpop.permute.xlu0 %1780 }
 0x106   :  { %8433 = vst [vmem:[#allocation99_spill] sm:$0xff] %v5133_v8  ;;  %v5149_v8 = vld [vmem:[#allocation2 + $0xb0] sm:$0xff] }
 0x107   :  { %8436 = vst [vmem:[#allocation102_spill] sm:$0xff] %v5141_v45 }
 0x108   :  { %8439 = vst [vmem:[#allocation105_spill] sm:$0xff] %v5149_v8 }
 0x109   :  { %1100 = vmax.xlane.f32.xlu0 %v1099_v58  ;;  %v1102_v58 = vmax.f32 %v5115_v61, %v5117_v57  ;;  %v5137_v57 = vld [vmem:[#allocation2 + $0xa8] sm:$0xff]  ;;  %v5145_v61 = vmul.f32 14.285714, %v215_v60 }
 0x10a   :  { %1097 = vmax.xlane.f32.xlu2 %v1096_v33  ;;  %v5121_v54 = vpop.permute.xlu2 %1782  ;;  %v5127_v33 = vpop.f32.mrf.mxu1  ;;  %8434 = vst [vmem:[#allocation100_spill] sm:$0xff] %v5137_v57 }
 0x10b   :  { %8429 = vst [vmem:[#allocation95_spill] sm:$0xff] %v5121_v54  ;;  %v269_v42 = vpop.f32.mrf.mxu2 }
 0x10c   :  { %8437 = vst [vmem:[#allocation103_spill] sm:$0xff] %v5145_v61  ;;  %v5157_v45 = vpop.permute.xlu1 %1790  ;;  %v5166_v52 = vmul.f32 14.285714, %v269_v42 }
 0x10d   :  { %8440 = vst [vmem:[#allocation106_spill] sm:$0xff] %v5157_v45  ;;  %v5164_v51 = vpop.permute.xlu0 %1786 }
 0x10e   :  { %1148 = vmax.xlane.f32.xlu1 %v1147_v55  ;;  %v382_v55 = vpop.f32.mrf.mxu3  ;;  %8442 = vst [vmem:[#allocation108_spill] sm:$0xff] %v5164_v51 }
 0x10f   :  { %8443 = vst [vmem:[#allocation109_spill] sm:$0xff] %v5166_v52  ;;  %v5168_v59 = vmul.f32 14.285714, %v382_v55 }
 0x111   :  { %8444 = vst [vmem:[#allocation110_spill] sm:$0xff] %v5168_v59 }
 0x112   :  { %v5139_v54 = vpop.permute.xlu2 %1788  ;;  %v337_v50 = vpop.f32.mrf.mxu1 }
 0x113   :  { %8435 = vst [vmem:[#allocation101_spill] sm:$0xff] %v5139_v54  ;;  %v5151_v34 = vpop.f32.mrf.mxu2  ;;  %v1111_v54 = vmax.f32 %v5145_v61, %v5147_v43  ;;  %v1165_v61 = vmax.f32 %v5166_v52, %v5168_v59  ;;  %v5189_v13 = vmul.f32 14.285714, %v337_v50 }
 0x115   :  { %8447 = vst [vmem:[#allocation113_spill] sm:$0xff] %v5189_v13 }
 0x116   :  { %1103 = vmax.xlane.f32.xlu1 %v1102_v58  ;;  %v224_v58 = vpop.f32.mrf.mxu0  ;;  %v5153_v6 = vpop.f32.mrf.mxu3 }
 0x11a   :  { %v5174_v45 = vpop.f32.mrf.mxu1 }
 0x11b   :  { %v5178_v62 = vpop.f32.mrf.mxu2 }
 0x11d   :  { %1798 = vrot.lane.b32.xlu0 %v5137_v57, %s4488_s6 }
 0x11e   :  { %1157 = vmax.xlane.f32.xlu1 %v1156_v15  ;;  %v5172_v43 = vpop.f32.mrf.mxu0 }
 0x122   :  { %1800 = vrot.lane.b32.xlu2 %v5149_v8, %s4488_s6 }
 0x124   :  { %v1086_v15 = vpop.xlane.xlu2 %1085 }
 0x125   :  { %v5162_v60 = vmax.f32 %v4767_v22, %v1086_v15  ;;  %v5180_v15 = vpop.f32.mrf.mxu3  ;;  %v5187_v22 = vmul.f32 14.285714, %v224_v58  ;;  %v278_v58 = vpop.f32.mrf.mxu2 }
 0x126   :  { %1112 = vmax.xlane.f32.xlu1 %v1111_v54  ;;  %v5182_v54 = vpop.permute.xlu1 %1796 }
 0x127   :  { %8441 = vst [vmem:[#allocation107_spill] sm:$0xff] %v5162_v60 }
 0x128   :  { %2333 = vst.msk [vmem:[#allocation2] sm:$0xff] %vm71_vm1, %v5162_v60 }
 0x129   :  { %8445 = vst [vmem:[#allocation111_spill] sm:$0xff] %v5182_v54  ;;  %v1120_v54 = vmax.f32 %v5187_v22, %v5189_v13 }
 0x12c   :  { %v1134_v42 = vpop.xlane.xlu2 %1133 }
 0x12d   :  { %v5185_v55 = vmax.f32 %v4871_v41, %v1134_v42  ;;  %v5200_v42 = vpop.f32.mrf.mxu0  ;;  %v391_v41 = vpop.f32.mrf.mxu3 }
 0x12e   :  { %1166 = vmax.xlane.f32.xlu1 %v1165_v61  ;;  %v1089_v51 = vpop.xlane.xlu0 %1088  ;;  %v5202_v61 = vpop.f32.mrf.mxu1 }
 0x12f   :  { %8446 = vst [vmem:[#allocation112_spill] sm:$0xff] %v5185_v55  ;;  %v5194_v59 = vmax.f32 %v4730_v16, %v1089_v51  ;;  %v5207_v51 = vmul.f32 14.285714, %v278_v58  ;;  %v5209_v16 = vmul.f32 14.285714, %v391_v41 }
 0x130   :  { %2349 = vst.msk [vmem:[#allocation2 + $0x80] sm:$0xff] %vm71_vm1, %v5185_v55 }
 0x131   :  { %8448 = vst [vmem:[#allocation114_spill] sm:$0xff] %v5194_v59  ;;  %v1174_v13 = vmax.f32 %v5207_v51, %v5209_v16 }
 0x132   :  { %2334 = vst.msk [vmem:[#allocation2 + $0x8] sm:$0xff] %vm71_vm1, %v5194_v59 }
 0x133   :  { %8450 = vst [vmem:[#allocation116_spill] sm:$0xff] %v5209_v16  ;;  %v5233_v16 = vmul.f32 14.285714, %v5041_v2  ;;  %v5248_v2 = vmul.f32 14.285714, %v5053_v9  ;;  %v5264_v9 = vld [vmem:[#allocation2 + $0xc0] sm:$0xff] }
 0x134   :  { %8455 = vst [vmem:[#allocation121_spill] sm:$0xff] %v5264_v9 }
 0x135   :  { %8453 = vst [vmem:[#allocation119_spill] sm:$0xff] %v5233_v16 }
 0x136   :  { %1121 = vmax.xlane.f32.xlu1 %v1120_v54  ;;  %v1092_v50 = vpop.xlane.xlu1 %1091  ;;  %v1137_v23 = vpop.xlane.xlu0 %1136 }
 0x137   :  { %v5205_v52 = vmax.f32 %v4761_v20, %v1092_v50  ;;  %v5212_v53 = vmax.f32 %v4893_v48, %v1137_v23  ;;  %v233_v54 = vpop.f32.mrf.mxu0  ;;  %v346_v50 = vpop.f32.mrf.mxu1  ;;  %v5230_v48 = vmul.f32 14.285714, %v5039_v0 }
 0x138   :  { %v5223_v41 = vmul.f32 14.285714, %v233_v54  ;;  %v5225_v23 = vmul.f32 14.285714, %v346_v50  ;;  %v5240_v54 = vmul.f32 14.285714, %v5025_v38 }
 0x139   :  { %8449 = vst [vmem:[#allocation115_spill] sm:$0xff] %v5205_v52  ;;  %v5243_v50 = vmul.f32 14.285714, %v5027_v28  ;;  %v5256_v38 = vmul.f32 14.285714, %v5035_v29  ;;  %v5271_v29 = vld [vmem:[#allocation2 + $0xc8] sm:$0xff] }
 0x13a   :  { %8451 = vst [vmem:[#allocation117_spill] sm:$0xff] %v5212_v53  ;;  %v5259_v28 = vmul.f32 14.285714, %v5037_v1 }
 0x13b   :  { %2335 = vst.msk [vmem:[#allocation2 + $0x10] sm:$0xff] %vm71_vm1, %v5205_v52  ;;  %v1150_v0 = vmax.f32 %v5240_v54, %v5243_v50 }
 0x13c   :  { %2350 = vst.msk [vmem:[#allocation2 + $0x88] sm:$0xff] %vm71_vm1, %v5212_v53 }
 0x13d   :  { %8454 = vst [vmem:[#allocation120_spill] sm:$0xff] %v5243_v50 }
 0x13e   :  { %1175 = vmax.xlane.f32.xlu1 %v1174_v13  ;;  %v1140_v20 = vpop.xlane.xlu1 %1139  ;;  %v1129_v13 = vmax.f32 %v5223_v41, %v5225_v23  ;;  %8457 = vst [vmem:[#allocation123_spill] sm:$0xff] %v5271_v29 }
 0x13f   :  { %v5221_v58 = vmax.f32 %v5007_v5, %v1140_v20  ;;  %v1153_v20 = vmax.f32 %v5230_v48, %v5233_v16  ;;  %v5251_v5 = vmul.f32 14.285714, %v5055_v24  ;;  %v5268_v24 = vpop.permute.xlu2 %1794 }
 0x140   :  { %8456 = vst [vmem:[#allocation122_spill] sm:$0xff] %v5268_v24 }
 0x141   :  { %8452 = vst [vmem:[#allocation118_spill] sm:$0xff] %v5221_v58  ;;  %v1108_v16 = vmax.f32 %v5248_v2, %v5251_v5 }
 0x142   :  { %2351 = vst.msk [vmem:[#allocation2 + $0x90] sm:$0xff] %vm71_vm1, %v5221_v58 }
 0x146   :  { %1130 = vmax.xlane.f32.xlu1 %v1129_v13  ;;  %v1105_v13 = vmax.f32 %v5256_v38, %v5259_v28 }
 0x147   :  { %1154 = vmax.xlane.f32.xlu0 %v1153_v20 }
 0x149   :  { %v5277_v1 = vpop.permute.xlu0 %1792 }
 0x14a   :  { %8459 = vst [vmem:[#allocation125_spill] sm:$0xff] %v5277_v1 }
 0x14b   :  { %1151 = vmax.xlane.f32.xlu2 %v1150_v0 }
 0x14f   :  { %1109 = vmax.xlane.f32.xlu0 %v1108_v16  ;;  %v5275_v16 = vld [vmem:[#allocation2 + $0xd0] sm:$0xff] }
 0x150   :  { %8458 = vst [vmem:[#allocation124_spill] sm:$0xff] %v5275_v16 }
 0x153   :  { %1106 = vmax.xlane.f32.xlu2 %v1105_v13 }
 0x156   :  { %v5292_v50 = vpop.permute.xlu1 %1802 }
 0x157   :  { %8463 = vst [vmem:[#allocation129_spill] sm:$0xff] %v5292_v50 }
 0x15f   :  { %1390 = vperm.xlu1 %4172, %v5185_v55  }
 0x163   :  { %1804 = vrot.lane.b32.xlu0 %v5264_v9, %s4488_s6 }
 0x167   :  { %1315 = vperm.xlu1 %4172, %v5194_v59  }
 0x16b   :  { %1806 = vrot.lane.b32.xlu2 %v5271_v29, %s4488_s6 }
 0x16d   :  { %v1095_v20 = vpop.xlane.xlu2 %1094 }
 0x16e   :  { %v5280_v0 = vmax.f32 %v4801_v27, %v1095_v20 }
 0x16f   :  { %1808 = vrot.lane.b32.xlu1 %v5275_v16, %s4488_s6 }
 0x170   :  { %8460 = vst [vmem:[#allocation126_spill] sm:$0xff] %v5280_v0 }
 0x171   :  { %2336 = vst.msk [vmem:[#allocation2 + $0x18] sm:$0xff] %vm71_vm1, %v5280_v0 }
 0x174   :  { %v1146_v13 = vpop.xlane.xlu0 %1145 }
 0x175   :  { %v5287_v24 = vmax.f32 %v4913_v56, %v1146_v13  ;;  %v1143_v55 = vpop.xlane.xlu2 %1142 }
 0x176   :  { %v5290_v59 = vmax.f32 %v5001_v3, %v1143_v55  ;;  %v5316_v3 = vmul.f32 14.285714, %v5109_v18  ;;  %v5333_v18 = vmul.f32 14.285714, %v5077_v10 }
 0x177   :  { %8461 = vst [vmem:[#allocation127_spill] sm:$0xff] %v5287_v24 }
 0x178   :  { %8462 = vst [vmem:[#allocation128_spill] sm:$0xff] %v5290_v59  ;;  %1405 = vperm.xlu1 %4172, %v5290_v59  }
 0x179   :  { %2353 = vst.msk [vmem:[#allocation2 + $0xa0] sm:$0xff] %vm71_vm1, %v5287_v24 }
 0x17a   :  { %2352 = vst.msk [vmem:[#allocation2 + $0x98] sm:$0xff] %vm71_vm1, %v5290_v59 }
 0x17c   :  { %v1101_v20 = vpop.xlane.xlu0 %1100 }
 0x17d   :  { %v5300_v1 = vmax.f32 %v4795_v25, %v1101_v20  ;;  %v1098_v13 = vpop.xlane.xlu2 %1097 }
 0x17e   :  { %v5303_v56 = vmax.f32 %v4763_v21, %v1098_v13  ;;  %v5319_v13 = vmul.f32 14.285714, %v5111_v39  ;;  %v5336_v39 = vmul.f32 14.285714, %v5079_v14  ;;  %v5339_v21 = vmul.f32 14.285714, %v5125_v19 }
 0x17f   :  { %8464 = vst [vmem:[#allocation130_spill] sm:$0xff] %v5300_v1  ;;  %v5354_v19 = vmul.f32 14.285714, %v5178_v62  ;;  %v5357_v14 = vmul.f32 14.285714, %v5180_v15 }
 0x180   :  { %8465 = vst [vmem:[#allocation131_spill] sm:$0xff] %v5303_v56  ;;  %1330 = vperm.xlu1 %4172, %v5303_v56   ;;  %v5381_v15 = vmul.f32 14.285714, %v5151_v34  ;;  %v5398_v34 = vmul.f32 14.285714, %v5172_v43 }
 0x181   :  { %2338 = vst.msk [vmem:[#allocation2 + $0x28] sm:$0xff] %vm71_vm1, %v5300_v1  ;;  %v1149_v55 = vpop.xlane.xlu1 %1148 }
 0x182   :  { %2337 = vst.msk [vmem:[#allocation2 + $0x20] sm:$0xff] %vm71_vm1, %v5303_v56  ;;  %v5311_v50 = vmax.f32 %v5137_v57, %v1149_v55  ;;  %v1162_v55 = vmax.f32 %v5316_v3, %v5319_v13  ;;  %v5328_v57 = vld [vmem:[#allocation2 + $0xe8] sm:$0xff]  ;;  %v5342_v56 = vmul.f32 14.285714, %v5127_v33  ;;  %v5360_v33 = vmul.f32 14.285714, %v5105_v47 }
 0x183   :  { %8467 = vst [vmem:[#allocation133_spill] sm:$0xff] %v5319_v13  ;;  %v5375_v47 = vmul.f32 14.285714, %v5200_v42 }
 0x184   :  { %8466 = vst [vmem:[#allocation132_spill] sm:$0xff] %v5311_v50  ;;  %v1117_v10 = vmax.f32 %v5339_v21, %v5342_v56 }
 0x185   :  { %2354 = vst.msk [vmem:[#allocation2 + $0xa8] sm:$0xff] %vm71_vm1, %v5311_v50 }
 0x186   :  { %8469 = vst [vmem:[#allocation135_spill] sm:$0xff] %v5328_v57 }
 0x187   :  { %8470 = vst [vmem:[#allocation136_spill] sm:$0xff] %v5336_v39 }
 0x188   :  { %1814 = vrot.lane.b32.xlu1 %v5328_v57, %s4488_s6  ;;  %8472 = vst [vmem:[#allocation138_spill] sm:$0xff] %v5357_v14 }
 0x189   :  { %v1104_v20 = vpop.xlane.xlu1 %1103 }
 0x18a   :  { %v5322_v59 = vmax.f32 %v4835_v32, %v1104_v20  ;;  %v1159_v32 = vmax.f32 %v5333_v18, %v5336_v39 }
 0x18c   :  { %8468 = vst [vmem:[#allocation134_spill] sm:$0xff] %v5322_v59 }
 0x18d   :  { %2339 = vst.msk [vmem:[#allocation2 + $0x30] sm:$0xff] %vm71_vm1, %v5322_v59  ;;  %1163 = vmax.xlane.f32.xlu0 %v1162_v55 }
 0x18f   :  { %v5421_v39 = vpop.permute.xlu0 %1798 }
 0x190   :  { %8480 = vst [vmem:[#allocation146_spill] sm:$0xff] %v5421_v39 }
 0x191   :  { %v1158_v20 = vpop.xlane.xlu1 %1157 }
 0x192   :  { %v5345_v55 = vmax.f32 %v5264_v9, %v1158_v20  ;;  %v5363_v20 = vmul.f32 14.285714, %v5107_v63  ;;  %v5378_v63 = vmul.f32 14.285714, %v5202_v61 }
 0x194   :  { %8471 = vst [vmem:[#allocation137_spill] sm:$0xff] %v5345_v55  ;;  %1160 = vmax.xlane.f32.xlu2 %v1159_v32  ;;  %v1171_v32 = vmax.f32 %v5354_v19, %v5357_v14  ;;  %v1114_v62 = vmax.f32 %v5360_v33, %v5363_v20  ;;  %v281_v14 = vpop.f32.mrf.mxu2 }
 0x195   :  { %2357 = vst.msk [vmem:[#allocation2 + $0xc0] sm:$0xff] %vm71_vm1, %v5345_v55  ;;  %1118 = vmax.xlane.f32.xlu0 %v1117_v10  ;;  %v5386_v10 = vld [vmem:[#allocation2 + $0xd8] sm:$0xff] }
 0x196   :  { %8475 = vst [vmem:[#allocation141_spill] sm:$0xff] %v5386_v10 }
 0x199   :  { %v1113_v9 = vpop.xlane.xlu1 %1112 }
 0x19a   :  { %v5366_v25 = vmax.f32 %v4855_v37, %v1113_v9  ;;  %v5384_v9 = vmul.f32 14.285714, %v5153_v6  ;;  %v5401_v6 = vmul.f32 14.285714, %v5174_v45 }
 0x19c   :  { %8473 = vst [vmem:[#allocation139_spill] sm:$0xff] %v5366_v25  ;;  %1115 = vmax.xlane.f32.xlu2 %v1114_v62  ;;  %v1168_v42 = vmax.f32 %v5381_v15, %v5384_v9  ;;  %v1123_v62 = vmax.f32 %v5398_v34, %v5401_v6 }
 0x19d   :  { %2342 = vst.msk [vmem:[#allocation2 + $0x48] sm:$0xff] %vm71_vm1, %v5366_v25  ;;  %1172 = vmax.xlane.f32.xlu0 %v1171_v32  ;;  %v1126_v32 = vmax.f32 %v5375_v47, %v5378_v63 }
 0x19e   :  { %8474 = vst [vmem:[#allocation140_spill] sm:$0xff] %v5384_v9  ;;  %v394_v9 = vpop.f32.mrf.mxu3 }
 0x19f   :  { %v5412_v43 = vmul.f32 14.285714, %v394_v9 }
 0x1a1   :  { %v1167_v37 = vpop.xlane.xlu1 %1166 }
 0x1a2   :  { %v5389_v27 = vmax.f32 %v5386_v10, %v1167_v37 }
 0x1a4   :  { %8476 = vst [vmem:[#allocation142_spill] sm:$0xff] %v5389_v27  ;;  %1169 = vmax.xlane.f32.xlu2 %v1168_v42  ;;  %v5414_v42 = vld [vmem:[#allocation2 + $0xf0] sm:$0xff] }
 0x1a5   :  { %2360 = vst.msk [vmem:[#allocation2 + $0xd8] sm:$0xff] %vm71_vm1, %v5389_v27  ;;  %1127 = vmax.xlane.f32.xlu0 %v1126_v32  ;;  %v5410_v32 = vmul.f32 14.285714, %v281_v14 }
 0x1a6   :  { %8478 = vst [vmem:[#allocation144_spill] sm:$0xff] %v5414_v42 }
 0x1a9   :  { %v1122_v61 = vpop.xlane.xlu1 %1121 }
 0x1aa   :  { %v5404_v37 = vmax.f32 %v4877_v44, %v1122_v61  ;;  %v1177_v61 = vmax.f32 %v5410_v32, %v5412_v43 }
 0x1ac   :  { %8477 = vst [vmem:[#allocation143_spill] sm:$0xff] %v5404_v37  ;;  %1124 = vmax.xlane.f32.xlu2 %v1123_v62  ;;  %v5425_v62 = vpop.permute.xlu2 %1800 }
 0x1ad   :  { %2345 = vst.msk [vmem:[#allocation2 + $0x60] sm:$0xff] %vm71_vm1, %v5404_v37 }
 0x1ae   :  { %8481 = vst [vmem:[#allocation147_spill] sm:$0xff] %v5425_v62 }
 0x1b1   :  { %v1176_v45 = vpop.xlane.xlu1 %1175 }
 0x1b2   :  { %v5419_v44 = vmax.f32 %v5414_v42, %v1176_v45 }
 0x1b4   :  { %8479 = vst [vmem:[#allocation145_spill] sm:$0xff] %v5419_v44  ;;  %1178 = vmax.xlane.f32.xlu2 %v1177_v61 }
 0x1b5   :  { %2363 = vst.msk [vmem:[#allocation2 + $0xf0] sm:$0xff] %vm71_vm1, %v5419_v44 }
 0x1b9   :  { %v1131_v14 = vpop.xlane.xlu1 %1130  ;;  %1310 = vperm.xlu0 %4171, %v5162_v60  }
 0x1ba   :  { %v5428_v9 = vmax.f32 %v4895_v49, %v1131_v14  ;;  %v1155_v13 = vpop.xlane.xlu0 %1154 }
 0x1bb   :  { %v5434_v45 = vmax.f32 %v5019_v11, %v1155_v13 }
 0x1bc   :  { %8482 = vst [vmem:[#allocation148_spill] sm:$0xff] %v5428_v9 }
 0x1bd   :  { %2348 = vst.msk [vmem:[#allocation2 + $0x78] sm:$0xff] %vm71_vm1, %v5428_v9 }
 0x1be   :  { %8483 = vst [vmem:[#allocation149_spill] sm:$0xff] %v5434_v45  ;;  %v1152_v39 = vpop.xlane.xlu2 %1151 }
 0x1bf   :  { %2356 = vst.msk [vmem:[#allocation2 + $0xb8] sm:$0xff] %vm71_vm1, %v5434_v45  ;;  %v5439_v61 = vmax.f32 %v5149_v8, %v1152_v39  ;;  %v5462_v39 = vld [vmem:[#allocation2 + $0xe0] sm:$0xff] }
 0x1c0   :  { %8487 = vst [vmem:[#allocation153_spill] sm:$0xff] %v5462_v39 }
 0x1c1   :  { %8484 = vst [vmem:[#allocation150_spill] sm:$0xff] %v5439_v61  ;;  %1395 = vperm.xlu0 %4171, %v5212_v53   ;;  %1420 = vperm.xlu1 %4172, %v5439_v61  }
 0x1c2   :  { %2355 = vst.msk [vmem:[#allocation2 + $0xb0] sm:$0xff] %vm71_vm1, %v5439_v61  ;;  %v1110_v14 = vpop.xlane.xlu0 %1109 }
 0x1c3   :  { %v5446_v62 = vmax.f32 %v4829_v30, %v1110_v14  ;;  %v5472_v14 = vld [vmem:[#allocation2 + $0xf8] sm:$0xff] }
 0x1c4   :  { %8488 = vst [vmem:[#allocation154_spill] sm:$0xff] %v5472_v14 }
 0x1c5   :  { %8485 = vst [vmem:[#allocation151_spill] sm:$0xff] %v5446_v62 }
 0x1c6   :  { %2341 = vst.msk [vmem:[#allocation2 + $0x40] sm:$0xff] %vm71_vm1, %v5446_v62  ;;  %v1107_v13 = vpop.xlane.xlu2 %1106 }
 0x1c7   :  { %v5451_v11 = vmax.f32 %v4797_v26, %v1107_v13 }
 0x1c9   :  { %8486 = vst [vmem:[#allocation152_spill] sm:$0xff] %v5451_v11  ;;  %1810 = vrot.lane.b32.xlu0 %v5386_v10, %s4488_s6  ;;  %1345 = vperm.xlu1 %4172, %v5451_v11  }
 0x1ca   :  { %2340 = vst.msk [vmem:[#allocation2 + $0x38] sm:$0xff] %vm71_vm1, %v5451_v11 }
 0x1cc   :  { %1320 = vperm.xlu2 %4173, %v5205_v52  }
 0x1ce   :  { %v5480_v10 = vpop.permute.xlu2 %1806 }
 0x1cf   :  { %8490 = vst [vmem:[#allocation156_spill] sm:$0xff] %v5480_v10 }
 0x1d1   :  { %1325 = vperm.xlu0 %4171, %v5280_v0  }
 0x1d4   :  { %1400 = vperm.xlu2 %4173, %v5221_v58  }
 0x1d5   :  { %v5476_v13 = vpop.permute.xlu0 %1804 }
 0x1d6   :  { %8489 = vst [vmem:[#allocation155_spill] sm:$0xff] %v5476_v13 }
 0x1d9   :  { %1410 = vperm.xlu0 %4171, %v5287_v24  }
 0x1dc   :  { %1812 = vrot.lane.b32.xlu2 %v5462_v39, %s4488_s6 }
 0x1e1   :  { %1335 = vperm.xlu0 %4171, %v5300_v1  }
 0x1e4   :  { %1415 = vperm.xlu2 %4173, %v5311_v50   ;;  %v462_v50 = vlaneseq }
 0x1e9   :  { %1816 = vrot.lane.b32.xlu0 %v5414_v42, %s4488_s6 }
 0x1ec   :  { %1340 = vperm.xlu2 %4173, %v5322_v59  }
 0x1f1   :  { %1425 = vperm.xlu0 %4171, %v5434_v45  }
 0x1f4   :  { %1818 = vrot.lane.b32.xlu2 %v5472_v14, %s4488_s6 }
 0x1f9   :  { %1350 = vperm.xlu0 %4171, %v5446_v62  }
 0x1fc   :  { %1430 = vperm.xlu2 %4173, %v5345_v55  }
 0x200   :  { %v1164_v8 = vpop.xlane.xlu0 %1163 }
 0x201   :  { %v5483_v42 = vmax.f32 %v5275_v16, %v1164_v8 }
 0x203   :  { %8491 = vst [vmem:[#allocation157_spill] sm:$0xff] %v5483_v42  ;;  %1440 = vperm.xlu0 %4171, %v5483_v42  }
 0x204   :  { %2359 = vst.msk [vmem:[#allocation2 + $0xd0] sm:$0xff] %vm71_vm1, %v5483_v42  ;;  %1355 = vperm.xlu2 %4173, %v5366_v25  }
 0x207   :  { %v1161_v61 = vpop.xlane.xlu2 %1160 }
 0x208   :  { %v5490_v13 = vmax.f32 %v5271_v29, %v1161_v61  ;;  %v1119_v45 = vpop.xlane.xlu0 %1118  ;;  %v1391_v29 = vpop.permute.xlu1 %1390 }
 0x209   :  { %v5493_v55 = vmax.f32 %v4851_v35, %v1119_v45 }
 0x20a   :  { %8492 = vst [vmem:[#allocation158_spill] sm:$0xff] %v5490_v13  ;;  %1435 = vperm.xlu1 %4172, %v5490_v13  }
 0x20b   :  { %8493 = vst [vmem:[#allocation159_spill] sm:$0xff] %v5493_v55  ;;  %1365 = vperm.xlu0 %4171, %v5493_v55  }
 0x20c   :  { %2358 = vst.msk [vmem:[#allocation2 + $0xc8] sm:$0xff] %vm71_vm1, %v5490_v13  ;;  %1445 = vperm.xlu2 %4173, %v5389_v27  }
 0x20d   :  { %2344 = vst.msk [vmem:[#allocation2 + $0x58] sm:$0xff] %vm71_vm1, %v5493_v55 }
 0x20f   :  { %v1116_v8 = vpop.xlane.xlu2 %1115 }
 0x210   :  { %v5503_v61 = vmax.f32 %v4831_v31, %v1116_v8  ;;  %v1173_v10 = vpop.xlane.xlu0 %1172 }
 0x211   :  { %v5506_v45 = vmax.f32 %v5328_v57, %v1173_v10 }
 0x212   :  { %8494 = vst [vmem:[#allocation160_spill] sm:$0xff] %v5503_v61  ;;  %1360 = vperm.xlu1 %4172, %v5503_v61  }
 0x213   :  { %8495 = vst [vmem:[#allocation161_spill] sm:$0xff] %v5506_v45  ;;  %1455 = vperm.xlu0 %4171, %v5506_v45  }
 0x214   :  { %2343 = vst.msk [vmem:[#allocation2 + $0x50] sm:$0xff] %vm71_vm1, %v5503_v61  ;;  %1370 = vperm.xlu2 %4173, %v5404_v37   ;;  %v8506_v61 = vld [vmem:[#allocation80_spill] sm:$0xff] }
 0x215   :  { %2362 = vst.msk [vmem:[#allocation2 + $0xe8] sm:$0xff] %vm71_vm1, %v5506_v45 }
 0x217   :  { %v1170_v27 = vpop.xlane.xlu2 %1169 }
 0x218   :  { %v5516_v8 = vmax.f32 %v5462_v39, %v1170_v27  ;;  %v1128_v13 = vpop.xlane.xlu0 %1127  ;;  %v1316_v39 = vpop.permute.xlu1 %1315 }
 0x219   :  { %v5519_v10 = vmax.f32 %v4869_v40, %v1128_v13 }
 0x21a   :  { %8496 = vst [vmem:[#allocation162_spill] sm:$0xff] %v5516_v8  ;;  %1450 = vperm.xlu1 %4172, %v5516_v8  }
 0x21b   :  { %8497 = vst [vmem:[#allocation163_spill] sm:$0xff] %v5519_v10  ;;  %1380 = vperm.xlu0 %4171, %v5519_v10  }
 0x21c   :  { %2361 = vst.msk [vmem:[#allocation2 + $0xe0] sm:$0xff] %vm71_vm1, %v5516_v8  ;;  %1460 = vperm.xlu2 %4173, %v5419_v44   ;;  %v1470_v44 = vsub.f32 %v4957_v17, %v1316_v39 }
 0x21d   :  { %2347 = vst.msk [vmem:[#allocation2 + $0x70] sm:$0xff] %vm71_vm1, %v5519_v10  ;;  %v8507_v10 = vld [vmem:[#allocation55_spill] sm:$0xff] }
 0x21e   :  { %v1536_v24 = vmul.f32 1.442695, %v1470_v44 }
 0x21f   :  { %v1125_v57 = vpop.xlane.xlu2 %1124 }
 0x220   :  { %v5529_v27 = vmax.f32 %v4853_v36, %v1125_v57  ;;  %v5538_v45 = vpop.permute.xlu1 %1808  ;;  %v5544_v36 = vshrl.u32 %v462_v50, 7  ;;  %4174 = vpow2.f32 %v1536_v24 }
 0x221   :  { %8500 = vst [vmem:[#allocation166_spill] sm:$0xff] %v5538_v45 }
 0x222   :  { %8498 = vst [vmem:[#allocation164_spill] sm:$0xff] %v5529_v27  ;;  %1375 = vperm.xlu1 %4172, %v5529_v27  }
 0x223   :  { %2346 = vst.msk [vmem:[#allocation2 + $0x68] sm:$0xff] %vm71_vm1, %v5529_v27  ;;  %v464_v27 = vadd.s32 8, %v5544_v36 }
 0x224   :  { %1385 = vperm.xlu2 %4173, %v5428_v9  }
 0x226   :  { %v4175_v44 = vpop.eup %4174 }
 0x227   :  { %v1179_v13 = vpop.xlane.xlu2 %1178 }
 0x228   :  { %v5536_v8 = vmax.f32 %v5472_v14, %v1179_v13  ;;  %v1406_v42 = vpop.permute.xlu1 %1405  ;;  %v1500_v13 = vsub.f32 %v4953_v12, %v1391_v29 }
 0x229   :  { %v1506_v40 = vsub.f32 %v8506_v61, %v1406_v42 }
 0x22a   :  { %8499 = vst [vmem:[#allocation165_spill] sm:$0xff] %v5536_v8  ;;  %1465 = vperm.xlu1 %4172, %v5536_v8   ;;  %v1596_v49 = vmul.f32 1.442695, %v1500_v13 }
 0x22b   :  { %2364 = vst.msk [vmem:[#allocation2 + $0xf8] sm:$0xff] %vm71_vm1, %v5536_v8  ;;  %v1311_v57 = vpop.permute.xlu0 %1310  ;;  %v5551_v8 = vand.u32 127, %v462_v50 }
 0x22c   :  { %4176 = vpow2.f32 %v1596_v49  ;;  %v1468_v24 = vsub.f32 %v4941_v4, %v1311_v57 }
 0x22d   :  { %vm537_vm2 = vcmp.ne.s32.totalorder %v464_v27, %v5551_v8  ;;  %vm599_vm3 = vcmp.lt.s32.totalorder %v5551_v8, 16  ;;  %v465_v27 = vadd.s32 16, %v5544_v36  ;;  %vm535_vm7 = vcmp.ne.s32.totalorder %v5544_v36, %v5551_v8 }
 0x22e   :  { %vm5560_vm4 = vmand %vm537_vm2, %vm599_vm3 }
 0x22f   :  { %v1321_v58 = vpop.permute.xlu2 %1320  ;;  %vm539_vm5 = vcmp.ne.s32.totalorder %v465_v27, %v5551_v8  ;;  %v467_v27 = vadd.s32 32, %v5544_v36  ;;  %vm5593_vm9 = vmand %vm535_vm7, %vm599_vm3 }
 0x230   :  { %v1472_v14 = vsub.f32 %v4971_v46, %v1321_v58  ;;  %v1331_v39 = vpop.permute.xlu1 %1330  ;;  %v8502_v58 = vld [vmem:[#allocation49_spill] sm:$0xff]  ;;  %vm5574_vm6 = vmand %vm539_vm5, %vm599_vm3 }
 0x231   :  { %v1476_v53 = vsub.f32 %v5087_v7, %v1331_v39  ;;  %vm543_vm8 = vcmp.ne.s32.totalorder %v467_v27, %v5551_v8  ;;  %v8517_v27 = vld [vmem:[#allocation84_spill] sm:$0xff] }
 0x232   :  { %v1540_v9 = vmul.f32 1.442695, %v1472_v14  ;;  %v1662_v14 = vsel %vm5560_vm4, %v4175_v44, 0.0  ;;  %vm5599_vm10 = vmand %vm543_vm8, %vm599_vm3 }
 0x233   :  { %v1396_v16 = vpop.permute.xlu0 %1395  ;;  %v1548_v13 = vmul.f32 1.442695, %v1476_v53 }
 0x234   :  { %4178 = vpow2.f32 %v1540_v9  ;;  %v1502_v29 = vsub.f32 %v8502_v58, %v1396_v16  ;;  %v1532_v9 = vmul.f32 1.442695, %v1468_v24  ;;  %v4177_v16 = vpop.eup %4176  ;;  %v8510_v24 = vld [vmem:[#allocation78_spill] sm:$0xff] }
 0x235   :  { %4180 = vpow2.f32 %v1548_v13  ;;  %v1608_v13 = vmul.f32 1.442695, %v1506_v40  ;;  %v8512_v40 = vld [vmem:[#allocation74_spill] sm:$0xff] }
 0x236   :  { %v1600_v57 = vmul.f32 1.442695, %v1502_v29  ;;  %4182 = vpow2.f32 %v1532_v9 }
 0x238   :  { %v5567_v49 = vpop.permute.xlu1 %1814  ;;  %4184 = vpow2.f32 %v1600_v57 }
 0x239   :  { %8505 = vst [vmem:[#allocation49_spill] sm:$0xff] %v5567_v49  ;;  %4186 = vpow2.f32 %v1608_v13 }
 0x23a   :  { %v4179_v39 = vpop.eup %4178 }
 0x23b   :  { %v5548_v45 = vpop.permute.xlu0 %1810  ;;  %v1664_v42 = vsel %vm5574_vm6, %v4179_v39, 0.0  ;;  %v4181_v49 = vpop.eup %4180 }
 0x23c   :  { %8501 = vst [vmem:[#allocation167_spill] sm:$0xff] %v5548_v45  ;;  %v1401_v45 = vpop.permute.xlu2 %1400 }
 0x23d   :  { %v1504_v37 = vsub.f32 %v8507_v10, %v1401_v45 }
 0x23f   :  { %v1604_v57 = vmul.f32 1.442695, %v1504_v37 }
 0x240   :  { %v1421_v9 = vpop.permute.xlu1 %1420 }
 0x241   :  { %v1512_v39 = vsub.f32 %v5240_v54, %v1421_v9  ;;  %4188 = vpow2.f32 %v1604_v57 }
 0x243   :  { %v1326_v31 = vpop.permute.xlu0 %1325 }
 0x244   :  { %v5584_v45 = vpop.permute.xlu2 %1812  ;;  %v1474_v11 = vsub.f32 %v8512_v40, %v1326_v31  ;;  %v1668_v31 = vsel %vm5599_vm10, %v4181_v49, 0.0  ;;  %v468_v49 = vadd.s32 40, %v5544_v36 }
 0x245   :  { %1888 = vadd.xlane.f32.xlu0 %v1662_v14  ;;  %v1692_v14 = vsel %vm599_vm3, %v4177_v16, 0.0  ;;  %8511 = vst [vmem:[#allocation80_spill] sm:$0xff] %v5584_v45 }
 0x246   :  { %v1544_v57 = vmul.f32 1.442695, %v1474_v11  ;;  %vm545_vm11 = vcmp.ne.s32.totalorder %v468_v49, %v5551_v8 }
 0x247   :  { %vm5634_vm15 = vmand %vm545_vm11, %vm599_vm3 }
 0x248   :  { %v1346_v30 = vpop.permute.xlu1 %1345 }
 0x24b   :  { %v1411_v44 = vpop.permute.xlu0 %1410 }
 0x24c   :  { %v1508_v29 = vsub.f32 %v8510_v24, %v1411_v44  ;;  %v4183_v44 = vpop.eup %4182  ;;  %v1416_v35 = vpop.permute.xlu2 %1415 }
 0x24d   :  { %1933 = vadd.xlane.f32.xlu0 %v1692_v14  ;;  %1891 = vadd.xlane.f32.xlu2 %v1664_v42  ;;  %v4185_v16 = vpop.eup %4184  ;;  %v1660_v42 = vsel %vm5593_vm9, %v4183_v44, 0.0  ;;  %v697_v44 = vld [vmem:[%s8111_s3] sm:$0x3]  ;;  %v8527_v14 = vmov 0.0   ;;  %s4489_s3 = smov 1  }
 0x24e   :  { %v1612_v26 = vmul.f32 1.442695, %v1508_v29  ;;  %v1694_v9 = vsel %vm599_vm3, %v4185_v16, 0.0  ;;  %v4187_v45 = vpop.eup %4186  ;;  %v1482_v16 = vsub.f32 %v5256_v38, %v1346_v30  ;;  %v8519_v30 = vld [vmem:[#allocation32_spill] sm:$0xff] }
 0x24f   :  { %v4189_v25 = vpop.eup %4188 }
 0x250   :  { %4190 = vpow2.f32 %v1612_v26  ;;  %v1620_v26 = vmul.f32 1.442695, %v1512_v39  ;;  %v1696_v11 = vsel %vm599_vm3, %v4189_v25, 0.0  ;;  %v1560_v25 = vmul.f32 1.442695, %v1482_v16 }
 0x252   :  { %4192 = vpow2.f32 %v1620_v26  ;;  %v8520_v26 = vld [vmem:[#allocation27_spill] sm:$0xff] }
 0x253   :  { %v1336_v37 = vpop.permute.xlu0 %1335  ;;  %4194 = vpow2.f32 %v1544_v57 }
 0x254   :  { %v1478_v13 = vsub.f32 %v8517_v27, %v1336_v37  ;;  %1885 = vadd.xlane.f32.xlu1 %v1660_v42  ;;  %v466_v37 = vadd.s32 24, %v5544_v36  ;;  %v5620_v42 = vperm.slane %v697_v44, 0  ;;  %v1341_v57 = vpop.permute.xlu2 %1340  ;;  %v8523_v44 = vld [vmem:[#allocation88_spill] sm:$0xff] }
 0x255   :  { %1897 = vadd.xlane.f32.xlu0 %v1668_v31  ;;  %1936 = vadd.xlane.f32.xlu2 %v1694_v9  ;;  %v1510_v49 = vsub.f32 %v8523_v44, %v1416_v35 }
 0x256   :  { %v1552_v55 = vmul.f32 1.442695, %v1478_v13  ;;  %v4191_v62 = vpop.eup %4190  ;;  %v1698_v13 = vsel %vm599_vm3, %v4187_v45, 0.0  ;;  %vm798_vm12 = vcmp.eq.s32.totalorder %v8519_v30, %v5620_v42  ;;  %vm541_vm13 = vcmp.ne.s32.totalorder %v466_v37, %v5551_v8  ;;  %v8526_v30 = vld [vmem:[#allocation24_spill] sm:$0xff] }
 0x257   :  { %v1700_v31 = vsel %vm599_vm3, %v4191_v62, 0.0  ;;  %vm796_vm14 = vcmp.eq.s32.totalorder %v8520_v26, %v5620_v42  ;;  %vm862_vm0 = vmand %vm798_vm12, %vm5560_vm4  ;;  %vm800_vm4 = vcmp.eq.s32.totalorder %v8526_v30, %v5620_v42 }
 0x258   :  { %4196 = vpow2.f32 %v1552_v55  ;;  %v4193_v55 = vpop.eup %4192  ;;  %vm5643_vm2 = vmand %vm541_vm13, %vm599_vm3 }
 0x259   :  { %v4195_v9 = vpop.eup %4194  ;;  %4198 = vpow2.f32 %v1560_v25  ;;  %vm860_vm5 = vmand %vm796_vm14, %vm5593_vm9  ;;  %v5660_v25 = vsel %vm862_vm0, 1.0, %v8527_v14 }
 0x25a   :  { %v1666_v37 = vsel %vm5643_vm2, %v4195_v9, 0.0  ;;  %v8528_v9 = vld [vmem:[#allocation45_spill] sm:$0xff]  ;;  %vm864_vm8 = vmand %vm800_vm4, %vm5574_vm6 }
 0x25b   :  { %v5615_v39 = vpop.permute.xlu0 %1816  ;;  %v2015_v26 = vmul.f32 0.0, %v8528_v9 }
 0x25c   :  { %8518 = vst [vmem:[#allocation55_spill] sm:$0xff] %v5615_v39  ;;  %1939 = vadd.xlane.f32.xlu1 %v1696_v11  ;;  %v5664_v39 = vsel %vm860_vm5, 1.0, %v8527_v14  ;;  %v5675_v9 = vpop.permute.xlu2 %1818 }
 0x25d   :  { %1942 = vadd.xlane.f32.xlu0 %v1698_v13  ;;  %1945 = vadd.xlane.f32.xlu2 %v1700_v31  ;;  %v1704_v13 = vsel %vm599_vm3, %v4193_v55, 0.0  ;;  %v470_v31 = vadd.s32 56, %v5544_v36  ;;  %8529 = vst [vmem:[#allocation78_spill] sm:$0xff] %v5664_v39  ;;  %v2014_v55 = vmul.f32 %v5660_v25, %v4957_v17  ;;  %v2012_v30 = vmul.f32 %v5664_v39, %v4941_v4 }
 0x25e   :  { %v4197_v62 = vpop.eup %4196  ;;  %8532 = vst [vmem:[#allocation74_spill] sm:$0xff] %v5675_v9 }
 0x25f   :  { %v1670_v35 = vsel %vm5634_vm15, %v4197_v62, 0.0  ;;  %v8530_v62 = vld [vmem:[#allocation41_spill] sm:$0xff]  ;;  %vm549_vm7 = vcmp.ne.s32.totalorder %v470_v31, %v5551_v8  ;;  %v4199_v60 = vpop.eup %4198  ;;  %v5684_v31 = vsel %vm864_vm8, 1.0, %v8527_v14 }
 0x260   :  { %vm5679_vm9 = vmand %vm549_vm7, %vm599_vm3  ;;  %8535 = vst [vmem:[#allocation84_spill] sm:$0xff] %v5684_v31 }
 0x263   :  { %v1426_v11 = vpop.permute.xlu0 %1425 }
 0x264   :  { %v1514_v50 = vsub.f32 %v5230_v48, %v1426_v11  ;;  %1894 = vadd.xlane.f32.xlu1 %v1666_v37  ;;  %v1616_v11 = vmul.f32 1.442695, %v1510_v49  ;;  %v2013_v37 = vmul.f32 0.0, %v8530_v62  ;;  %v8531_v49 = vld [vmem:[#allocation93_spill] sm:$0xff] }
 0x265   :  { %1951 = vadd.xlane.f32.xlu0 %v1704_v13  ;;  %1900 = vadd.xlane.f32.xlu2 %v1670_v35  ;;  %v1480_v13 = vsub.f32 %v8531_v49, %v1341_v57  ;;  %v2079_v35 = vadd.f32 %v2015_v26, %v2014_v55  ;;  %v1674_v57 = vsel %vm5679_vm9, %v4199_v60, 0.0  ;;  %v8536_v26 = vld [vmem:[#allocation51_spill] sm:$0xff]  ;;  %v2016_v55 = vmul.f32 %v5684_v31, %v4971_v46  ;;  %v1431_v46 = vpop.permute.xlu2 %1430 }
 0x266   :  { %v1624_v59 = vmul.f32 1.442695, %v1514_v50  ;;  %4200 = vpow2.f32 %v1616_v11  ;;  %v2076_v4 = vadd.f32 %v2013_v37, %v2012_v30  ;;  %v2017_v11 = vmul.f32 0.0, %v8536_v26  ;;  %v8539_v26 = vld [vmem:[#allocation97_spill] sm:$0xff]  ;;  %v8547_v31 = vld [vmem:[#allocation103_spill] sm:$0xff] }
 0x267   :  { %v469_v60 = vadd.s32 48, %v5544_v36 }
 0x268   :  { %4202 = vpow2.f32 %v1624_v59  ;;  %v1556_v59 = vmul.f32 1.442695, %v1480_v13  ;;  %v2082_v30 = vadd.f32 %v2017_v11, %v2016_v55  ;;  %v1516_v11 = vsub.f32 %v8539_v26, %v1431_v46 }
 0x269   :  { %vm547_vm12 = vcmp.ne.s32.totalorder %v469_v60, %v5551_v8 }
 0x26a   :  { %4204 = vpow2.f32 %v1556_v59  ;;  %vm5711_vm5 = vmand %vm547_vm12, %vm599_vm3  ;;  %v1628_v46 = vmul.f32 1.442695, %v1516_v11 }
 0x26b   :  { %v1351_v17 = vpop.permute.xlu0 %1350 }
 0x26c   :  { %v1484_v53 = vsub.f32 %v5248_v2, %v1351_v17  ;;  %2080 = vadd.xlane.f32.xlu1 %v2079_v35  ;;  %v4201_v9 = vpop.eup %4200  ;;  %v471_v35 = vadd.s32 64, %v5544_v36 }
 0x26d   :  { %1906 = vadd.xlane.f32.xlu0 %v1674_v57  ;;  %2077 = vadd.xlane.f32.xlu2 %v2076_v4  ;;  %v1702_v17 = vsel %vm599_vm3, %v4201_v9, 0.0  ;;  %v8537_v4 = vld [vmem:[#allocation25_spill] sm:$0xff]  ;;  %v1356_v1 = vpop.permute.xlu2 %1355 }
 0x26e   :  { %v1564_v62 = vmul.f32 1.442695, %v1484_v53  ;;  %v4203_v37 = vpop.eup %4202  ;;  %vm804_vm6 = vcmp.eq.s32.totalorder %v8537_v4, %v5620_v42  ;;  %v8538_v53 = vld [vmem:[#allocation30_spill] sm:$0xff]  ;;  %vm551_vm13 = vcmp.ne.s32.totalorder %v471_v35, %v5551_v8 }
 0x26f   :  { %v1706_v13 = vsel %vm599_vm3, %v4203_v37, 0.0  ;;  %vm802_vm11 = vcmp.eq.s32.totalorder %v8538_v53, %v5620_v42  ;;  %vm868_vm14 = vmand %vm804_vm6, %vm5599_vm10 }
 0x270   :  { %4206 = vpow2.f32 %v1564_v62  ;;  %v4205_v9 = vpop.eup %4204  ;;  %vm866_vm0 = vmand %vm802_vm11, %vm5643_vm2  ;;  %v5730_v60 = vsel %vm868_vm14, 1.0, %v8527_v14  ;;  %v8567_v62 = vld [vmem:[#allocation39_spill] sm:$0xff] }
 0x271   :  { %vm5717_vm4 = vmand %vm551_vm13, %vm599_vm3  ;;  %v1672_v16 = vsel %vm5711_vm5, %v4205_v9, 0.0  ;;  %v5725_v37 = vsel %vm866_vm0, 1.0, %v8527_v14  ;;  %v2020_v53 = vmul.f32 %v5730_v60, %v5087_v7 }
 0x272   :  { %8544 = vst [vmem:[#allocation32_spill] sm:$0xff] %v5725_v37 }
 0x274   :  { %1948 = vadd.xlane.f32.xlu1 %v1702_v17 }
 0x275   :  { %2083 = vadd.xlane.f32.xlu0 %v2082_v30  ;;  %1954 = vadd.xlane.f32.xlu2 %v1706_v13  ;;  %v1441_v57 = vpop.permute.xlu0 %1440  ;;  %v8545_v13 = vld [vmem:[#allocation87_spill] sm:$0xff] }
 0x276   :  { %v4207_v59 = vpop.eup %4206  ;;  %v1520_v29 = vsub.f32 %v5316_v3, %v1441_v57  ;;  %v2021_v4 = vmul.f32 0.0, %v8545_v13  ;;  %v8546_v57 = vld [vmem:[#allocation75_spill] sm:$0xff] }
 0x277   :  { %v1676_v17 = vsel %vm5717_vm4, %v4207_v59, 0.0  ;;  %v2019_v9 = vmul.f32 0.0, %v8546_v57 }
 0x278   :  { %v1636_v0 = vmul.f32 1.442695, %v1520_v29 }
 0x27c   :  { %v1436_v30 = vpop.permute.xlu1 %1435  ;;  %1903 = vadd.xlane.f32.xlu1 %v1672_v16  ;;  %v2018_v16 = vmul.f32 %v5725_v37, %v8512_v40 }
 0x27d   :  { %v1518_v35 = vsub.f32 %v5333_v18, %v1436_v30  ;;  %1909 = vadd.xlane.f32.xlu2 %v1676_v17  ;;  %v1366_v52 = vpop.permute.xlu0 %1365  ;;  %v1486_v30 = vsub.f32 %v8547_v31, %v1356_v1  ;;  %v2088_v17 = vadd.f32 %v2021_v4, %v2020_v53 }
 0x27e   :  { %v1490_v11 = vsub.f32 %v5339_v21, %v1366_v52  ;;  %v2085_v13 = vadd.f32 %v2019_v9, %v2018_v16  ;;  %v8548_v52 = vld [vmem:[#allocation31_spill] sm:$0xff]  ;;  %v8549_v16 = vld [vmem:[#allocation34_spill] sm:$0xff] }
 0x27f   :  { %v1632_v59 = vmul.f32 1.442695, %v1518_v35  ;;  %v1568_v57 = vmul.f32 1.442695, %v1486_v30  ;;  %vm806_vm10 = vcmp.eq.s32.totalorder %v8548_v52, %v5620_v42  ;;  %vm810_vm7 = vcmp.eq.s32.totalorder %v8549_v16, %v5620_v42  ;;  %v1446_v30 = vpop.permute.xlu2 %1445  ;;  %v8557_v52 = vld [vmem:[#allocation109_spill] sm:$0xff] }
 0x280   :  { %v1576_v37 = vmul.f32 1.442695, %v1490_v11  ;;  %vm870_vm8 = vmand %vm806_vm10, %vm5634_vm15  ;;  %v8550_v11 = vld [vmem:[#allocation36_spill] sm:$0xff] }
 0x281   :  { %4208 = vpow2.f32 %v1632_v59  ;;  %v473_v59 = vadd.s32 80, %v5544_v36  ;;  %vm808_vm11 = vcmp.eq.s32.totalorder %v8550_v11, %v5620_v42  ;;  %v5770_v45 = vsel %vm870_vm8, 1.0, %v8527_v14  ;;  %vm874_vm13 = vmand %vm810_vm7, %vm5679_vm9 }
 0x282   :  { %4210 = vpow2.f32 %v1628_v46  ;;  %v474_v46 = vadd.s32 88, %v5544_v36  ;;  %8553 = vst [vmem:[#allocation27_spill] sm:$0xff] %v5770_v45  ;;  %vm872_vm9 = vmand %vm808_vm11, %vm5711_vm5 }
 0x283   :  { %4212 = vpow2.f32 %v1636_v0  ;;  %v472_v0 = vadd.s32 72, %v5544_v36  ;;  %vm555_vm2 = vcmp.ne.s32.totalorder %v473_v59, %v5551_v8  ;;  %v8556_v59 = vld [vmem:[#allocation85_spill] sm:$0xff]  ;;  %v5803_v16 = vsel %vm872_vm9, 1.0, %v8527_v14 }
 0x284   :  { %v1361_v39 = vpop.permute.xlu1 %1360  ;;  %2089 = vadd.xlane.f32.xlu1 %v2088_v17  ;;  %vm5763_vm12 = vmand %vm555_vm2, %vm599_vm3  ;;  %vm557_vm15 = vcmp.ne.s32.totalorder %v474_v46, %v5551_v8 }
 0x285   :  { %v1488_v7 = vsub.f32 %v5360_v33, %v1361_v39  ;;  %2086 = vadd.xlane.f32.xlu2 %v2085_v13  ;;  %vm553_vm6 = vcmp.ne.s32.totalorder %v472_v0, %v5551_v8  ;;  %v1522_v0 = vsub.f32 %v8557_v52, %v1446_v30  ;;  %vm5790_vm0 = vmand %vm557_vm15, %vm599_vm3 }
 0x286   :  { %vm5778_vm14 = vmand %vm553_vm6, %vm599_vm3 }
 0x287   :  { %v4209_v40 = vpop.eup %4208  ;;  %v1572_v29 = vmul.f32 1.442695, %v1488_v7 }
 0x288   :  { %v4211_v35 = vpop.eup %4210  ;;  %v1710_v1 = vsel %vm599_vm3, %v4209_v40, 0.0 }
 0x289   :  { %v4213_v4 = vpop.eup %4212  ;;  %4214 = vpow2.f32 %v1572_v29  ;;  %1960 = vadd.xlane.f32.xlu0 %v1710_v1  ;;  %v1708_v39 = vsel %vm599_vm3, %v4211_v35, 0.0  ;;  %v2023_v1 = vmul.f32 0.0, %v8556_v59  ;;  %v1371_v59 = vpop.permute.xlu2 %1370 }
 0x28a   :  { %4216 = vpow2.f32 %v1568_v57  ;;  %v1712_v9 = vsel %vm599_vm3, %v4213_v4, 0.0  ;;  %v2022_v4 = vmul.f32 %v5770_v45, %v8517_v27 }
 0x28b   :  { %4218 = vpow2.f32 %v1576_v37  ;;  %v1456_v37 = vpop.permute.xlu0 %1455 }
 0x28c   :  { %v1451_v53 = vpop.permute.xlu1 %1450  ;;  %1957 = vadd.xlane.f32.xlu1 %v1708_v39  ;;  %v5795_v39 = vsel %vm874_vm13, 1.0, %v8527_v14  ;;  %v1526_v46 = vsub.f32 %v5354_v19, %v1456_v37  ;;  %v2091_v30 = vadd.f32 %v2023_v1, %v2022_v4  ;;  %v1640_v37 = vmul.f32 1.442695, %v1522_v0 }
 0x28d   :  { %1963 = vadd.xlane.f32.xlu2 %v1712_v9  ;;  %v1524_v7 = vsub.f32 %v5381_v15, %v1451_v53  ;;  %v2026_v11 = vmul.f32 %v5795_v39, %v5256_v38  ;;  %v1492_v1 = vsub.f32 %v5187_v22, %v1371_v59 }
 0x28f   :  { %v4215_v17 = vpop.eup %4214  ;;  %v1644_v53 = vmul.f32 1.442695, %v1524_v7  ;;  %v2024_v7 = vmul.f32 %v5803_v16, %v8531_v49 }
 0x290   :  { %v4217_v57 = vpop.eup %4216  ;;  %v1680_v40 = vsel %vm5763_vm12, %v4215_v17, 0.0  ;;  %v2027_v17 = vmul.f32 0.0, %v5259_v28 }
 0x291   :  { %v4219_v29 = vpop.eup %4218  ;;  %1915 = vadd.xlane.f32.xlu0 %v1680_v40  ;;  %v1678_v27 = vsel %vm5778_vm14, %v4217_v57, 0.0  ;;  %v8560_v57 = vld [vmem:[#allocation94_spill] sm:$0xff]  ;;  %4220 = vpow2.f32 %v1644_v53  ;;  %v476_v53 = vadd.s32 104, %v5544_v36  ;;  %v1461_v59 = vpop.permute.xlu2 %1460 }
 0x292   :  { %v1682_v55 = vsel %vm5790_vm0, %v4219_v29, 0.0  ;;  %v2025_v40 = vmul.f32 0.0, %v8560_v57  ;;  %4222 = vpow2.f32 %v1640_v37  ;;  %v2097_v28 = vadd.f32 %v2027_v17, %v2026_v11  ;;  %v8561_v11 = vld [vmem:[#allocation35_spill] sm:$0xff] }
 0x293   :  { %v1381_v45 = vpop.permute.xlu0 %1380  ;;  %v477_v17 = vadd.s32 112, %v5544_v36  ;;  %vm812_vm5 = vcmp.eq.s32.totalorder %v8561_v11, %v5620_v42  ;;  %vm561_vm10 = vcmp.ne.s32.totalorder %v476_v53, %v5551_v8 }
 0x294   :  { %v1376_v9 = vpop.permute.xlu1 %1375  ;;  %1912 = vadd.xlane.f32.xlu1 %v1678_v27  ;;  %v1648_v27 = vmul.f32 1.442695, %v1526_v46  ;;  %v1496_v38 = vsub.f32 %v5375_v47, %v1381_v45  ;;  %v2094_v0 = vadd.f32 %v2025_v40, %v2024_v7  ;;  %v475_v45 = vadd.s32 96, %v5544_v36  ;;  %vm876_vm7 = vmand %vm812_vm5, %vm5717_vm4 }
 0x295   :  { %1918 = vadd.xlane.f32.xlu2 %v1682_v55  ;;  %v1494_v29 = vsub.f32 %v5398_v34, %v1376_v9  ;;  %v1580_v55 = vmul.f32 1.442695, %v1492_v1  ;;  %vm563_vm2 = vcmp.ne.s32.totalorder %v477_v17, %v5551_v8  ;;  %vm5834_vm11 = vmand %vm561_vm10, %vm599_vm3  ;;  %vm814_vm4 = vcmp.eq.s32.totalorder %v8567_v62, %v5620_v42 }
 0x296   :  { %4224 = vpow2.f32 %v1648_v27  ;;  %v1588_v57 = vmul.f32 1.442695, %v1496_v38  ;;  %vm559_vm8 = vcmp.ne.s32.totalorder %v475_v45, %v5551_v8  ;;  %v8562_v27 = vld [vmem:[#allocation37_spill] sm:$0xff]  ;;  %vm5840_vm15 = vmand %vm563_vm2, %vm599_vm3 }
 0x297   :  { %v1584_v4 = vmul.f32 1.442695, %v1494_v29  ;;  %v4221_v49 = vpop.eup %4220  ;;  %vm816_vm6 = vcmp.eq.s32.totalorder %v8562_v27, %v5620_v42  ;;  %vm5850_vm13 = vmand %vm559_vm8, %vm599_vm3 }
 0x298   :  { %v4223_v46 = vpop.eup %4222  ;;  %v1716_v9 = vsel %vm599_vm3, %v4221_v49, 0.0  ;;  %v5855_v49 = vsel %vm876_vm7, 1.0, %v8527_v14  ;;  %vm880_vm9 = vmand %vm816_vm6, %vm5763_vm12 }
 0x299   :  { %2092 = vadd.xlane.f32.xlu0 %v2091_v30  ;;  %4226 = vpow2.f32 %v1584_v4  ;;  %v1714_v37 = vsel %vm599_vm3, %v4223_v46, 0.0  ;;  %vm878_vm5 = vmand %vm814_vm4, %vm5778_vm14  ;;  %v2029_v46 = vmul.f32 0.0, %v5251_v5  ;;  %v5872_v17 = vsel %vm880_vm9, 1.0, %v8527_v14 }
 0x29a   :  { %4228 = vpow2.f32 %v1580_v55  ;;  %v1528_v55 = vsub.f32 %v5207_v51, %v1461_v59  ;;  %v5875_v35 = vsel %vm878_vm5, 1.0, %v8527_v14  ;;  %v2032_v5 = vmul.f32 %v5872_v17, %v5360_v33 }
 0x29b   :  { %4230 = vpow2.f32 %v1588_v57  ;;  %v2028_v57 = vmul.f32 %v5855_v49, %v5248_v2  ;;  %v2033_v2 = vmul.f32 0.0, %v5363_v20  ;;  %v2030_v11 = vmul.f32 %v5875_v35, %v8547_v31 }
 0x29c   :  { %2098 = vadd.xlane.f32.xlu1 %v2097_v28  ;;  %v4225_v30 = vpop.eup %4224  ;;  %v1652_v45 = vmul.f32 1.442695, %v1528_v55  ;;  %v478_v33 = vadd.s32 120, %v5544_v36 }
 0x29d   :  { %2095 = vadd.xlane.f32.xlu2 %v2094_v0  ;;  %v1718_v7 = vsel %vm599_vm3, %v4225_v30, 0.0  ;;  %v1466_v30 = vpop.permute.xlu1 %1465  ;;  %v2100_v27 = vadd.f32 %v2029_v46, %v2028_v57  ;;  %v2106_v62 = vadd.f32 %v2033_v2, %v2032_v5  ;;  %v8573_v0 = vld [vmem:[#allocation113_spill] sm:$0xff]  ;;  %v8577_v2 = vld [vmem:[#allocation42_spill] sm:$0xff] }
 0x29e   :  { %v1530_v59 = vsub.f32 %v5410_v32, %v1466_v30  ;;  %4232 = vpow2.f32 %v1652_v45  ;;  %vm565_vm2 = vcmp.ne.s32.totalorder %v478_v33, %v5551_v8  ;;  %v8576_v30 = vld [vmem:[#allocation48_spill] sm:$0xff]  ;;  %vm824_vm4 = vcmp.eq.s32.totalorder %v8577_v2, %v5620_v42  ;;  %v8614_v8 = vld [vmem:[#allocation78_spill] sm:$0xff] }
 0x29f   :  { %v4227_v40 = vpop.eup %4226  ;;  %vm5907_vm7 = vmand %vm565_vm2, %vm599_vm3  ;;  %vm826_vm8 = vcmp.eq.s32.totalorder %v8576_v30, %v5620_v42 }
 0x2a0   :  { %v4229_v1 = vpop.eup %4228  ;;  %v1686_v38 = vsel %vm5834_vm11, %v4227_v40, 0.0  ;;  %v1386_v40 = vpop.permute.xlu2 %1385  ;;  %vm890_vm6 = vmand %vm826_vm8, %vm5907_vm7 }
 0x2a1   :  { %1969 = vadd.xlane.f32.xlu0 %v1716_v9  ;;  %v4231_v4 = vpop.eup %4230  ;;  %v1684_v53 = vsel %vm5850_vm13, %v4229_v1, 0.0  ;;  %v8570_v9 = vld [vmem:[#allocation38_spill] sm:$0xff]  ;;  %v8572_v1 = vld [vmem:[#allocation43_spill] sm:$0xff]  ;;  %v1498_v50 = vsub.f32 %v5223_v41, %v1386_v40  ;;  %v2043_v40 = vmul.f32 0.0, %v5225_v23  ;;  %v2041_v23 = vmul.f32 0.0, %v5378_v63 }
 0x2a2   :  { %vm818_vm10 = vcmp.eq.s32.totalorder %v8570_v9, %v5620_v42  ;;  %v1688_v13 = vsel %vm5840_vm15, %v4231_v4, 0.0  ;;  %vm820_vm14 = vcmp.eq.s32.totalorder %v8572_v1, %v5620_v42  ;;  %v1656_v4 = vmul.f32 1.442695, %v1530_v59 }
 0x2a3   :  { %vm882_vm12 = vmand %vm818_vm10, %vm5790_vm0  ;;  %v1592_v57 = vmul.f32 1.442695, %v1498_v50  ;;  %v2039_v63 = vmul.f32 0.0, %v5401_v6 }
 0x2a4   :  { %1966 = vadd.xlane.f32.xlu1 %v1714_v37  ;;  %v8571_v37 = vld [vmem:[#allocation104_spill] sm:$0xff]  ;;  %v5890_v20 = vsel %vm882_vm12, 1.0, %v8527_v14  ;;  %vm884_vm0 = vmand %vm820_vm14, %vm5850_vm13  ;;  %4234 = vpow2.f32 %v1656_v4  ;;  %v8581_v4 = vld [vmem:[#allocation46_spill] sm:$0xff] }
 0x2a5   :  { %1972 = vadd.xlane.f32.xlu2 %v1718_v7  ;;  %v2031_v7 = vmul.f32 0.0, %v8571_v37  ;;  %v2034_v31 = vmul.f32 %v5890_v20, %v5339_v21  ;;  %v5900_v36 = vsel %vm884_vm0, 1.0, %v8527_v14  ;;  %v4233_v21 = vpop.eup %4232  ;;  %4236 = vpow2.f32 %v1592_v57  ;;  %vm888_vm13 = vmand %vm824_vm4, %vm5840_vm15  ;;  %v8578_v37 = vld [vmem:[#allocation40_spill] sm:$0xff] }
 0x2a6   :  { %v2036_v46 = vmul.f32 %v5900_v36, %v5187_v22  ;;  %v1720_v22 = vsel %vm599_vm3, %v4233_v21, 0.0  ;;  %vm822_vm9 = vcmp.eq.s32.totalorder %v8578_v37, %v5620_v42  ;;  %v5938_v28 = vsel %vm888_vm13, 1.0, %v8527_v14  ;;  %v8583_v21 = vld [vmem:[#allocation59_spill] sm:$0xff] }
 0x2a7   :  { %v2103_v55 = vadd.f32 %v2031_v7, %v2030_v11  ;;  %v5922_v11 = vsel %vm890_vm6, 1.0, %v8527_v14  ;;  %vm886_vm15 = vmand %vm822_vm9, %vm5834_vm11  ;;  %vm828_vm11 = vcmp.eq.s32.totalorder %v8581_v4, %v5620_v42  ;;  %vm838_vm2 = vcmp.eq.s32.totalorder %v8583_v21, %v5620_v42  ;;  %v8592_v21 = vld [vmem:[#allocation57_spill] sm:$0xff] }
 0x2a8   :  { %v2042_v7 = vmul.f32 %v5922_v11, %v5223_v41  ;;  %v2040_v41 = vmul.f32 %v5938_v28, %v5375_v47  ;;  %v5954_v29 = vsel %vm886_vm15, 1.0, %v8527_v14  ;;  %vm892_vm0 = vmand %vm828_vm11, %vm599_vm3 }
 0x2a9   :  { %1924 = vadd.xlane.f32.xlu0 %v1686_v38  ;;  %v2035_v38 = vmul.f32 0.0, %v5342_v56  ;;  %v2038_v47 = vmul.f32 %v5954_v29, %v5398_v34 }
 0x2aa   :  { %v4235_v45 = vpop.eup %4234 }
 0x2ab   :  { %v2109_v9 = vadd.f32 %v2035_v38, %v2034_v31  ;;  %v4237_v59 = vpop.eup %4236  ;;  %v1722_v33 = vsel %vm599_vm3, %v4235_v45, 0.0  ;;  %v8580_v38 = vld [vmem:[#allocation47_spill] sm:$0xff]  ;;  %v2115_v56 = vadd.f32 %v2039_v63, %v2038_v47  ;;  %v8585_v45 = vld [vmem:[#allocation53_spill] sm:$0xff] }
 0x2ac   :  { %1921 = vadd.xlane.f32.xlu1 %v1684_v53  ;;  %v2037_v53 = vmul.f32 0.0, %v8573_v0  ;;  %v1690_v31 = vsel %vm5907_vm7, %v4237_v59, 0.0  ;;  %vm830_vm12 = vcmp.eq.s32.totalorder %v8580_v38, %v5620_v42  ;;  %vm902_vm7 = vmand %vm838_vm2, %vm599_vm3  ;;  %vm836_vm8 = vcmp.eq.s32.totalorder %v8585_v45, %v5620_v42  ;;  %v8589_v38 = vld [vmem:[#allocation64_spill] sm:$0xff]  ;;  %v8594_v45 = vld [vmem:[#allocation98_spill] sm:$0xff] }
 0x2ad   :  { %1927 = vadd.xlane.f32.xlu2 %v1688_v13  ;;  %vm894_vm14 = vmand %vm830_vm12, %vm599_vm3  ;;  %vm844_vm13 = vcmp.eq.s32.totalorder %v8589_v38, %v5620_v42 }
 0x2ae   :  { %v2112_v5 = vadd.f32 %v2037_v53, %v2036_v46  ;;  %v8582_v46 = vld [vmem:[#allocation56_spill] sm:$0xff]  ;;  %v5978_v6 = vsel %vm894_vm14, 1.0, %v8527_v14  ;;  %vm900_vm4 = vmand %vm836_vm8, %vm599_vm3 }
 0x2af   :  { %v2049_v0 = vmul.f32 0.0, %v8582_v46  ;;  %v2046_v30 = vmul.f32 %v5978_v6, %v8502_v58  ;;  %v5998_v58 = vsel %vm902_vm7, 1.0, %v8527_v14  ;;  %v6014_v4 = vsel %vm900_vm4, 1.0, %v8527_v14 }
 0x2b0   :  { %v2052_v63 = vmul.f32 %v6014_v4, %v8510_v24 }
 0x2b1   :  { %2101 = vadd.xlane.f32.xlu0 %v2100_v27  ;;  %v8579_v27 = vld [vmem:[#allocation54_spill] sm:$0xff] }
 0x2b2   :  { %vm832_vm5 = vcmp.eq.s32.totalorder %v8579_v27, %v5620_v42 }
 0x2b3   :  { %vm896_vm10 = vmand %vm832_vm5, %vm599_vm3 }
 0x2b4   :  { %2107 = vadd.xlane.f32.xlu1 %v2106_v62  ;;  %v2121_v62 = vadd.f32 %v2043_v40, %v2042_v7  ;;  %v8586_v7 = vld [vmem:[#allocation52_spill] sm:$0xff]  ;;  %vm908_vm5 = vmand %vm844_vm13, %vm599_vm3 }
 0x2b5   :  { %2104 = vadd.xlane.f32.xlu2 %v2103_v55  ;;  %v5959_v55 = vsel %vm896_vm10, 1.0, %v8527_v14  ;;  %vm834_vm6 = vcmp.eq.s32.totalorder %v8586_v7, %v5620_v42  ;;  %v8587_v40 = vld [vmem:[#allocation44_spill] sm:$0xff]  ;;  %vm840_vm10 = vcmp.eq.s32.totalorder %v8592_v21, %v5620_v42  ;;  %v2061_v7 = vmul.f32 0.0, %v8594_v45  ;;  %v8602_v45 = vld [vmem:[#allocation71_spill] sm:$0xff] }
 0x2b6   :  { %v2048_v57 = vmul.f32 %v5959_v55, %v8507_v10  ;;  %v5981_v10 = vsel %vm892_vm0, 1.0, %v8527_v14  ;;  %v2045_v59 = vmul.f32 0.0, %v8587_v40  ;;  %vm898_vm9 = vmand %vm834_vm6, %vm599_vm3  ;;  %vm856_vm6 = vcmp.eq.s32.totalorder %v8602_v45, %v5620_v42 }
 0x2b7   :  { %v2044_v27 = vmul.f32 %v5981_v10, %v4953_v12  ;;  %vm904_vm14 = vmand %vm840_vm10, %vm599_vm3 }
 0x2b8   :  { %v5913_v13 = vpop.xlane.xlu0 %1888  ;;  %v2130_v2 = vadd.f32 %v2049_v0, %v2048_v57  ;;  %v8590_v57 = vld [vmem:[#allocation79_spill] sm:$0xff]  ;;  %vm920_vm13 = vmand %vm856_vm6, %vm599_vm3 }
 0x2b9   :  { %2110 = vadd.xlane.f32.xlu0 %v2109_v9  ;;  %v2118_v9 = vadd.f32 %v2041_v23, %v2040_v41  ;;  %v8588_v41 = vld [vmem:[#allocation89_spill] sm:$0xff]  ;;  %v2124_v47 = vadd.f32 %v2045_v59, %v2044_v27  ;;  %v2053_v46 = vmul.f32 0.0, %v8590_v57  ;;  %v8595_v27 = vld [vmem:[#allocation68_spill] sm:$0xff] }
 0x2ba   :  { %v2055_v23 = vmul.f32 0.0, %v8588_v41  ;;  %vm850_vm11 = vcmp.eq.s32.totalorder %v8595_v27, %v5620_v42 }
 0x2bb   :  { %v2136_v59 = vadd.f32 %v2053_v46, %v2052_v63  ;;  %vm914_vm0 = vmand %vm850_vm11, %vm599_vm3  ;;  %v8597_v63 = vld [vmem:[#allocation63_spill] sm:$0xff] }
 0x2bc   :  { %1975 = vadd.xlane.f32.xlu1 %v1720_v22  ;;  %v8584_v22 = vld [vmem:[#allocation50_spill] sm:$0xff]  ;;  %vm848_vm2 = vcmp.eq.s32.totalorder %v8597_v63, %v5620_v42  ;;  %v6063_v57 = vsel %vm914_vm0, 1.0, %v8527_v14  ;;  %v6099_v63 = vsel %vm920_vm13, 1.0, %v8527_v14  ;;  %vm2559_vm0 = vcmask 31768  }
 0x2bd   :  { %2113 = vadd.xlane.f32.xlu2 %v2112_v5  ;;  %v2047_v5 = vmul.f32 0.0, %v8584_v22  ;;  %vm912_vm7 = vmand %vm848_vm2, %vm599_vm3  ;;  %v2066_v21 = vmul.f32 %v6063_v57, %v8557_v52 }
 0x2c0   :  { %v5933_v1 = vpop.xlane.xlu2 %1891  ;;  %v5942_v50 = vpop.xlane.xlu0 %1933 }
 0x2c1   :  { %1978 = vadd.xlane.f32.xlu0 %v1722_v33  ;;  %v2054_v33 = vmul.f32 %v5998_v58, %v8523_v44  ;;  %v6019_v44 = vsel %vm898_vm9, 1.0, %v8527_v14 }
 0x2c3   :  { %v2139_v0 = vadd.f32 %v2055_v23, %v2054_v33 }
 0x2c4   :  { %1930 = vadd.xlane.f32.xlu1 %v1690_v31  ;;  %v2127_v31 = vadd.f32 %v2047_v5, %v2046_v30  ;;  %v8593_v30 = vld [vmem:[#allocation81_spill] sm:$0xff]  ;;  %v2050_v5 = vmul.f32 %v6019_v44, %v8506_v61 }
 0x2c5   :  { %2122 = vadd.xlane.f32.xlu2 %v2121_v62  ;;  %v2051_v22 = vmul.f32 0.0, %v8593_v30  ;;  %v8600_v30 = vld [vmem:[#allocation110_spill] sm:$0xff] }
 0x2c7   :  { %v5969_v53 = vpop.xlane.xlu1 %1885  ;;  %v2133_v41 = vadd.f32 %v2051_v22, %v2050_v5  ;;  %v2067_v22 = vmul.f32 0.0, %v8600_v30 }
 0x2c8   :  { %v5975_v34 = vpop.xlane.xlu2 %1936  ;;  %v5990_v37 = vpop.xlane.xlu0 %1897 }
 0x2c9   :  { %2119 = vadd.xlane.f32.xlu0 %v2118_v9  ;;  %v8591_v9 = vld [vmem:[#allocation58_spill] sm:$0xff] }
 0x2ca   :  { %vm842_vm15 = vcmp.eq.s32.totalorder %v8591_v9, %v5620_v42 }
 0x2cb   :  { %vm906_vm12 = vmand %vm842_vm15, %vm599_vm3 }
 0x2cc   :  { %2116 = vadd.xlane.f32.xlu1 %v2115_v56  ;;  %v6029_v56 = vsel %vm908_vm5, 1.0, %v8527_v14  ;;  %v6050_v33 = vsel %vm906_vm12, 1.0, %v8527_v14 }
 0x2cd   :  { %2131 = vadd.xlane.f32.xlu2 %v2130_v2  ;;  %v2060_v2 = vmul.f32 %v6029_v56, %v8539_v26  ;;  %v6055_v26 = vsel %vm904_vm14, 1.0, %v8527_v14  ;;  %v2058_v23 = vmul.f32 %v6050_v33, %v5230_v48  ;;  %v8599_v48 = vld [vmem:[#allocation61_spill] sm:$0xff]  ;;  %vm2526_vm14 = vcmask 23568  }
 0x2ce   :  { %v2056_v46 = vmul.f32 %v6055_v26, %v5240_v54  ;;  %vm846_vm8 = vcmp.eq.s32.totalorder %v8599_v48, %v5620_v42  ;;  %v2072_v48 = vmul.f32 %v6099_v63, %v5207_v51 }
 0x2cf   :  { %v6005_v62 = vpop.xlane.xlu1 %1939  ;;  %vm910_vm4 = vmand %vm846_vm8, %vm599_vm3 }
 0x2d0   :  { %v6011_v12 = vpop.xlane.xlu2 %1945  ;;  %v6034_v24 = vpop.xlane.xlu0 %1942 }
 0x2d1   :  { %2128 = vadd.xlane.f32.xlu0 %v2127_v31  ;;  %v8596_v31 = vld [vmem:[#allocation119_spill] sm:$0xff] }
 0x2d2   :  { %v2059_v38 = vmul.f32 0.0, %v8596_v31  ;;  %v2157_v31 = vadd.f32 %v2067_v22, %v2066_v21  ;;  %v8608_v21 = vld [vmem:[#allocation116_spill] sm:$0xff] }
 0x2d3   :  { %v2073_v30 = vmul.f32 0.0, %v8608_v21 }
 0x2d4   :  { %2125 = vadd.xlane.f32.xlu1 %v2124_v47  ;;  %v2148_v47 = vadd.f32 %v2061_v7, %v2060_v2  ;;  %v2145_v2 = vadd.f32 %v2059_v38, %v2058_v23  ;;  %v8605_v38 = vld [vmem:[#allocation66_spill] sm:$0xff] }
 0x2d5   :  { %2140 = vadd.xlane.f32.xlu2 %v2139_v0  ;;  %v8598_v0 = vld [vmem:[#allocation120_spill] sm:$0xff]  ;;  %vm854_vm9 = vcmp.eq.s32.totalorder %v8605_v38, %v5620_v42 }
 0x2d6   :  { %v2057_v9 = vmul.f32 0.0, %v8598_v0  ;;  %v8606_v0 = vld [vmem:[#allocation136_spill] sm:$0xff]  ;;  %vm918_vm5 = vmand %vm854_vm9, %vm599_vm3 }
 0x2d7   :  { %v6041_v40 = vpop.xlane.xlu1 %1894 }
 0x2d8   :  { %v6047_v61 = vpop.xlane.xlu2 %1900  ;;  %v6079_v54 = vpop.xlane.xlu0 %1951  ;;  %v2142_v52 = vadd.f32 %v2057_v9, %v2056_v46  ;;  %v2063_v9 = vmul.f32 0.0, %v8606_v0  ;;  %v2166_v0 = vadd.f32 %v2073_v30, %v2072_v48 }
 0x2d9   :  { %2137 = vadd.xlane.f32.xlu0 %v2136_v59  ;;  %v6084_v59 = vsel %vm912_vm7, 1.0, %v8527_v14 }
 0x2da   :  { %v2064_v27 = vmul.f32 %v6084_v59, %v5316_v3  ;;  %v8607_v3 = vld [vmem:[#allocation65_spill] sm:$0xff] }
 0x2db   :  { %vm852_vm15 = vcmp.eq.s32.totalorder %v8607_v3, %v5620_v42  ;;  %v8610_v3 = vld [vmem:[#allocation140_spill] sm:$0xff] }
 0x2dc   :  { %2134 = vadd.xlane.f32.xlu1 %v2133_v41  ;;  %v8604_v41 = vld [vmem:[#allocation133_spill] sm:$0xff]  ;;  %vm916_vm10 = vmand %vm852_vm15, %vm599_vm3  ;;  %v2069_v21 = vmul.f32 0.0, %v8610_v3 }
 0x2dd   :  { %2149 = vadd.xlane.f32.xlu2 %v2148_v47  ;;  %v2065_v23 = vmul.f32 0.0, %v8604_v41  ;;  %v6096_v47 = vsel %vm910_vm4, 1.0, %v8527_v14 }
 0x2de   :  { %v2062_v46 = vmul.f32 %v6096_v47, %v5333_v18  ;;  %v6116_v18 = vsel %vm918_vm5, 1.0, %v8527_v14 }
 0x2df   :  { %v6075_v5 = vpop.xlane.xlu1 %2080  ;;  %v2070_v51 = vmul.f32 %v6116_v18, %v5354_v19 }
 0x2e0   :  { %8601 = vst [vmem:[#allocation88_spill] sm:$0xff] %v6075_v5  ;;  %v6081_v7 = vpop.xlane.xlu2 %2077  ;;  %v2151_v41 = vadd.f32 %v2063_v9, %v2062_v46 }
 0x2e1   :  { %8603 = vst [vmem:[#allocation24_spill] sm:$0xff] %v6081_v7  ;;  %2146 = vadd.xlane.f32.xlu0 %v2145_v2  ;;  %v2154_v2 = vadd.f32 %v2065_v23, %v2064_v27  ;;  %v6126_v27 = vsel %vm916_vm10, 1.0, %v8527_v14 }
 0x2e2   :  { %v2068_v23 = vmul.f32 %v6126_v27, %v5381_v15 }
 0x2e4   :  { %2143 = vadd.xlane.f32.xlu1 %v2142_v52  ;;  %v6120_v52 = vpop.xlane.xlu0 %1906  ;;  %v2160_v48 = vadd.f32 %v2069_v21, %v2068_v23  ;;  %v8615_v23 = vld [vmem:[#allocation32_spill] sm:$0xff] }
 0x2e5   :  { %2158 = vadd.xlane.f32.xlu2 %v2157_v31  ;;  %v8609_v31 = vld [vmem:[#allocation138_spill] sm:$0xff] }
 0x2e6   :  { %v2071_v38 = vmul.f32 0.0, %v8609_v31 }
 0x2e7   :  { %v6111_v22 = vpop.xlane.xlu1 %1948 }
 0x2e8   :  { %v6113_v45 = vpop.xlane.xlu2 %1954  ;;  %v2163_v9 = vadd.f32 %v2071_v38, %v2070_v51 }
 0x2e9   :  { %2155 = vadd.xlane.f32.xlu0 %v2154_v2  ;;  %v8611_v2 = vld [vmem:[#allocation69_spill] sm:$0xff] }
 0x2ea   :  { %vm858_vm12 = vcmp.eq.s32.totalorder %v8611_v2, %v5620_v42  ;;  %v8617_v2 = vld [vmem:[#allocation27_spill] sm:$0xff] }
 0x2eb   :  { %vm922_vm11 = vmand %vm858_vm12, %vm599_vm3  ;;  %vm2493_vm3 = vcmask 15368  }
 0x2ec   :  { %2152 = vadd.xlane.f32.xlu1 %v2151_v41  ;;  %v6139_v30 = vpop.xlane.xlu0 %2083  ;;  %v6142_v15 = vsel %vm922_vm11, 1.0, %v8527_v14  ;;  %v2075_v41 = vmul.f32 0.0, %v5412_v43 }
 0x2ed   :  { %2167 = vadd.xlane.f32.xlu2 %v2166_v0  ;;  %v2074_v42 = vmul.f32 %v6142_v15, %v5410_v32  ;;  %v8616_v32 = vld [vmem:[#allocation84_spill] sm:$0xff] }
 0x2ef   :  { %v6133_v46 = vpop.xlane.xlu1 %1903  ;;  %v2169_v38 = vadd.f32 %v2075_v41, %v2074_v42 }
 0x2f0   :  { %v6135_v19 = vpop.xlane.xlu2 %1909 }
 0x2f1   :  { %2164 = vadd.xlane.f32.xlu0 %v2163_v9 }
 0x2f4   :  { %2161 = vadd.xlane.f32.xlu1 %v2160_v48 }
 0x2f5   :  { %2208 = vadd.xlane.f32.xlu2 %v5660_v25 }
 0x2f7   :  { %v6148_v51 = vpop.xlane.xlu1 %2089 }
 0x2f8   :  { %8612 = vst [vmem:[#allocation45_spill] sm:$0xff] %v6148_v51  ;;  %v6150_v31 = vpop.xlane.xlu2 %2086  ;;  %v8647_v51 = vld [vmem:[#allocation134_spill] sm:$0xff] }
 0x2f9   :  { %8613 = vst [vmem:[#allocation41_spill] sm:$0xff] %v6150_v31  ;;  %2205 = vadd.xlane.f32.xlu0 %v8614_v8  ;;  %v8655_v31 = vld [vmem:[#allocation70_spill] sm:$0xff] }
 0x2fc   :  { %2170 = vadd.xlane.f32.xlu1 %v2169_v38  ;;  %v6153_v0 = vpop.xlane.xlu0 %1960  ;;  %v8634_v38 = vld [vmem:[#allocation115_spill] sm:$0xff] }
 0x2fd   :  { %2217 = vadd.xlane.f32.xlu2 %v5730_v60 }
 0x2ff   :  { %v6156_v14 = vpop.xlane.xlu1 %1957 }
 0x300   :  { %v6158_v25 = vpop.xlane.xlu2 %1963 }
 0x301   :  { %2214 = vadd.xlane.f32.xlu0 %v8615_v23  ;;  %v8635_v23 = vld [vmem:[#allocation10_spill] sm:$0xff] }
 0x304   :  { %2211 = vadd.xlane.f32.xlu1 %v8616_v32  ;;  %v6162_v43 = vpop.xlane.xlu0 %1915 }
 0x305   :  { %2226 = vadd.xlane.f32.xlu2 %v5795_v39 }
 0x307   :  { %v6165_v3 = vpop.xlane.xlu1 %1912 }
 0x308   :  { %v6167_v21 = vpop.xlane.xlu2 %1918 }
 0x309   :  { %2223 = vadd.xlane.f32.xlu0 %v5803_v16 }
 0x30c   :  { %2220 = vadd.xlane.f32.xlu1 %v8617_v2  ;;  %v6171_v60 = vpop.xlane.xlu0 %2092 }
 0x30d   :  { %8618 = vst [vmem:[#allocation93_spill] sm:$0xff] %v6171_v60  ;;  %2235 = vadd.xlane.f32.xlu2 %v5872_v17  ;;  %v8668_v60 = vld [vmem:[#allocation76_spill] sm:$0xff] }
 0x30f   :  { %v6174_v9 = vpop.xlane.xlu1 %2098 }
 0x310   :  { %8619 = vst [vmem:[#allocation51_spill] sm:$0xff] %v6174_v9  ;;  %v6176_v48 = vpop.xlane.xlu2 %2095 }
 0x311   :  { %8620 = vst [vmem:[#allocation25_spill] sm:$0xff] %v6176_v48  ;;  %2232 = vadd.xlane.f32.xlu0 %v5875_v35 }
 0x314   :  { %2229 = vadd.xlane.f32.xlu1 %v5855_v49  ;;  %v6180_v39 = vpop.xlane.xlu0 %1969 }
 0x315   :  { %2244 = vadd.xlane.f32.xlu2 %v5954_v29 }
 0x317   :  { %v6183_v42 = vpop.xlane.xlu1 %1966 }
 0x318   :  { %v6185_v16 = vpop.xlane.xlu2 %1972 }
 0x319   :  { %2241 = vadd.xlane.f32.xlu0 %v5900_v36 }
 0x31c   :  { %2238 = vadd.xlane.f32.xlu1 %v5890_v20  ;;  %v6189_v17 = vpop.xlane.xlu0 %1924 }
 0x31d   :  { %2253 = vadd.xlane.f32.xlu2 %v5981_v10 }
 0x31f   :  { %v6192_v41 = vpop.xlane.xlu1 %1921 }
 0x320   :  { %v6194_v35 = vpop.xlane.xlu2 %1927 }
 0x321   :  { %2250 = vadd.xlane.f32.xlu0 %v5922_v11 }
 0x324   :  { %2247 = vadd.xlane.f32.xlu1 %v5938_v28  ;;  %v6198_v49 = vpop.xlane.xlu0 %2101 }
 0x325   :  { %8621 = vst [vmem:[#allocation30_spill] sm:$0xff] %v6198_v49  ;;  %2262 = vadd.xlane.f32.xlu2 %v6019_v44 }
 0x327   :  { %v6201_v29 = vpop.xlane.xlu1 %2107 }
 0x328   :  { %8622 = vst [vmem:[#allocation97_spill] sm:$0xff] %v6201_v29  ;;  %v6203_v36 = vpop.xlane.xlu2 %2104  ;;  %v8642_v29 = vld [vmem:[#allocation13_spill] sm:$0xff] }
 0x329   :  { %8623 = vst [vmem:[#allocation87_spill] sm:$0xff] %v6203_v36  ;;  %2259 = vadd.xlane.f32.xlu0 %v5959_v55 }
 0x32c   :  { %2256 = vadd.xlane.f32.xlu1 %v5978_v6  ;;  %v6207_v20 = vpop.xlane.xlu0 %2110 }
 0x32d   :  { %8624 = vst [vmem:[#allocation75_spill] sm:$0xff] %v6207_v20  ;;  %2271 = vadd.xlane.f32.xlu2 %v6055_v26  ;;  %v8650_v20 = vld [vmem:[#allocation151_spill] sm:$0xff] }
 0x32f   :  { %v6210_v10 = vpop.xlane.xlu1 %1975 }
 0x330   :  { %v6212_v11 = vpop.xlane.xlu2 %2113 }
 0x331   :  { %8625 = vst [vmem:[#allocation103_spill] sm:$0xff] %v6212_v11  ;;  %2268 = vadd.xlane.f32.xlu0 %v5998_v58 }
 0x334   :  { %2265 = vadd.xlane.f32.xlu1 %v6014_v4  ;;  %v6216_v28 = vpop.xlane.xlu0 %1978 }
 0x335   :  { %2280 = vadd.xlane.f32.xlu2 %v6096_v47  ;;  %v8631_v47 = vld [vmem:[#allocation114_spill] sm:$0xff] }
 0x337   :  { %v6219_v44 = vpop.xlane.xlu1 %1930 }
 0x338   :  { %v6221_v55 = vpop.xlane.xlu2 %2122 }
 0x339   :  { %8626 = vst [vmem:[#allocation31_spill] sm:$0xff] %v6221_v55  ;;  %2277 = vadd.xlane.f32.xlu0 %v6029_v56  ;;  %v8632_v56 = vld [vmem:[#allocation9_spill] sm:$0xff] }
 0x33a   :  { %v1213_v8 = vsub.f32 %v8632_v56, %v8631_v47  ;;  %v8667_v56 = vld [vmem:[#allocation77_spill] sm:$0xff] }
 0x33c   :  { %2274 = vadd.xlane.f32.xlu1 %v6050_v33  ;;  %v6225_v6 = vpop.xlane.xlu0 %2119  ;;  %v1246_v2 = vmul.f32 1.442695, %v1213_v8 }
 0x33d   :  { %8627 = vst [vmem:[#allocation34_spill] sm:$0xff] %v6225_v6  ;;  %2289 = vadd.xlane.f32.xlu2 %v6126_v27  ;;  %v1214_v27 = vsub.f32 %v8635_v23, %v8634_v38 }
 0x33e   :  { %4238 = vpow2.f32 %v1246_v2  ;;  %v8648_v2 = vld [vmem:[#allocation18_spill] sm:$0xff] }
 0x33f   :  { %v6228_v26 = vpop.xlane.xlu1 %2116  ;;  %v1218_v48 = vsub.f32 %v8648_v2, %v8647_v51 }
 0x340   :  { %8628 = vst [vmem:[#allocation36_spill] sm:$0xff] %v6228_v26  ;;  %v6230_v58 = vpop.xlane.xlu2 %2131 }
 0x341   :  { %8629 = vst [vmem:[#allocation85_spill] sm:$0xff] %v6230_v58  ;;  %2286 = vadd.xlane.f32.xlu0 %v6063_v57  ;;  %v1248_v57 = vmul.f32 1.442695, %v1214_v27  ;;  %v8638_v58 = vld [vmem:[#allocation126_spill] sm:$0xff]  ;;  %v1256_v49 = vmul.f32 1.442695, %v1218_v48 }
 0x343   :  { %4240 = vpow2.f32 %v1248_v57  ;;  %v8651_v57 = vld [vmem:[#allocation16_spill] sm:$0xff] }
 0x344   :  { %2283 = vadd.xlane.f32.xlu1 %v6084_v59  ;;  %v6234_v4 = vpop.xlane.xlu0 %2128  ;;  %v1220_v7 = vsub.f32 %v8651_v57, %v8650_v20 }
 0x345   :  { %8630 = vst [vmem:[#allocation109_spill] sm:$0xff] %v6234_v4  ;;  %2298 = vadd.xlane.f32.xlu2 %v6142_v15  ;;  %v8639_v15 = vld [vmem:[#allocation15_spill] sm:$0xff] }
 0x346   :  { %v1215_v26 = vsub.f32 %v8639_v15, %v8638_v58  ;;  %v8656_v15 = vld [vmem:[#allocation72_spill] sm:$0xff] }
 0x347   :  { %v6239_v33 = vpop.xlane.xlu1 %2125 }
 0x348   :  { %8633 = vst [vmem:[#allocation94_spill] sm:$0xff] %v6239_v33  ;;  %v6243_v32 = vpop.xlane.xlu2 %2140  ;;  %v8641_v33 = vld [vmem:[#allocation130_spill] sm:$0xff]  ;;  %v1250_v27 = vmul.f32 1.442695, %v1215_v26  ;;  %v8654_v26 = vld [vmem:[#allocation11_spill] sm:$0xff] }
 0x349   :  { %8636 = vst [vmem:[#allocation35_spill] sm:$0xff] %v6243_v32  ;;  %2295 = vadd.xlane.f32.xlu0 %v6099_v63  ;;  %v1217_v11 = vsub.f32 %v8642_v29, %v8641_v33  ;;  %v8644_v32 = vld [vmem:[#allocation107_spill] sm:$0xff]  ;;  %v8645_v63 = vld [vmem:[#allocation12_spill] sm:$0xff]  ;;  %v8680_v33 = vld [vmem:[#allocation73_spill] sm:$0xff] }
 0x34a   :  { %v1212_v8 = vsub.f32 %v8645_v63, %v8644_v32  ;;  %4242 = vpow2.f32 %v1250_v27  ;;  %v8653_v63 = vld [vmem:[#allocation131_spill] sm:$0xff] }
 0x34b   :  { %v1254_v9 = vmul.f32 1.442695, %v1217_v11  ;;  %v1216_v11 = vsub.f32 %v8654_v26, %v8653_v63  ;;  %v8666_v26 = vld [vmem:[#allocation83_spill] sm:$0xff] }
 0x34c   :  { %2292 = vadd.xlane.f32.xlu1 %v6116_v18  ;;  %v6247_v59 = vpop.xlane.xlu0 %2137  ;;  %v1244_v36 = vmul.f32 1.442695, %v1212_v8 }
 0x34d   :  { %8637 = vst [vmem:[#allocation37_spill] sm:$0xff] %v6247_v59  ;;  %v4239_v59 = vpop.eup %4238  ;;  %4244 = vpow2.f32 %v1254_v9 }
 0x34e   :  { %v4241_v6 = vpop.eup %4240  ;;  %4246 = vpow2.f32 %v1244_v36  ;;  %v8658_v36 = vld [vmem:[#allocation139_spill] sm:$0xff] }
 0x34f   :  { %v6251_v55 = vpop.xlane.xlu1 %2134  ;;  %v1854_v8 = vmul.f32 %v4241_v6, %v8656_v15  ;;  %4248 = vpow2.f32 %v1256_v49 }
 0x350   :  { %8640 = vst [vmem:[#allocation39_spill] sm:$0xff] %v6251_v55  ;;  %v6255_v4 = vpop.xlane.xlu2 %2149  ;;  %v4243_v9 = vpop.eup %4242 }
 0x351   :  { %8643 = vst [vmem:[#allocation38_spill] sm:$0xff] %v6255_v4  ;;  %v6277_v27 = vadd.f32 %v5933_v1, %v1854_v8  ;;  %v8665_v8 = vld [vmem:[#allocation14_spill] sm:$0xff]  ;;  %v1855_v5 = vmul.f32 %v4243_v9, %v8666_v26  ;;  %v8676_v9 = vld [vmem:[#allocation160_spill] sm:$0xff] }
 0x353   :  { %v6299_v49 = vadd.f32 %v6041_v40, %v1855_v5  ;;  %v8671_v5 = vld [vmem:[#allocation26_spill] sm:$0xff] }
 0x354   :  { %v6259_v18 = vpop.xlane.xlu0 %2146 }
 0x355   :  { %8646 = vst [vmem:[#allocation104_spill] sm:$0xff] %v6259_v18  ;;  %v1853_v18 = vmul.f32 %v4239_v59, %v8655_v31  ;;  %v4245_v31 = vpop.eup %4244  ;;  %v8662_v59 = vld [vmem:[#allocation19_spill] sm:$0xff] }
 0x356   :  { %v4247_v48 = vpop.eup %4246  ;;  %v1857_v20 = vmul.f32 %v4245_v31, %v8667_v56  ;;  %v8674_v56 = vld [vmem:[#allocation22_spill] sm:$0xff]  ;;  %v8677_v31 = vld [vmem:[#allocation17_spill] sm:$0xff] }
 0x357   :  { %v6263_v55 = vpop.xlane.xlu1 %2143  ;;  %v6274_v2 = vadd.f32 %v5913_v13, %v1853_v18  ;;  %v8659_v13 = vld [vmem:[#allocation21_spill] sm:$0xff]  ;;  %v1852_v29 = vmul.f32 %v4247_v48, %v8668_v60  ;;  %v1222_v48 = vsub.f32 %v8677_v31, %v8676_v9 }
 0x358   :  { %8649 = vst [vmem:[#allocation43_spill] sm:$0xff] %v6263_v55  ;;  %v6267_v4 = vpop.xlane.xlu2 %2158  ;;  %v1260_v55 = vmul.f32 1.442695, %v1220_v7  ;;  %v1221_v6 = vsub.f32 %v8659_v13, %v8658_v36  ;;  %v8661_v7 = vld [vmem:[#allocation159_spill] sm:$0xff] }
 0x359   :  { %8652 = vst [vmem:[#allocation113_spill] sm:$0xff] %v6267_v4  ;;  %v1252_v4 = vmul.f32 1.442695, %v1216_v11  ;;  %v1223_v15 = vsub.f32 %v8662_v59, %v8661_v7  ;;  %v8664_v11 = vld [vmem:[#allocation152_spill] sm:$0xff]  ;;  %v1264_v31 = vmul.f32 1.442695, %v1222_v48 }
 0x35a   :  { %4250 = vpow2.f32 %v1260_v55  ;;  %v1262_v13 = vmul.f32 1.442695, %v1221_v6  ;;  %v8678_v6 = vld [vmem:[#allocation91_spill] sm:$0xff] }
 0x35b   :  { %4252 = vpow2.f32 %v1252_v4  ;;  %v1266_v55 = vmul.f32 1.442695, %v1223_v15  ;;  %v4249_v4 = vpop.eup %4248 }
 0x35c   :  { %v6279_v57 = vpop.xlane.xlu0 %2155  ;;  %4254 = vpow2.f32 %v1262_v13  ;;  %v1858_v15 = vmul.f32 %v4249_v4, %v8678_v6  ;;  %v8686_v4 = vld [vmem:[#allocation29_spill] sm:$0xff]  ;;  %v8690_v6 = vld [vmem:[#allocation96_spill] sm:$0xff] }
 0x35d   :  { %8657 = vst [vmem:[#allocation48_spill] sm:$0xff] %v6279_v57  ;;  %2401 = vrot.lane.b32.xlu2 %v6277_v27, %s4489_s3  ;;  %2399 = vrot.lane.b32.xlu0 %v6274_v2, %s4489_s3  ;;  %v1219_v57 = vsub.f32 %v8665_v8, %v8664_v11  ;;  %4256 = vpow2.f32 %v1266_v55 }
 0x35e   :  { %v6329_v13 = vadd.f32 %v6133_v46, %v1858_v15 }
 0x35f   :  { %v6287_v1 = vpop.xlane.xlu1 %2152  ;;  %v1258_v8 = vmul.f32 1.442695, %v1219_v57 }
 0x360   :  { %8660 = vst [vmem:[#allocation42_spill] sm:$0xff] %v6287_v1  ;;  %v6291_v18 = vpop.xlane.xlu2 %2167  ;;  %v6302_v1 = vadd.f32 %v6047_v61, %v1857_v20  ;;  %v4251_v60 = vpop.eup %4250  ;;  %v8670_v61 = vld [vmem:[#allocation143_spill] sm:$0xff] }
 0x361   :  { %8663 = vst [vmem:[#allocation40_spill] sm:$0xff] %v6291_v18  ;;  %v6305_v18 = vadd.f32 %v5969_v53, %v1852_v29  ;;  %v4253_v40 = vpop.eup %4252  ;;  %v1224_v20 = vsub.f32 %v8671_v5, %v8670_v61  ;;  %v8673_v29 = vld [vmem:[#allocation163_spill] sm:$0xff]  ;;  %4258 = vpow2.f32 %v1258_v8  ;;  %v8692_v61 = vld [vmem:[#allocation82_spill] sm:$0xff] }
 0x362   :  { %v1226_v57 = vsub.f32 %v8674_v56, %v8673_v29  ;;  %v1856_v36 = vmul.f32 %v4253_v40, %v8680_v33  ;;  %v4255_v8 = vpop.eup %4254 }
 0x363   :  { %v1268_v5 = vmul.f32 1.442695, %v1224_v20  ;;  %v4257_v33 = vpop.eup %4256  ;;  %v8688_v20 = vld [vmem:[#allocation164_spill] sm:$0xff]  ;;  %v1861_v15 = vmul.f32 %v4255_v8, %v8690_v6  ;;  %v8697_v8 = vld [vmem:[#allocation33_spill] sm:$0xff]  ;;  %v8701_v6 = vld [vmem:[#allocation102_spill] sm:$0xff] }
 0x364   :  { %v6307_v59 = vpop.xlane.xlu0 %2164  ;;  %v1272_v55 = vmul.f32 1.442695, %v1226_v57  ;;  %v6335_v56 = vadd.f32 %v5990_v37, %v1856_v36  ;;  %v8685_v36 = vld [vmem:[#allocation148_spill] sm:$0xff] }
 0x365   :  { %8669 = vst [vmem:[#allocation54_spill] sm:$0xff] %v6307_v59  ;;  %2407 = vrot.lane.b32.xlu2 %v6302_v1, %s4489_s3  ;;  %2403 = vrot.lane.b32.xlu0 %v6299_v49, %s4489_s3  ;;  %v8679_v59 = vld [vmem:[#allocation86_spill] sm:$0xff]  ;;  %4260 = vpow2.f32 %v1268_v5  ;;  %v8689_v57 = vld [vmem:[#allocation20_spill] sm:$0xff]  ;;  %v6359_v5 = vadd.f32 %v6165_v3, %v1861_v15 }
 0x366   :  { %2397 = vrot.lane.b32.xlu1 %v6305_v18, %s4489_s3  ;;  %v1860_v7 = vmul.f32 %v4251_v60, %v8679_v59  ;;  %v1227_v60 = vsub.f32 %v8686_v4, %v8685_v36  ;;  %4262 = vpow2.f32 %v1272_v55  ;;  %v1225_v48 = vsub.f32 %v8689_v57, %v8688_v20  ;;  %v8703_v36 = vld [vmem:[#allocation90_spill] sm:$0xff] }
 0x367   :  { %v6317_v53 = vpop.xlane.xlu1 %2161  ;;  %v4259_v46 = vpop.eup %4258  ;;  %4264 = vpow2.f32 %v1264_v31 }
 0x368   :  { %8672 = vst [vmem:[#allocation47_spill] sm:$0xff] %v6317_v53  ;;  %v6321_v26 = vpop.xlane.xlu2 %2208  ;;  %v6332_v53 = vadd.f32 %v6135_v19, %v1860_v7  ;;  %v8682_v19 = vld [vmem:[#allocation117_spill] sm:$0xff]  ;;  %v8683_v7 = vld [vmem:[#allocation28_spill] sm:$0xff]  ;;  %v1859_v9 = vmul.f32 %v4259_v46, %v8692_v61  ;;  %v1274_v55 = vmul.f32 1.442695, %v1227_v60  ;;  %v8700_v60 = vld [vmem:[#allocation23_spill] sm:$0xff] }
 0x369   :  { %8675 = vst [vmem:[#allocation46_spill] sm:$0xff] %v6321_v26  ;;  %v1229_v59 = vsub.f32 %v8683_v7, %v8682_v19  ;;  %v1270_v57 = vmul.f32 1.442695, %v1225_v48 }
 0x36a   :  { %v6365_v4 = vadd.f32 %v6120_v52, %v1859_v9  ;;  %v8696_v9 = vld [vmem:[#allocation127_spill] sm:$0xff] }
 0x36b   :  { %v1278_v7 = vmul.f32 1.442695, %v1229_v59  ;;  %v4261_v31 = vpop.eup %4260  ;;  %v8699_v59 = vld [vmem:[#allocation112_spill] sm:$0xff] }
 0x36c   :  { %v6337_v29 = vpop.xlane.xlu0 %2205  ;;  %v4263_v61 = vpop.eup %4262  ;;  %v1228_v48 = vsub.f32 %v8700_v60, %v8699_v59  ;;  %v1864_v15 = vmul.f32 %v4261_v31, %v8701_v6  ;;  %v8713_v6 = vld [vmem:[#allocation106_spill] sm:$0xff] }
 0x36d   :  { %8681 = vst [vmem:[#allocation56_spill] sm:$0xff] %v6337_v29  ;;  %2413 = vrot.lane.b32.xlu2 %v6332_v53, %s4489_s3  ;;  %2409 = vrot.lane.b32.xlu0 %v6329_v13, %s4489_s3  ;;  %v8691_v29 = vld [vmem:[#allocation92_spill] sm:$0xff]  ;;  %v4265_v3 = vpop.eup %4264  ;;  %4266 = vpow2.f32 %v1278_v7 }
 0x36e   :  { %2405 = vrot.lane.b32.xlu1 %v6335_v56, %s4489_s3  ;;  %v1863_v26 = vmul.f32 %v4257_v33, %v8691_v29  ;;  %v8695_v29 = vld [vmem:[#allocation62_spill] sm:$0xff]  ;;  %v1232_v33 = vsub.f32 %v8697_v8, %v8696_v9  ;;  %4268 = vpow2.f32 %v1274_v55  ;;  %v1862_v20 = vmul.f32 %v4265_v3, %v8703_v36  ;;  %v8714_v9 = vld [vmem:[#allocation108_spill] sm:$0xff] }
 0x36f   :  { %v6347_v37 = vpop.xlane.xlu1 %2170  ;;  %4270 = vpow2.f32 %v1270_v57  ;;  %v6389_v7 = vadd.f32 %v6192_v41, %v1864_v15  ;;  %v1276_v60 = vmul.f32 1.442695, %v1228_v48 }
 0x370   :  { %8684 = vst [vmem:[#allocation59_spill] sm:$0xff] %v6347_v37  ;;  %v6351_v40 = vpop.xlane.xlu2 %2217  ;;  %v6362_v37 = vadd.f32 %v6167_v21, %v1863_v26  ;;  %v8694_v21 = vld [vmem:[#allocation118_spill] sm:$0xff]  ;;  %v1284_v55 = vmul.f32 1.442695, %v1232_v33  ;;  %v6395_v8 = vadd.f32 %v6162_v43, %v1862_v20  ;;  %v8709_v20 = vld [vmem:[#allocation67_spill] sm:$0xff]  ;;  %v8712_v33 = vld [vmem:[#allocation60_spill] sm:$0xff] }
 0x371   :  { %8687 = vst [vmem:[#allocation50_spill] sm:$0xff] %v6351_v40  ;;  %v1230_v26 = vsub.f32 %v8695_v29, %v8694_v21  ;;  %v8702_v40 = vld [vmem:[#allocation99_spill] sm:$0xff] }
 0x373   :  { %v1280_v29 = vmul.f32 1.442695, %v1230_v26  ;;  %v4267_v57 = vpop.eup %4266  ;;  %v8711_v26 = vld [vmem:[#allocation128_spill] sm:$0xff] }
 0x374   :  { %v6367_v19 = vpop.xlane.xlu0 %2214  ;;  %v4269_v36 = vpop.eup %4268  ;;  %v1231_v48 = vsub.f32 %v8712_v33, %v8711_v26  ;;  %v1869_v15 = vmul.f32 %v4267_v57, %v8713_v6  ;;  %v8721_v57 = vld [vmem:[#allocation124_spill] sm:$0xff]  ;;  %v8725_v6 = vld [vmem:[#allocation105_spill] sm:$0xff] }
 0x375   :  { %8693 = vst [vmem:[#allocation53_spill] sm:$0xff] %v6367_v19  ;;  %2419 = vrot.lane.b32.xlu2 %v6362_v37, %s4489_s3  ;;  %2415 = vrot.lane.b32.xlu0 %v6359_v5, %s4489_s3  ;;  %v1866_v19 = vmul.f32 %v4263_v61, %v8702_v40  ;;  %v4271_v41 = vpop.eup %4270  ;;  %4272 = vpow2.f32 %v1280_v29  ;;  %v8708_v40 = vld [vmem:[#allocation149_spill] sm:$0xff]  ;;  %v8715_v29 = vld [vmem:[#allocation95_spill] sm:$0xff] }
 0x376   :  { %2411 = vrot.lane.b32.xlu1 %v6365_v4, %s4489_s3  ;;  %v1235_v31 = vsub.f32 %v8709_v20, %v8708_v40  ;;  %4274 = vpow2.f32 %v1284_v55  ;;  %v1865_v59 = vmul.f32 %v4271_v41, %v8715_v29  ;;  %v1282_v33 = vmul.f32 1.442695, %v1231_v48  ;;  %v8724_v48 = vld [vmem:[#allocation150_spill] sm:$0xff]  ;;  %v8726_v29 = vld [vmem:[#allocation111_spill] sm:$0xff] }
 0x377   :  { %v6377_v52 = vpop.xlane.xlu1 %2211  ;;  %v6392_v21 = vadd.f32 %v6194_v35, %v1866_v19  ;;  %v8706_v35 = vld [vmem:[#allocation132_spill] sm:$0xff]  ;;  %4276 = vpow2.f32 %v1276_v60 }
 0x378   :  { %v6381_v46 = vpop.xlane.xlu2 %2226  ;;  %v8707_v19 = vld [vmem:[#allocation100_spill] sm:$0xff]  ;;  %v1290_v20 = vmul.f32 1.442695, %v1235_v31 }
 0x379   :  { %8698 = vst [vmem:[#allocation52_spill] sm:$0xff] %v6381_v46  ;;  %v1233_v43 = vsub.f32 %v8707_v19, %v8706_v35  ;;  %v6419_v19 = vadd.f32 %v5975_v34, %v1869_v15  ;;  %v1234_v15 = vsub.f32 %v8725_v6, %v8724_v48  ;;  %v8727_v35 = vld [vmem:[#allocation101_spill] sm:$0xff] }
 0x37a   :  { %8704 = vst [vmem:[#allocation44_spill] sm:$0xff] %v6392_v21 }
 0x37b   :  { %8716 = vst [vmem:[#allocation79_spill] sm:$0xff] %v6419_v19  ;;  %v4273_v60 = vpop.eup %4272  ;;  %v1288_v6 = vmul.f32 1.442695, %v1234_v15  ;;  %v8735_v15 = vld [vmem:[#allocation129_spill] sm:$0xff] }
 0x37c   :  { %v6397_v46 = vpop.xlane.xlu0 %2223 }
 0x37d   :  { %8705 = vst [vmem:[#allocation89_spill] sm:$0xff] %v6397_v46  ;;  %2425 = vrot.lane.b32.xlu2 %v6392_v21, %s4489_s3  ;;  %2421 = vrot.lane.b32.xlu0 %v6389_v7, %s4489_s3  ;;  %v1867_v46 = vmul.f32 %v4269_v36, %v8714_v9  ;;  %v1286_v21 = vmul.f32 1.442695, %v1233_v43  ;;  %v4275_v9 = vpop.eup %4274  ;;  %v8723_v43 = vld [vmem:[#allocation125_spill] sm:$0xff] }
 0x37e   :  { %2417 = vrot.lane.b32.xlu1 %v6395_v8, %s4489_s3  ;;  %v4277_v34 = vpop.eup %4276  ;;  %v1870_v31 = vmul.f32 %v4273_v60, %v8723_v43 }
 0x37f   :  { %v6409_v61 = vpop.xlane.xlu1 %2220  ;;  %v6422_v55 = vadd.f32 %v6219_v44, %v1867_v46  ;;  %4278 = vpow2.f32 %v1286_v21  ;;  %v8718_v44 = vld [vmem:[#allocation137_spill] sm:$0xff]  ;;  %v1868_v26 = vmul.f32 %v4277_v34, %v8727_v35 }
 0x380   :  { %v6411_v3 = vpop.xlane.xlu2 %2235  ;;  %v8719_v46 = vld [vmem:[#allocation121_spill] sm:$0xff]  ;;  %4280 = vpow2.f32 %v1290_v20 }
 0x381   :  { %8710 = vst [vmem:[#allocation64_spill] sm:$0xff] %v6411_v3  ;;  %v6425_v3 = vadd.f32 %v6189_v17, %v1865_v59  ;;  %v1236_v17 = vsub.f32 %v8719_v46, %v8718_v44  ;;  %v8720_v59 = vld [vmem:[#allocation157_spill] sm:$0xff]  ;;  %4282 = vpow2.f32 %v1282_v33  ;;  %v6449_v46 = vadd.f32 %v6005_v62, %v1870_v31  ;;  %v8738_v44 = vld [vmem:[#allocation122_spill] sm:$0xff] }
 0x382   :  { %v1238_v36 = vsub.f32 %v8721_v57, %v8720_v59  ;;  %v6455_v60 = vadd.f32 %v5942_v50, %v1868_v26  ;;  %v8737_v59 = vld [vmem:[#allocation141_spill] sm:$0xff] }
 0x384   :  { %v6427_v40 = vpop.xlane.xlu0 %2232  ;;  %v1296_v57 = vmul.f32 1.442695, %v1238_v36  ;;  %v8734_v36 = vld [vmem:[#allocation123_spill] sm:$0xff] }
 0x385   :  { %8717 = vst [vmem:[#allocation58_spill] sm:$0xff] %v6427_v40  ;;  %2431 = vrot.lane.b32.xlu2 %v6419_v19, %s4489_s3  ;;  %2427 = vrot.lane.b32.xlu0 %v6422_v55, %s4489_s3  ;;  %v1872_v40 = vmul.f32 %v4275_v9, %v8726_v29  ;;  %v1292_v19 = vmul.f32 1.442695, %v1236_v17  ;;  %v4279_v33 = vpop.eup %4278  ;;  %v8732_v9 = vld [vmem:[#allocation146_spill] sm:$0xff] }
 0x386   :  { %2423 = vrot.lane.b32.xlu1 %v6425_v3, %s4489_s3  ;;  %v4281_v35 = vpop.eup %4280  ;;  %v1873_v34 = vmul.f32 %v4279_v33, %v8732_v9  ;;  %v8733_v17 = vld [vmem:[#allocation158_spill] sm:$0xff] }
 0x387   :  { %v6446_v21 = vpop.xlane.xlu1 %2229  ;;  %v6452_v20 = vadd.f32 %v6011_v12, %v1872_v40  ;;  %v4283_v62 = vpop.eup %4282  ;;  %4284 = vpow2.f32 %v1292_v19  ;;  %v8729_v12 = vld [vmem:[#allocation161_spill] sm:$0xff]  ;;  %v8730_v40 = vld [vmem:[#allocation135_spill] sm:$0xff]  ;;  %v1237_v31 = vsub.f32 %v8734_v36, %v8733_v17  ;;  %v1875_v29 = vmul.f32 %v4281_v35, %v8735_v15  ;;  %v8744_v15 = vld [vmem:[#allocation144_spill] sm:$0xff] }
 0x388   :  { %v6439_v41 = vpop.xlane.xlu2 %2244  ;;  %v1241_v50 = vsub.f32 %v8730_v40, %v8729_v12  ;;  %4286 = vpow2.f32 %v1296_v57  ;;  %v1871_v48 = vmul.f32 %v4283_v62, %v8738_v44  ;;  %v6477_v19 = vadd.f32 %v6111_v22, %v1873_v34  ;;  %v8746_v12 = vld [vmem:[#allocation162_spill] sm:$0xff] }
 0x389   :  { %8722 = vst [vmem:[#allocation57_spill] sm:$0xff] %v6439_v41  ;;  %4288 = vpow2.f32 %v1288_v6  ;;  %v8736_v41 = vld [vmem:[#allocation142_spill] sm:$0xff]  ;;  %v6480_v57 = vadd.f32 %v6113_v45, %v1875_v29  ;;  %v1294_v36 = vmul.f32 1.442695, %v1237_v31  ;;  %v8743_v31 = vld [vmem:[#allocation145_spill] sm:$0xff] }
 0x38a   :  { %v1302_v40 = vmul.f32 1.442695, %v1241_v50  ;;  %v6483_v33 = vadd.f32 %v6034_v24, %v1871_v48  ;;  %v8741_v48 = vld [vmem:[#allocation155_spill] sm:$0xff]  ;;  %v8742_v50 = vld [vmem:[#allocation166_spill] sm:$0xff]  ;;  %v1242_v29 = vsub.f32 %v8744_v15, %v8743_v31 }
 0x38c   :  { %v6457_v43 = vpop.xlane.xlu0 %2241  ;;  %4290 = vpow2.f32 %v1302_v40 }
 0x38d   :  { %8728 = vst [vmem:[#allocation81_spill] sm:$0xff] %v6457_v43  ;;  %2437 = vrot.lane.b32.xlu2 %v6452_v20, %s4489_s3  ;;  %2433 = vrot.lane.b32.xlu0 %v6449_v46, %s4489_s3  ;;  %v1239_v43 = vsub.f32 %v8737_v59, %v8736_v41  ;;  %v4285_v6 = vpop.eup %4284  ;;  %4292 = vpow2.f32 %v1294_v36  ;;  %v8745_v59 = vld [vmem:[#allocation147_spill] sm:$0xff] }
 0x38e   :  { %2429 = vrot.lane.b32.xlu1 %v6455_v60, %s4489_s3  ;;  %v4287_v22 = vpop.eup %4286  ;;  %v1876_v62 = vmul.f32 %v4285_v6, %v8741_v48 }
 0x38f   :  { %v6485_v9 = vpop.xlane.xlu1 %2238  ;;  %v1298_v44 = vmul.f32 1.442695, %v1239_v43  ;;  %v4289_v45 = vpop.eup %4288  ;;  %v1878_v34 = vmul.f32 %v4287_v22, %v8742_v50  ;;  %v8747_v43 = vld [vmem:[#allocation153_spill] sm:$0xff] }
 0x390   :  { %v6467_v26 = vpop.xlane.xlu2 %2253  ;;  %v6505_v41 = vadd.f32 %v6156_v14, %v1876_v62  ;;  %v8751_v62 = vld [vmem:[#allocation167_spill] sm:$0xff] }
 0x391   :  { %8731 = vst [vmem:[#allocation98_spill] sm:$0xff] %v6467_v26  ;;  %4294 = vpow2.f32 %v1298_v44  ;;  %v1874_v26 = vmul.f32 %v4289_v45, %v8745_v59  ;;  %v6508_v40 = vadd.f32 %v6158_v25, %v1878_v34  ;;  %v1304_v59 = vmul.f32 1.442695, %v1242_v29  ;;  %v8750_v45 = vld [vmem:[#allocation49_spill] sm:$0xff]  ;;  %v8752_v34 = vld [vmem:[#allocation156_spill] sm:$0xff] }
 0x392   :  { %v4291_v36 = vpop.eup %4290  ;;  %4296 = vlog2.f32 %v6305_v18  ;;  %v8753_v18 = vld [vmem:[#allocation165_spill] sm:$0xff] }
 0x393   :  { %v6511_v6 = vadd.f32 %v6079_v54, %v1874_v26  ;;  %v4293_v14 = vpop.eup %4292  ;;  %v1881_v48 = vmul.f32 %v4291_v36, %v8750_v45  ;;  %4298 = vpow2.f32 %v1304_v59  ;;  %v8756_v45 = vld [vmem:[#allocation80_spill] sm:$0xff] }
 0x394   :  { %v6487_v35 = vpop.xlane.xlu0 %2250  ;;  %v1877_v29 = vmul.f32 %v4293_v14, %v8752_v34 }
 0x395   :  { %8739 = vst [vmem:[#allocation68_spill] sm:$0xff] %v6487_v35  ;;  %2443 = vrot.lane.b32.xlu2 %v6480_v57, %s4489_s3  ;;  %2439 = vrot.lane.b32.xlu0 %v6477_v19, %s4489_s3  ;;  %v1240_v35 = vsub.f32 %v8747_v43, %v8746_v12  ;;  %v8754_v43 = vld [vmem:[#allocation154_spill] sm:$0xff] }
 0x396   :  { %2435 = vrot.lane.b32.xlu1 %v6483_v33, %s4489_s3  ;;  %v1243_v15 = vsub.f32 %v8754_v43, %v8753_v18 }
 0x397   :  { %v6518_v22 = vpop.xlane.xlu1 %2247  ;;  %v1300_v25 = vmul.f32 1.442695, %v1240_v35  ;;  %v4295_v54 = vpop.eup %4294  ;;  %v6535_v35 = vadd.f32 %v6185_v16, %v1881_v48 }
 0x398   :  { %v6495_v24 = vpop.xlane.xlu2 %2262  ;;  %v1879_v50 = vmul.f32 %v4295_v54, %v8751_v62 }
 0x399   :  { %8740 = vst [vmem:[#allocation119_spill] sm:$0xff] %v6495_v24  ;;  %4300 = vpow2.f32 %v1300_v25 }
 0x39a   :  { %v6532_v24 = vadd.f32 %v6183_v42, %v1879_v50  ;;  %4302 = vlog2.f32 %v6274_v2  ;;  %v1306_v42 = vmul.f32 1.442695, %v1243_v15  ;;  %v8755_v2 = vld [vmem:[#allocation55_spill] sm:$0xff] }
 0x39b   :  { %4304 = vlog2.f32 %v6299_v49 }
 0x39c   :  { %v6522_v44 = vpop.xlane.xlu0 %2259  ;;  %4306 = vpow2.f32 %v1306_v42 }
 0x39d   :  { %2449 = vrot.lane.b32.xlu2 %v6508_v40, %s4489_s3  ;;  %2445 = vrot.lane.b32.xlu0 %v6505_v41, %s4489_s3  ;;  %8748 = vst [vmem:[#allocation63_spill] sm:$0xff] %v6522_v44  ;;  %v4297_v44 = vpop.eup %4296  ;;  %4308 = vlog2.f32 %v6335_v56 }
 0x39e   :  { %2441 = vrot.lane.b32.xlu1 %v6511_v6, %s4489_s3  ;;  %v2596_v16 = vmul.f32 0.6931472, %v4297_v44  ;;  %v4299_v36 = vpop.eup %4298  ;;  %4310 = vlog2.f32 %v6329_v13 }
 0x39f   :  { %v6548_v59 = vpop.xlane.xlu1 %2256  ;;  %v4301_v14 = vpop.eup %4300  ;;  %v1882_v25 = vmul.f32 %v4299_v36, %v8755_v2  ;;  %4312 = vlog2.f32 %v6277_v27 }
 0x3a0   :  { %v6524_v26 = vpop.xlane.xlu2 %2271  ;;  %v1880_v48 = vmul.f32 %v4301_v14, %v8756_v45  ;;  %v4303_v62 = vpop.eup %4302  ;;  %v2659_v15 = vadd.f32 %v2596_v16, %v8644_v32  ;;  %4314 = vlog2.f32 %v6365_v4 }
 0x3a1   :  { %8749 = vst [vmem:[#allocation120_spill] sm:$0xff] %v6524_v26  ;;  %v6538_v26 = vadd.f32 %v6153_v0, %v1877_v29  ;;  %v6557_v49 = vadd.f32 %v6210_v10, %v1882_v25  ;;  %v4305_v44 = vpop.eup %4304  ;;  %v2598_v10 = vmul.f32 0.6931472, %v4303_v62  ;;  %v8757_v29 = vld [vmem:[#allocation74_spill] sm:$0xff]  ;;  %4316 = vlog2.f32 %v6359_v5 }
 0x3a2   :  { %v6561_v50 = vadd.f32 %v6180_v39, %v1880_v48  ;;  %v2602_v32 = vmul.f32 0.6931472, %v4305_v44  ;;  %v4307_v39 = vpop.eup %4306  ;;  %4318 = vlog2.f32 %v6302_v1  ;;  %v6607_v1 = vadd.f32 %v6139_v30, %v8635_v23 }
 0x3a3   :  { %v1883_v56 = vmul.f32 %v4307_v39, %v8757_v29  ;;  %v4309_v16 = vpop.eup %4308  ;;  %v2660_v14 = vadd.f32 %v2598_v10, %v8631_v47  ;;  %4320 = vlog2.f32 %v6395_v8  ;;  %v6611_v39 = vadd.f32 %v6377_v52, %v8635_v23  ;;  %v8759_v29 = vld [vmem:[#allocation139_spill] sm:$0xff] }
 0x3a4   :  { %v6553_v54 = vpop.xlane.xlu0 %2268  ;;  %v2662_v13 = vadd.f32 %v2602_v32, %v8638_v58  ;;  %v4311_v2 = vpop.eup %4310  ;;  %v2604_v45 = vmul.f32 0.6931472, %v4309_v16  ;;  %4322 = vlog2.f32 %v6389_v7  ;;  %v8760_v16 = vld [vmem:[#allocation130_spill] sm:$0xff] }
 0x3a5   :  { %2455 = vrot.lane.b32.xlu2 %v6535_v35, %s4489_s3  ;;  %2451 = vrot.lane.b32.xlu0 %v6532_v24, %s4489_s3  ;;  %v6581_v25 = vadd.f32 %v6216_v28, %v1883_v56  ;;  %v4313_v27 = vpop.eup %4312  ;;  %v2608_v58 = vmul.f32 0.6931472, %v4311_v2  ;;  %4324 = vlog2.f32 %v6332_v53  ;;  %8758 = vst [vmem:[#allocation61_spill] sm:$0xff] %v6611_v39 }
 0x3a6   :  { %2447 = vrot.lane.b32.xlu1 %v6538_v26, %s4489_s3  ;;  %v2600_v47 = vmul.f32 0.6931472, %v4313_v27  ;;  %v4315_v28 = vpop.eup %4314  ;;  %v2663_v62 = vadd.f32 %v2604_v45, %v8653_v63  ;;  %4326 = vlog2.f32 %v6425_v3  ;;  %v8761_v45 = vld [vmem:[#allocation13_spill] sm:$0xff] }
 0x3a7   :  { %v6574_v42 = vpop.xlane.xlu1 %2265  ;;  %v2665_v4 = vadd.f32 %v2608_v58, %v8647_v51  ;;  %v2610_v51 = vmul.f32 0.6931472, %v4315_v28  ;;  %4328 = vlog2.f32 %v6422_v55  ;;  %v8762_v58 = vld [vmem:[#allocation93_spill] sm:$0xff]  ;;  %v6637_v28 = vadd.f32 %v6409_v61, %v8761_v45 }
 0x3a8   :  { %v6550_v0 = vpop.xlane.xlu2 %2280  ;;  %v2661_v5 = vadd.f32 %v2600_v47, %v8634_v38  ;;  %4330 = vlog2.f32 %v6362_v37  ;;  %v6633_v3 = vadd.f32 %v8762_v58, %v8761_v45  ;;  %v8764_v37 = vld [vmem:[#allocation160_spill] sm:$0xff]  ;;  %v8767_v61 = vld [vmem:[#allocation9_spill] sm:$0xff] }
 0x3a9   :  { %v2666_v53 = vadd.f32 %v2610_v51, %v8664_v11  ;;  %8763 = vst [vmem:[#allocation110_spill] sm:$0xff] %v6637_v28  ;;  %4332 = vlog2.f32 %v6455_v60  ;;  %v8770_v60 = vld [vmem:[#allocation46_spill] sm:$0xff]  ;;  %v8775_v58 = vld [vmem:[#allocation164_spill] sm:$0xff] }
 0x3aa   :  { %4334 = vlog2.f32 %v6449_v46 }
 0x3ac   :  { %v6576_v36 = vpop.xlane.xlu0 %2277 }
 0x3ad   :  { %2457 = vrot.lane.b32.xlu0 %v6557_v49, %s4489_s3  ;;  %2755 = vrot.lane.b32.xlu2 %v2659_v15, %s4490_s16  ;;  %v4317_v15 = vpop.eup %4316 }
 0x3ae   :  { %2453 = vrot.lane.b32.xlu1 %v6561_v50, %s4489_s3  ;;  %v4319_v10 = vpop.eup %4318  ;;  %v2614_v63 = vmul.f32 0.6931472, %v4317_v15 }
 0x3af   :  { %v6594_v44 = vpop.xlane.xlu1 %2274  ;;  %v2606_v38 = vmul.f32 0.6931472, %v4319_v10  ;;  %v4321_v7 = vpop.eup %4320  ;;  %v8766_v10 = vld [vmem:[#allocation151_spill] sm:$0xff] }
 0x3b0   :  { %v6571_v34 = vpop.xlane.xlu2 %2289  ;;  %v2668_v30 = vadd.f32 %v2614_v63, %v8759_v29  ;;  %v4323_v56 = vpop.eup %4322  ;;  %v2616_v52 = vmul.f32 0.6931472, %v4321_v7 }
 0x3b1   :  { %v2620_v11 = vmul.f32 0.6931472, %v4323_v56 }
 0x3b4   :  { %v6598_v32 = vpop.xlane.xlu0 %2286 }
 0x3b5   :  { %2757 = vrot.lane.b32.xlu0 %v2660_v14, %s4490_s16  ;;  %2761 = vrot.lane.b32.xlu2 %v2662_v13, %s4490_s16  ;;  %v2664_v14 = vadd.f32 %v2606_v38, %v8760_v16  ;;  %v4325_v13 = vpop.eup %4324  ;;  %v8768_v38 = vld [vmem:[#allocation88_spill] sm:$0xff]  ;;  %v6659_v16 = vadd.f32 %v8770_v60, %v8767_v61 }
 0x3b6   :  { %2459 = vrot.lane.b32.xlu1 %v6581_v25, %s4489_s3  ;;  %v2612_v27 = vmul.f32 0.6931472, %v4325_v13  ;;  %v4327_v55 = vpop.eup %4326  ;;  %v8772_v13 = vld [vmem:[#allocation16_spill] sm:$0xff] }
 0x3b7   :  { %v6625_v23 = vpop.xlane.xlu1 %2283  ;;  %v2622_v7 = vmul.f32 0.6931472, %v4327_v55  ;;  %8771 = vst [vmem:[#allocation71_spill] sm:$0xff] %v6659_v16  ;;  %v6674_v45 = vadd.f32 %v6446_v21, %v8772_v13  ;;  %v8776_v55 = vld [vmem:[#allocation148_spill] sm:$0xff] }
 0x3b8   :  { %v6590_v48 = vpop.xlane.xlu2 %2298  ;;  %v2667_v51 = vadd.f32 %v2612_v27, %v8766_v10  ;;  %v8778_v10 = vld [vmem:[#allocation79_spill] sm:$0xff]  ;;  %v8784_v60 = vld [vmem:[#allocation24_spill] sm:$0xff] }
 0x3b9   :  { %8774 = vst [vmem:[#allocation133_spill] sm:$0xff] %v6674_v45 }
 0x3bc   :  { %v6629_v2 = vpop.xlane.xlu0 %2295 }
 0x3bd   :  { %2763 = vrot.lane.b32.xlu0 %v2663_v62, %s4490_s16  ;;  %2767 = vrot.lane.b32.xlu2 %v2665_v4, %s4490_s16  ;;  %v2669_v62 = vadd.f32 %v2616_v52, %v8764_v37  ;;  %v8765_v4 = vld [vmem:[#allocation143_spill] sm:$0xff]  ;;  %v8773_v52 = vld [vmem:[#allocation30_spill] sm:$0xff] }
 0x3be   :  { %2759 = vrot.lane.b32.xlu1 %v2661_v5, %s4490_s16  ;;  %v2671_v15 = vadd.f32 %v2620_v11, %v8765_v4  ;;  %v4329_v5 = vpop.eup %4328  ;;  %v6668_v11 = vadd.f32 %v8773_v52, %v8772_v13  ;;  %v8777_v4 = vld [vmem:[#allocation159_spill] sm:$0xff]  ;;  %v8785_v52 = vld [vmem:[#allocation56_spill] sm:$0xff] }
 0x3bf   :  { %v4331_v63 = vpop.eup %4330  ;;  %v2626_v29 = vmul.f32 0.6931472, %v4329_v5 }
 0x3c0   :  { %v2402_v8 = vpop.permute.xlu2 %2401  ;;  %v2618_v56 = vmul.f32 0.6931472, %v4331_v63  ;;  %v4333_v27 = vpop.eup %4332  ;;  %v8779_v63 = vld [vmem:[#allocation15_spill] sm:$0xff] }
 0x3c1   :  { %2496 = vst.msk [vmem:[#allocation2 + $0x10] sm:$0xff] %vm2493_vm3, %v2402_v8  ;;  %v6654_v8 = vadd.f32 %v8768_v38, %v8767_v61  ;;  %v2674_v37 = vadd.f32 %v2626_v29, %v8776_v55  ;;  %v2628_v21 = vmul.f32 0.6931472, %v4333_v27  ;;  %v8780_v61 = vld [vmem:[#allocation41_spill] sm:$0xff]  ;;  %v8788_v55 = vld [vmem:[#allocation118_spill] sm:$0xff] }
 0x3c2   :  { %2529 = vst.msk [vmem:[#allocation2 + $0x10] sm:$0xff] %vm2526_vm14, %v6607_v1  ;;  %v6692_v38 = vadd.f32 %v8780_v61, %v8779_v63 }
 0x3c3   :  { %2562 = vst.msk [vmem:[#allocation2 + $0x10] sm:$0xff] %vm2559_vm0, %v6611_v39 }
 0x3c5   :  { %2769 = vrot.lane.b32.xlu0 %v2666_v53, %s4490_s16  ;;  %2773 = vrot.lane.b32.xlu2 %v2668_v30, %s4490_s16  ;;  %v8769_v53 = vld [vmem:[#allocation44_spill] sm:$0xff] }
 0x3c6   :  { %2765 = vrot.lane.b32.xlu1 %v2664_v14, %s4490_s16  ;;  %4336 = vlog2.f32 %v8769_v53  ;;  %v6661_v14 = vpop.xlane.xlu1 %2292  ;;  %v8781_v53 = vld [vmem:[#allocation53_spill] sm:$0xff] }
 0x3c7   :  { %4338 = vlog2.f32 %v6483_v33  ;;  %v6696_v29 = vadd.f32 %v8781_v53, %v8779_v63  ;;  %v8791_v63 = vld [vmem:[#allocation75_spill] sm:$0xff]  ;;  %v8793_v53 = vld [vmem:[#allocation18_spill] sm:$0xff] }
 0x3c8   :  { %v2408_v47 = vpop.permute.xlu2 %2407  ;;  %4340 = vlog2.f32 %v6477_v19 }
 0x3c9   :  { %2499 = vst.msk [vmem:[#allocation2 + $0x28] sm:$0xff] %vm2493_vm3, %v2408_v47  ;;  %v2672_v47 = vadd.f32 %v2622_v7, %v8775_v58  ;;  %4342 = vlog2.f32 %v8778_v10  ;;  %v8787_v58 = vld [vmem:[#allocation112_spill] sm:$0xff]  ;;  %v8790_v10 = vld [vmem:[#allocation19_spill] sm:$0xff] }
 0x3ca   :  { %2532 = vst.msk [vmem:[#allocation2 + $0x28] sm:$0xff] %vm2526_vm14, %v6633_v3  ;;  %4344 = vlog2.f32 %v6511_v6  ;;  %v6720_v61 = vadd.f32 %v8791_v63, %v8790_v10 }
 0x3cb   :  { %2565 = vst.msk [vmem:[#allocation2 + $0x28] sm:$0xff] %vm2559_vm0, %v6637_v28  ;;  %4346 = vlog2.f32 %v6505_v41 }
 0x3cc   :  { %8782 = vst [vmem:[#allocation66_spill] sm:$0xff] %v6696_v29  ;;  %4348 = vlog2.f32 %v6452_v20 }
 0x3cd   :  { %2775 = vrot.lane.b32.xlu0 %v2669_v62, %s4490_s16  ;;  %2779 = vrot.lane.b32.xlu2 %v2671_v15, %s4490_s16  ;;  %v4335_v62 = vpop.eup %4334  ;;  %v2670_v15 = vadd.f32 %v2618_v56, %v8777_v4  ;;  %v8783_v56 = vld [vmem:[#allocation12_spill] sm:$0xff]  ;;  %v8789_v4 = vld [vmem:[#allocation163_spill] sm:$0xff]  ;;  %4350 = vlog2.f32 %v6538_v26 }
 0x3ce   :  { %2771 = vrot.lane.b32.xlu1 %v2667_v51, %s4490_s16  ;;  %v4337_v5 = vpop.eup %4336  ;;  %v2632_v51 = vmul.f32 0.6931472, %v4335_v62  ;;  %v6709_v27 = vadd.f32 %v8785_v52, %v8783_v56  ;;  %v8798_v52 = vld [vmem:[#allocation45_spill] sm:$0xff]  ;;  %4352 = vlog2.f32 %v6532_v24 }
 0x3cf   :  { %v2400_v30 = vpop.permute.xlu0 %2399  ;;  %v2624_v7 = vmul.f32 0.6931472, %v4337_v5  ;;  %v4339_v13 = vpop.eup %4338  ;;  %4354 = vlog2.f32 %v6480_v57  ;;  %v8809_v57 = vld [vmem:[#allocation58_spill] sm:$0xff] }
 0x3d0   :  { %2495 = vst.msk [vmem:[#allocation2 + $0x8] sm:$0xff] %vm2493_vm3, %v2400_v30  ;;  %v2414_v46 = vpop.permute.xlu2 %2413  ;;  %v4341_v62 = vpop.eup %4340  ;;  %v2634_v6 = vmul.f32 0.6931472, %v4339_v13  ;;  %v8797_v13 = vld [vmem:[#allocation11_spill] sm:$0xff]  ;;  %4356 = vlog2.f32 %v6561_v50 }
 0x3d1   :  { %2528 = vst.msk [vmem:[#allocation2 + $0x8] sm:$0xff] %vm2526_vm14, %v6654_v8  ;;  %v4343_v5 = vpop.eup %4342  ;;  %4358 = vlog2.f32 %v6557_v49 }
 0x3d2   :  { %2561 = vst.msk [vmem:[#allocation2 + $0x8] sm:$0xff] %vm2559_vm0, %v6659_v16  ;;  %v4345_v20 = vpop.eup %4344  ;;  %4360 = vlog2.f32 %v6508_v40  ;;  %v8822_v40 = vld [vmem:[#allocation26_spill] sm:$0xff] }
 0x3d3   :  { %2502 = vst.msk [vmem:[#allocation2 + $0x40] sm:$0xff] %vm2493_vm3, %v2414_v46  ;;  %v6703_v46 = vadd.f32 %v8784_v60, %v8783_v56  ;;  %v8795_v56 = vld [vmem:[#allocation89_spill] sm:$0xff]  ;;  %4362 = vlog2.f32 %v6581_v25 }
 0x3d4   :  { %2535 = vst.msk [vmem:[#allocation2 + $0x40] sm:$0xff] %vm2526_vm14, %v6668_v11  ;;  %v6744_v60 = vadd.f32 %v8795_v56, %v8793_v53  ;;  %4364 = vlog2.f32 %v6535_v35  ;;  %v8836_v35 = vld [vmem:[#allocation29_spill] sm:$0xff] }
 0x3d5   :  { %2568 = vst.msk [vmem:[#allocation2 + $0x40] sm:$0xff] %vm2559_vm0, %v6674_v45  ;;  %2781 = vrot.lane.b32.xlu0 %v2672_v47, %s4490_s16  ;;  %2785 = vrot.lane.b32.xlu2 %v2674_v37, %s4490_s16  ;;  %v2675_v47 = vadd.f32 %v2628_v21, %v8787_v58  ;;  %v2677_v37 = vadd.f32 %v2632_v51, %v8788_v55  ;;  %v2638_v51 = vmul.f32 0.6931472, %v4341_v62 }
 0x3d6   :  { %2777 = vrot.lane.b32.xlu1 %v2670_v15, %s4490_s16  ;;  %8786 = vst [vmem:[#allocation136_spill] sm:$0xff] %v6709_v27  ;;  %v2673_v15 = vadd.f32 %v2624_v7, %v8789_v4  ;;  %v6729_v21 = vadd.f32 %v6485_v9, %v8790_v10  ;;  %v2630_v7 = vmul.f32 0.6931472, %v4343_v5  ;;  %v6751_v58 = vadd.f32 %v8798_v52, %v8797_v13  ;;  %v4347_v4 = vpop.eup %4346  ;;  %v8803_v10 = vld [vmem:[#allocation117_spill] sm:$0xff] }
 0x3d7   :  { %v2404_v33 = vpop.permute.xlu0 %2403  ;;  %8796 = vst [vmem:[#allocation116_spill] sm:$0xff] %v6744_v60  ;;  %v2644_v26 = vmul.f32 0.6931472, %v4347_v4  ;;  %v8807_v52 = vld [vmem:[#allocation21_spill] sm:$0xff] }
 0x3d8   :  { %2497 = vst.msk [vmem:[#allocation2 + $0x18] sm:$0xff] %vm2493_vm3, %v2404_v33  ;;  %v2398_v30 = vpop.permute.xlu1 %2397  ;;  %v2420_v19 = vpop.permute.xlu2 %2419  ;;  %v2676_v63 = vadd.f32 %v2630_v7, %v8803_v10  ;;  %v2640_v7 = vmul.f32 0.6931472, %v4345_v20  ;;  %v8811_v20 = vld [vmem:[#allocation150_spill] sm:$0xff] }
 0x3d9   :  { %2530 = vst.msk [vmem:[#allocation2 + $0x18] sm:$0xff] %vm2526_vm14, %v6692_v38  ;;  %v8813_v10 = vld [vmem:[#allocation14_spill] sm:$0xff] }
 0x3da   :  { %2563 = vst.msk [vmem:[#allocation2 + $0x18] sm:$0xff] %vm2559_vm0, %v6696_v29 }
 0x3db   :  { %2494 = vst.msk [vmem:[#allocation2] sm:$0xff] %vm2493_vm3, %v2398_v30  ;;  %v8794_v30 = vld [vmem:[#allocation25_spill] sm:$0xff] }
 0x3dc   :  { %2527 = vst.msk [vmem:[#allocation2] sm:$0xff] %vm2526_vm14, %v6703_v46  ;;  %v6738_v41 = vadd.f32 %v8794_v30, %v8793_v53 }
 0x3dd   :  { %2560 = vst.msk [vmem:[#allocation2] sm:$0xff] %vm2559_vm0, %v6709_v27  ;;  %2787 = vrot.lane.b32.xlu0 %v2675_v47, %s4490_s16  ;;  %2791 = vrot.lane.b32.xlu2 %v2677_v37, %s4490_s16  ;;  %v8799_v47 = vld [vmem:[#allocation128_spill] sm:$0xff] }
 0x3de   :  { %8792 = vst [vmem:[#allocation65_spill] sm:$0xff] %v6729_v21  ;;  %2783 = vrot.lane.b32.xlu1 %v2673_v15, %s4490_s16  ;;  %v2678_v55 = vadd.f32 %v2634_v6, %v8799_v47  ;;  %v8800_v37 = vld [vmem:[#allocation132_spill] sm:$0xff]  ;;  %v8801_v15 = vld [vmem:[#allocation50_spill] sm:$0xff]  ;;  %v8808_v47 = vld [vmem:[#allocation87_spill] sm:$0xff] }
 0x3df   :  { %2505 = vst.msk [vmem:[#allocation2 + $0x58] sm:$0xff] %vm2493_vm3, %v2420_v19  ;;  %v2410_v33 = vpop.permute.xlu0 %2409  ;;  %v2680_v62 = vadd.f32 %v2638_v51, %v8800_v37  ;;  %v6759_v5 = vadd.f32 %v8801_v15, %v8797_v13  ;;  %v8804_v6 = vld [vmem:[#allocation22_spill] sm:$0xff]  ;;  %v2681_v37 = vadd.f32 %v2640_v7, %v8811_v20 }
 0x3e0   :  { %2538 = vst.msk [vmem:[#allocation2 + $0x58] sm:$0xff] %vm2526_vm14, %v6720_v61  ;;  %v2406_v9 = vpop.permute.xlu1 %2405  ;;  %v2426_v19 = vpop.permute.xlu2 %2425  ;;  %v8805_v51 = vld [vmem:[#allocation34_spill] sm:$0xff]  ;;  %v6779_v30 = vadd.f32 %v6518_v22, %v8804_v6  ;;  %v6792_v22 = vadd.f32 %v8809_v57, %v8807_v52 }
 0x3e1   :  { %2571 = vst.msk [vmem:[#allocation2 + $0x58] sm:$0xff] %vm2559_vm0, %v6729_v21  ;;  %v6771_v53 = vadd.f32 %v8805_v51, %v8804_v6  ;;  %v8815_v6 = vld [vmem:[#allocation127_spill] sm:$0xff] }
 0x3e2   :  { %2500 = vst.msk [vmem:[#allocation2 + $0x30] sm:$0xff] %vm2493_vm3, %v2410_v33  ;;  %v4349_v33 = vpop.eup %4348 }
 0x3e3   :  { %2533 = vst.msk [vmem:[#allocation2 + $0x30] sm:$0xff] %vm2526_vm14, %v6738_v41 }
 0x3e4   :  { %2566 = vst.msk [vmem:[#allocation2 + $0x30] sm:$0xff] %vm2559_vm0, %v6744_v60 }
 0x3e5   :  { %8802 = vst [vmem:[#allocation138_spill] sm:$0xff] %v6759_v5  ;;  %2793 = vrot.lane.b32.xlu0 %v2678_v55, %s4490_s16  ;;  %2797 = vrot.lane.b32.xlu2 %v2680_v62, %s4490_s16  ;;  %v6786_v55 = vadd.f32 %v8808_v47, %v8807_v52  ;;  %v8812_v62 = vld [vmem:[#allocation137_spill] sm:$0xff] }
 0x3e6   :  { %2498 = vst.msk [vmem:[#allocation2 + $0x20] sm:$0xff] %vm2493_vm3, %v2406_v9  ;;  %2789 = vrot.lane.b32.xlu1 %v2676_v63, %s4490_s16  ;;  %v2636_v9 = vmul.f32 0.6931472, %v4349_v33  ;;  %v2683_v4 = vadd.f32 %v2644_v26, %v8812_v62  ;;  %v8814_v63 = vld [vmem:[#allocation51_spill] sm:$0xff]  ;;  %v8818_v26 = vld [vmem:[#allocation28_spill] sm:$0xff] }
 0x3e7   :  { %2531 = vst.msk [vmem:[#allocation2 + $0x20] sm:$0xff] %vm2526_vm14, %v6751_v58  ;;  %v2416_v24 = vpop.permute.xlu0 %2415  ;;  %v6801_v33 = vadd.f32 %v8814_v63, %v8813_v10  ;;  %v6827_v49 = vadd.f32 %v6548_v59, %v8818_v26  ;;  %v8823_v62 = vld [vmem:[#allocation103_spill] sm:$0xff] }
 0x3e8   :  { %2564 = vst.msk [vmem:[#allocation2 + $0x20] sm:$0xff] %vm2559_vm0, %v6759_v5  ;;  %v2412_v56 = vpop.permute.xlu1 %2411  ;;  %v2432_v13 = vpop.permute.xlu2 %2431  ;;  %v2679_v51 = vadd.f32 %v2636_v9, %v8815_v6  ;;  %v8819_v9 = vld [vmem:[#allocation109_spill] sm:$0xff] }
 0x3e9   :  { %8806 = vst [vmem:[#allocation140_spill] sm:$0xff] %v6779_v30  ;;  %v6821_v57 = vadd.f32 %v8819_v9, %v8818_v26  ;;  %v8828_v9 = vld [vmem:[#allocation17_spill] sm:$0xff] }
 0x3ea   :  { %2508 = vst.msk [vmem:[#allocation2 + $0x70] sm:$0xff] %vm2493_vm3, %v2426_v19  ;;  %v4351_v19 = vpop.eup %4350 }
 0x3eb   :  { %2541 = vst.msk [vmem:[#allocation2 + $0x70] sm:$0xff] %vm2526_vm14, %v6771_v53  ;;  %v4353_v15 = vpop.eup %4352  ;;  %v2646_v7 = vmul.f32 0.6931472, %v4351_v19 }
 0x3ec   :  { %2574 = vst.msk [vmem:[#allocation2 + $0x70] sm:$0xff] %vm2559_vm0, %v6779_v30  ;;  %v4355_v52 = vpop.eup %4354  ;;  %v2650_v50 = vmul.f32 0.6931472, %v4353_v15 }
 0x3ed   :  { %8810 = vst [vmem:[#allocation69_spill] sm:$0xff] %v6792_v22  ;;  %2799 = vrot.lane.b32.xlu0 %v2681_v37, %s4490_s16  ;;  %2803 = vrot.lane.b32.xlu2 %v2683_v4, %s4490_s16  ;;  %v2642_v20 = vmul.f32 0.6931472, %v4355_v52  ;;  %v6834_v4 = vadd.f32 %v8823_v62, %v8822_v40  ;;  %v4357_v15 = vpop.eup %4356  ;;  %v2684_v59 = vadd.f32 %v2646_v7, %v8733_v17  ;;  %v8827_v52 = vld [vmem:[#allocation149_spill] sm:$0xff]  ;;  %v8830_v17 = vld [vmem:[#allocation64_spill] sm:$0xff] }
 0x3ee   :  { %2503 = vst.msk [vmem:[#allocation2 + $0x48] sm:$0xff] %vm2493_vm3, %v2416_v24  ;;  %v8816_v24 = vld [vmem:[#allocation52_spill] sm:$0xff]  ;;  %2795 = vrot.lane.b32.xlu1 %v2679_v51, %s4490_s16  ;;  %v4359_v51 = vpop.eup %4358  ;;  %v8829_v62 = vld [vmem:[#allocation97_spill] sm:$0xff]  ;;  %v6859_v7 = vadd.f32 %v8830_v17, %v8828_v9 }
 0x3ef   :  { %2536 = vst.msk [vmem:[#allocation2 + $0x48] sm:$0xff] %vm2526_vm14, %v6786_v55  ;;  %v6809_v47 = vadd.f32 %v8816_v24, %v8813_v10  ;;  %v8824_v10 = vld [vmem:[#allocation81_spill] sm:$0xff]  ;;  %v2682_v24 = vadd.f32 %v2642_v20, %v8827_v52  ;;  %v4361_v26 = vpop.eup %4360 }
 0x3f0   :  { %2569 = vst.msk [vmem:[#allocation2 + $0x48] sm:$0xff] %vm2559_vm0, %v6792_v22  ;;  %v2418_v37 = vpop.permute.xlu1 %2417  ;;  %v2438_v19 = vpop.permute.xlu2 %2437  ;;  %v6840_v63 = vadd.f32 %v8824_v10, %v8822_v40  ;;  %v2648_v40 = vmul.f32 0.6931472, %v4361_v26  ;;  %v8832_v10 = vld [vmem:[#allocation33_spill] sm:$0xff] }
 0x3f1   :  { %8817 = vst [vmem:[#allocation78_spill] sm:$0xff] %v6809_v47  ;;  %v4363_v26 = vpop.eup %4362 }
 0x3f2   :  { %2501 = vst.msk [vmem:[#allocation2 + $0x38] sm:$0xff] %vm2493_vm3, %v2412_v56  ;;  %v2422_v56 = vpop.permute.xlu0 %2421  ;;  %v4365_v17 = vpop.eup %4364 }
 0x3f3   :  { %2534 = vst.msk [vmem:[#allocation2 + $0x38] sm:$0xff] %vm2526_vm14, %v6801_v33 }
 0x3f4   :  { %8820 = vst [vmem:[#allocation32_spill] sm:$0xff] %v6821_v57 }
 0x3f5   :  { %2567 = vst.msk [vmem:[#allocation2 + $0x38] sm:$0xff] %vm2559_vm0, %v6809_v47  ;;  %2805 = vrot.lane.b32.xlu0 %v2684_v59, %s4490_s16  ;;  %v8833_v59 = vld [vmem:[#allocation37_spill] sm:$0xff] }
 0x3f6   :  { %8821 = vst [vmem:[#allocation84_spill] sm:$0xff] %v6827_v49  ;;  %2801 = vrot.lane.b32.xlu1 %v2682_v24, %s4490_s16  ;;  %v6868_v25 = vadd.f32 %v8833_v59, %v8832_v10  ;;  %v2654_v59 = vmul.f32 0.6931472, %v4365_v17 }
 0x3f7   :  { %2511 = vst.msk [vmem:[#allocation2 + $0x88] sm:$0xff] %vm2493_vm3, %v2432_v13  ;;  %v8826_v13 = vld [vmem:[#allocation142_spill] sm:$0xff] }
 0x3f8   :  { %2544 = vst.msk [vmem:[#allocation2 + $0x88] sm:$0xff] %vm2526_vm14, %v6821_v57  ;;  %v2686_v6 = vadd.f32 %v2650_v50, %v8826_v13  ;;  %v6850_v57 = vadd.f32 %v8829_v62, %v8828_v9  ;;  %v2652_v50 = vmul.f32 0.6931472, %v4357_v15  ;;  %v2424_v13 = vpop.permute.xlu1 %2423  ;;  %v6874_v15 = vadd.f32 %v6574_v42, %v8832_v10  ;;  %v8838_v42 = vld [vmem:[#allocation68_spill] sm:$0xff] }
 0x3f9   :  { %2577 = vst.msk [vmem:[#allocation2 + $0x88] sm:$0xff] %vm2559_vm0, %v6827_v49  ;;  %v6889_v9 = vadd.f32 %v8838_v42, %v8836_v35 }
 0x3fa   :  { %8825 = vst [vmem:[#allocation27_spill] sm:$0xff] %v6840_v63  ;;  %2809 = vrot.lane.b32.xlu2 %v2686_v6, %s4490_s16  ;;  %v2428_v20 = vpop.permute.xlu0 %2427  ;;  %v8837_v6 = vld [vmem:[#allocation31_spill] sm:$0xff]  ;;  %v2687_v52 = vadd.f32 %v2652_v50, %v8746_v12  ;;  %v8841_v12 = vld [vmem:[#allocation20_spill] sm:$0xff] }
 0x3fb   :  { %2506 = vst.msk [vmem:[#allocation2 + $0x60] sm:$0xff] %vm2493_vm3, %v2422_v56  ;;  %v2656_v56 = vmul.f32 0.6931472, %v4359_v51  ;;  %v6881_v51 = vadd.f32 %v8837_v6, %v8836_v35  ;;  %v8842_v50 = vld [vmem:[#allocation36_spill] sm:$0xff] }
 0x3fc   :  { %2539 = vst.msk [vmem:[#allocation2 + $0x60] sm:$0xff] %vm2526_vm14, %v6834_v4 }
 0x3fd   :  { %2572 = vst.msk [vmem:[#allocation2 + $0x60] sm:$0xff] %vm2559_vm0, %v6840_v63  ;;  %v2689_v24 = vadd.f32 %v2656_v56, %v8743_v31  ;;  %2811 = vrot.lane.b32.xlu0 %v2687_v52, %s4490_s16  ;;  %v6899_v31 = vadd.f32 %v8842_v50, %v8841_v12  ;;  %v2658_v56 = vmul.f32 0.6931472, %v4363_v26  ;;  %v8845_v52 = vld [vmem:[#allocation67_spill] sm:$0xff] }
 0x3fe   :  { %8831 = vst [vmem:[#allocation114_spill] sm:$0xff] %v6859_v7  ;;  %v6919_v26 = vadd.f32 %v6594_v44, %v8845_v52 }
 0x3ff   :  { %2504 = vst.msk [vmem:[#allocation2 + $0x50] sm:$0xff] %vm2493_vm3, %v2418_v37  ;;  %v2444_v37 = vpop.permute.xlu2 %2443 }
 0x400   :  { %2537 = vst.msk [vmem:[#allocation2 + $0x50] sm:$0xff] %vm2526_vm14, %v6850_v57  ;;  %v2430_v35 = vpop.permute.xlu1 %2429 }
 0x401   :  { %8834 = vst [vmem:[#allocation115_spill] sm:$0xff] %v6868_v25 }
 0x402   :  { %2570 = vst.msk [vmem:[#allocation2 + $0x50] sm:$0xff] %vm2559_vm0, %v6859_v7  ;;  %2815 = vrot.lane.b32.xlu2 %v2689_v24, %s4490_s16  ;;  %v2434_v10 = vpop.permute.xlu0 %2433  ;;  %v8846_v24 = vld [vmem:[#allocation104_spill] sm:$0xff] }
 0x403   :  { %8835 = vst [vmem:[#allocation10_spill] sm:$0xff] %v6874_v15  ;;  %v6913_v42 = vadd.f32 %v8846_v24, %v8845_v52  ;;  %v8857_v52 = vld [vmem:[#allocation98_spill] sm:$0xff] }
 0x404   :  { %2514 = vst.msk [vmem:[#allocation2 + $0xa0] sm:$0xff] %vm2493_vm3, %v2438_v19  ;;  %v8840_v19 = vld [vmem:[#allocation157_spill] sm:$0xff] }
 0x405   :  { %2547 = vst.msk [vmem:[#allocation2 + $0xa0] sm:$0xff] %vm2526_vm14, %v6868_v25  ;;  %v2685_v62 = vadd.f32 %v2648_v40, %v8840_v19  ;;  %v8849_v19 = vld [vmem:[#allocation62_spill] sm:$0xff] }
 0x406   :  { %2580 = vst.msk [vmem:[#allocation2 + $0xa0] sm:$0xff] %vm2559_vm0, %v6874_v15 }
 0x407   :  { %8839 = vst [vmem:[#allocation126_spill] sm:$0xff] %v6889_v9  ;;  %2807 = vrot.lane.b32.xlu1 %v2685_v62, %s4490_s16  ;;  %v2450_v6 = vpop.permute.xlu2 %2449  ;;  %v8850_v62 = vld [vmem:[#allocation85_spill] sm:$0xff] }
 0x408   :  { %2509 = vst.msk [vmem:[#allocation2 + $0x78] sm:$0xff] %vm2493_vm3, %v2428_v20  ;;  %v8843_v20 = vld [vmem:[#allocation57_spill] sm:$0xff]  ;;  %v6927_v17 = vadd.f32 %v8850_v62, %v8849_v19  ;;  %v8860_v62 = vld [vmem:[#allocation48_spill] sm:$0xff] }
 0x409   :  { %2542 = vst.msk [vmem:[#allocation2 + $0x78] sm:$0xff] %vm2526_vm14, %v6881_v51  ;;  %v6906_v40 = vadd.f32 %v8843_v20, %v8841_v12  ;;  %v8852_v12 = vld [vmem:[#allocation161_spill] sm:$0xff]  ;;  %v8853_v20 = vld [vmem:[#allocation63_spill] sm:$0xff] }
 0x40a   :  { %2575 = vst.msk [vmem:[#allocation2 + $0x78] sm:$0xff] %vm2559_vm0, %v6889_v9  ;;  %v2688_v50 = vadd.f32 %v2654_v59, %v8852_v12  ;;  %v6934_v44 = vadd.f32 %v8853_v20, %v8849_v19  ;;  %v2440_v59 = vpop.permute.xlu0 %2439  ;;  %v8859_v19 = vld [vmem:[#allocation124_spill] sm:$0xff]  ;;  %v8864_v20 = vld [vmem:[#allocation35_spill] sm:$0xff] }
 0x40b   :  { %8844 = vst [vmem:[#allocation107_spill] sm:$0xff] %v6906_v40  ;;  %v6956_v12 = vadd.f32 %v8860_v62, %v8859_v19 }
 0x40c   :  { %2507 = vst.msk [vmem:[#allocation2 + $0x68] sm:$0xff] %vm2493_vm3, %v2424_v13  ;;  %v2690_v13 = vadd.f32 %v2658_v56, %v8753_v18  ;;  %v8855_v18 = vld [vmem:[#allocation23_spill] sm:$0xff] }
 0x40d   :  { %2540 = vst.msk [vmem:[#allocation2 + $0x68] sm:$0xff] %vm2526_vm14, %v6899_v31  ;;  %v6949_v24 = vadd.f32 %v8857_v52, %v8855_v18  ;;  %v8868_v52 = vld [vmem:[#allocation39_spill] sm:$0xff] }
 0x40e   :  { %8847 = vst [vmem:[#allocation134_spill] sm:$0xff] %v6913_v42  ;;  %2817 = vrot.lane.b32.xlu0 %v2690_v13, %s4490_s16 }
 0x40f   :  { %2573 = vst.msk [vmem:[#allocation2 + $0x68] sm:$0xff] %vm2559_vm0, %v6906_v40  ;;  %2813 = vrot.lane.b32.xlu1 %v2688_v50, %s4490_s16  ;;  %v2456_v13 = vpop.permute.xlu2 %2455  ;;  %v6962_v50 = vadd.f32 %v6625_v23, %v8859_v19 }
 0x410   :  { %8848 = vst [vmem:[#allocation131_spill] sm:$0xff] %v6919_v26 }
 0x411   :  { %2517 = vst.msk [vmem:[#allocation2 + $0xb8] sm:$0xff] %vm2493_vm3, %v2444_v37  ;;  %v8856_v37 = vld [vmem:[#allocation94_spill] sm:$0xff] }
 0x412   :  { %2550 = vst.msk [vmem:[#allocation2 + $0xb8] sm:$0xff] %vm2526_vm14, %v6913_v42  ;;  %v6943_v56 = vadd.f32 %v8856_v37, %v8855_v18  ;;  %v2446_v23 = vpop.permute.xlu0 %2445 }
 0x413   :  { %8851 = vst [vmem:[#allocation70_spill] sm:$0xff] %v6927_v17 }
 0x414   :  { %2583 = vst.msk [vmem:[#allocation2 + $0xb8] sm:$0xff] %vm2559_vm0, %v6919_v26 }
 0x415   :  { %8854 = vst [vmem:[#allocation72_spill] sm:$0xff] %v6934_v44 }
 0x416   :  { %2512 = vst.msk [vmem:[#allocation2 + $0x90] sm:$0xff] %vm2493_vm3, %v2434_v10  ;;  %v2436_v10 = vpop.permute.xlu1 %2435 }
 0x417   :  { %2545 = vst.msk [vmem:[#allocation2 + $0x90] sm:$0xff] %vm2526_vm14, %v6927_v17 }
 0x418   :  { %2578 = vst.msk [vmem:[#allocation2 + $0x90] sm:$0xff] %vm2559_vm0, %v6934_v44 }
 0x419   :  { %8858 = vst [vmem:[#allocation152_spill] sm:$0xff] %v6949_v24 }
 0x41a   :  { %2510 = vst.msk [vmem:[#allocation2 + $0x80] sm:$0xff] %vm2493_vm3, %v2430_v35  ;;  %v8863_v35 = vld [vmem:[#allocation100_spill] sm:$0xff] }
 0x41b   :  { %2543 = vst.msk [vmem:[#allocation2 + $0x80] sm:$0xff] %vm2526_vm14, %v6943_v56  ;;  %v6969_v18 = vadd.f32 %v8864_v20, %v8863_v35  ;;  %v6975_v37 = vadd.f32 %v6553_v54, %v8863_v35  ;;  %v2756_v20 = vpop.permute.xlu2 %2755  ;;  %v8872_v35 = vld [vmem:[#allocation54_spill] sm:$0xff] }
 0x41c   :  { %8861 = vst [vmem:[#allocation83_spill] sm:$0xff] %v6956_v12  ;;  %v2851_v54 = vmul.f32 %v2756_v20, %v6709_v27 }
 0x41d   :  { %2576 = vst.msk [vmem:[#allocation2 + $0x80] sm:$0xff] %vm2559_vm0, %v6949_v24 }
 0x41e   :  { %8862 = vst [vmem:[#allocation77_spill] sm:$0xff] %v6962_v50  ;;  %v2442_v62 = vpop.permute.xlu1 %2441  ;;  %2915 = vrot.lane.b32.xlu1 %v2851_v54, %s4488_s6 }
 0x41f   :  { %2520 = vst.msk [vmem:[#allocation2 + $0xd0] sm:$0xff] %vm2493_vm3, %v2450_v6  ;;  %v8867_v6 = vld [vmem:[#allocation60_spill] sm:$0xff] }
 0x420   :  { %2553 = vst.msk [vmem:[#allocation2 + $0xd0] sm:$0xff] %vm2526_vm14, %v6956_v12  ;;  %v6982_v19 = vadd.f32 %v8868_v52, %v8867_v6  ;;  %v8869_v12 = vld [vmem:[#allocation119_spill] sm:$0xff] }
 0x421   :  { %8865 = vst [vmem:[#allocation76_spill] sm:$0xff] %v6969_v18  ;;  %v6988_v42 = vadd.f32 %v8869_v12, %v8867_v6  ;;  %v8876_v6 = vld [vmem:[#allocation38_spill] sm:$0xff] }
 0x422   :  { %2586 = vst.msk [vmem:[#allocation2 + $0xd0] sm:$0xff] %vm2559_vm0, %v6962_v50 }
 0x423   :  { %8866 = vst [vmem:[#allocation91_spill] sm:$0xff] %v6975_v37  ;;  %v2762_v54 = vpop.permute.xlu2 %2761 }
 0x424   :  { %2515 = vst.msk [vmem:[#allocation2 + $0xa8] sm:$0xff] %vm2493_vm3, %v2440_v59  ;;  %v8871_v59 = vld [vmem:[#allocation135_spill] sm:$0xff] }
 0x425   :  { %2548 = vst.msk [vmem:[#allocation2 + $0xa8] sm:$0xff] %vm2526_vm14, %v6969_v18  ;;  %v6996_v52 = vadd.f32 %v8872_v35, %v8871_v59  ;;  %v7003_v12 = vadd.f32 %v6661_v14, %v8871_v59  ;;  %v2452_v14 = vpop.permute.xlu0 %2451  ;;  %v8879_v59 = vld [vmem:[#allocation105_spill] sm:$0xff] }
 0x426   :  { %2581 = vst.msk [vmem:[#allocation2 + $0xa8] sm:$0xff] %vm2559_vm0, %v6975_v37 }
 0x427   :  { %8870 = vst [vmem:[#allocation86_spill] sm:$0xff] %v6988_v42 }
 0x428   :  { %2513 = vst.msk [vmem:[#allocation2 + $0x98] sm:$0xff] %vm2493_vm3, %v2436_v10  ;;  %v8875_v10 = vld [vmem:[#allocation121_spill] sm:$0xff] }
 0x429   :  { %2546 = vst.msk [vmem:[#allocation2 + $0x98] sm:$0xff] %vm2526_vm14, %v6982_v19  ;;  %v7010_v20 = vadd.f32 %v8876_v6, %v8875_v10  ;;  %v7016_v35 = vadd.f32 %v6576_v36, %v8875_v10  ;;  %v2854_v6 = vmul.f32 %v2762_v54, %v6696_v29  ;;  %v8882_v36 = vld [vmem:[#allocation120_spill] sm:$0xff] }
 0x42a   :  { %8873 = vst [vmem:[#allocation73_spill] sm:$0xff] %v6996_v52  ;;  %v7030_v10 = vadd.f32 %v8882_v36, %v8879_v59 }
 0x42b   :  { %2579 = vst.msk [vmem:[#allocation2 + $0x98] sm:$0xff] %vm2559_vm0, %v6988_v42  ;;  %2921 = vrot.lane.b32.xlu1 %v2854_v6, %s4488_s6 }
 0x42c   :  { %8874 = vst [vmem:[#allocation96_spill] sm:$0xff] %v7003_v12 }
 0x42d   :  { %2523 = vst.msk [vmem:[#allocation2 + $0xe8] sm:$0xff] %vm2493_vm3, %v2456_v13  ;;  %v2448_v13 = vpop.permute.xlu1 %2447 }
 0x42e   :  { %2556 = vst.msk [vmem:[#allocation2 + $0xe8] sm:$0xff] %vm2526_vm14, %v6996_v52  ;;  %v8880_v52 = vld [vmem:[#allocation43_spill] sm:$0xff] }
 0x42f   :  { %8877 = vst [vmem:[#allocation92_spill] sm:$0xff] %v7010_v20  ;;  %v7023_v18 = vadd.f32 %v8880_v52, %v8879_v59  ;;  %v8889_v59 = vld [vmem:[#allocation42_spill] sm:$0xff] }
 0x430   :  { %2589 = vst.msk [vmem:[#allocation2 + $0xe8] sm:$0xff] %vm2559_vm0, %v7003_v12 }
 0x431   :  { %8878 = vst [vmem:[#allocation82_spill] sm:$0xff] %v7016_v35 }
 0x432   :  { %2518 = vst.msk [vmem:[#allocation2 + $0xc0] sm:$0xff] %vm2493_vm3, %v2446_v23  ;;  %v8884_v23 = vld [vmem:[#allocation141_spill] sm:$0xff] }
 0x433   :  { %2551 = vst.msk [vmem:[#allocation2 + $0xc0] sm:$0xff] %vm2526_vm14, %v7010_v20  ;;  %v8885_v20 = vld [vmem:[#allocation113_spill] sm:$0xff]  ;;  %v7044_v54 = vadd.f32 %v6598_v32, %v8884_v23 }
 0x434   :  { %8881 = vst [vmem:[#allocation102_spill] sm:$0xff] %v7023_v18  ;;  %v7038_v52 = vadd.f32 %v8885_v20, %v8884_v23  ;;  %v2458_v20 = vpop.permute.xlu0 %2457  ;;  %v2768_v23 = vpop.permute.xlu2 %2767 }
 0x435   :  { %2584 = vst.msk [vmem:[#allocation2 + $0xc0] sm:$0xff] %vm2559_vm0, %v7016_v35  ;;  %v2454_v32 = vpop.permute.xlu1 %2453 }
 0x436   :  { %8883 = vst [vmem:[#allocation99_spill] sm:$0xff] %v7030_v10 }
 0x437   :  { %2516 = vst.msk [vmem:[#allocation2 + $0xb0] sm:$0xff] %vm2493_vm3, %v2442_v62  ;;  %v8888_v62 = vld [vmem:[#allocation123_spill] sm:$0xff] }
 0x438   :  { %2549 = vst.msk [vmem:[#allocation2 + $0xb0] sm:$0xff] %vm2526_vm14, %v7023_v18  ;;  %v7051_v36 = vadd.f32 %v8889_v59, %v8888_v62  ;;  %v7057_v6 = vadd.f32 %v6550_v0, %v8888_v62  ;;  %v8893_v59 = vld [vmem:[#allocation40_spill] sm:$0xff]  ;;  %v8897_v62 = vld [vmem:[#allocation47_spill] sm:$0xff] }
 0x439   :  { %8886 = vst [vmem:[#allocation90_spill] sm:$0xff] %v7038_v52 }
 0x43a   :  { %2582 = vst.msk [vmem:[#allocation2 + $0xb0] sm:$0xff] %vm2559_vm0, %v7030_v10 }
 0x43b   :  { %8887 = vst [vmem:[#allocation106_spill] sm:$0xff] %v7044_v54 }
 0x43c   :  { %2521 = vst.msk [vmem:[#allocation2 + $0xd8] sm:$0xff] %vm2493_vm3, %v2452_v14  ;;  %v2857_v14 = vmul.f32 %v2768_v23, %v6744_v60 }
 0x43d   :  { %2554 = vst.msk [vmem:[#allocation2 + $0xd8] sm:$0xff] %vm2526_vm14, %v7038_v52  ;;  %v8892_v52 = vld [vmem:[#allocation144_spill] sm:$0xff] }
 0x43e   :  { %8890 = vst [vmem:[#allocation108_spill] sm:$0xff] %v7051_v36  ;;  %v7065_v25 = vadd.f32 %v8893_v59, %v8892_v52  ;;  %v7071_v0 = vadd.f32 %v6629_v2, %v8892_v52  ;;  %2927 = vrot.lane.b32.xlu1 %v2857_v14, %s4488_s6  ;;  %v2758_v2 = vpop.permute.xlu0 %2757  ;;  %v8900_v52 = vld [vmem:[#allocation59_spill] sm:$0xff] }
 0x43f   :  { %2587 = vst.msk [vmem:[#allocation2 + $0xd8] sm:$0xff] %vm2559_vm0, %v7044_v54  ;;  %v2852_v14 = vmul.f32 %v2758_v2, %v6659_v16 }
 0x440   :  { %8891 = vst [vmem:[#allocation95_spill] sm:$0xff] %v7057_v6 }
 0x441   :  { %2519 = vst.msk [vmem:[#allocation2 + $0xc8] sm:$0xff] %vm2493_vm3, %v2448_v13  ;;  %v8896_v13 = vld [vmem:[#allocation153_spill] sm:$0xff]  ;;  %2917 = vrot.lane.b32.xlu2 %v2852_v14, %s4488_s6 }
 0x442   :  { %2552 = vst.msk [vmem:[#allocation2 + $0xc8] sm:$0xff] %vm2526_vm14, %v7051_v36  ;;  %v7079_v23 = vadd.f32 %v8897_v62, %v8896_v13  ;;  %v7085_v59 = vadd.f32 %v6571_v34, %v8896_v13  ;;  %v2460_v62 = vpop.permute.xlu1 %2459  ;;  %v7099_v34 = vadd.f32 %v6590_v48, %v8754_v43 }
 0x443   :  { %8894 = vst [vmem:[#allocation125_spill] sm:$0xff] %v7065_v25 }
 0x444   :  { %2585 = vst.msk [vmem:[#allocation2 + $0xc8] sm:$0xff] %vm2559_vm0, %v7057_v6 }
 0x445   :  { %8895 = vst [vmem:[#allocation111_spill] sm:$0xff] %v7071_v0 }
 0x446   :  { %2524 = vst.msk [vmem:[#allocation2 + $0xf0] sm:$0xff] %vm2493_vm3, %v2458_v20  ;;  %v7092_v20 = vadd.f32 %v8900_v52, %v8754_v43  ;;  %v2764_v13 = vpop.permute.xlu0 %2763 }
 0x447   :  { %2557 = vst.msk [vmem:[#allocation2 + $0xf0] sm:$0xff] %vm2526_vm14, %v7065_v25  ;;  %v2774_v25 = vpop.permute.xlu2 %2773  ;;  %v2855_v2 = vmul.f32 %v2764_v13, %v6759_v5 }
 0x448   :  { %8898 = vst [vmem:[#allocation101_spill] sm:$0xff] %v7079_v23 }
 0x449   :  { %2590 = vst.msk [vmem:[#allocation2 + $0xf0] sm:$0xff] %vm2559_vm0, %v7071_v0  ;;  %2923 = vrot.lane.b32.xlu2 %v2855_v2, %s4488_s6 }
 0x44a   :  { %8899 = vst [vmem:[#allocation146_spill] sm:$0xff] %v7085_v59  ;;  %v2760_v52 = vpop.permute.xlu1 %2759 }
 0x44b   :  { %2522 = vst.msk [vmem:[#allocation2 + $0xe0] sm:$0xff] %vm2493_vm3, %v2454_v32  ;;  %v2860_v32 = vmul.f32 %v2774_v25, %v6792_v22  ;;  %v2853_v48 = vmul.f32 %v2760_v52, %v6611_v39 }
 0x44c   :  { %2555 = vst.msk [vmem:[#allocation2 + $0xe0] sm:$0xff] %vm2526_vm14, %v7079_v23 }
 0x44d   :  { %8901 = vst [vmem:[#allocation158_spill] sm:$0xff] %v7092_v20  ;;  %2933 = vrot.lane.b32.xlu1 %v2860_v32, %s4488_s6  ;;  %2919 = vrot.lane.b32.xlu0 %v2853_v48, %s4488_s6 }
 0x44e   :  { %2588 = vst.msk [vmem:[#allocation2 + $0xe0] sm:$0xff] %vm2559_vm0, %v7085_v59  ;;  %v2770_v25 = vpop.permute.xlu0 %2769 }
 0x44f   :  { %8902 = vst [vmem:[#allocation129_spill] sm:$0xff] %v7099_v34  ;;  %v2780_v43 = vpop.permute.xlu2 %2779  ;;  %v2858_v14 = vmul.f32 %v2770_v25, %v6809_v47 }
 0x450   :  { %2525 = vst.msk [vmem:[#allocation2 + $0xf8] sm:$0xff] %vm2493_vm3, %v2460_v62  ;;  %v2863_v62 = vmul.f32 %v2780_v43, %v6840_v63 }
 0x451   :  { %2558 = vst.msk [vmem:[#allocation2 + $0xf8] sm:$0xff] %vm2526_vm14, %v7092_v20  ;;  %2929 = vrot.lane.b32.xlu2 %v2858_v14, %s4488_s6 }
 0x452   :  { %2591 = vst.msk [vmem:[#allocation2 + $0xf8] sm:$0xff] %vm2559_vm0, %v7099_v34  ;;  %v2766_v20 = vpop.permute.xlu1 %2765 }
 0x453   :  { %v2856_v23 = vmul.f32 %v2766_v20, %v6637_v28 }
 0x455   :  { %2939 = vrot.lane.b32.xlu1 %v2863_v62, %s4488_s6  ;;  %2925 = vrot.lane.b32.xlu0 %v2856_v23, %s4488_s6 }
 0x456   :  { %v2776_v2 = vpop.permute.xlu0 %2775 }
 0x457   :  { %v2786_v32 = vpop.permute.xlu2 %2785  ;;  %v2861_v52 = vmul.f32 %v2776_v2, %v6859_v7 }
 0x458   :  { %v2866_v13 = vmul.f32 %v2786_v32, %v6889_v9 }
 0x459   :  { %2935 = vrot.lane.b32.xlu2 %v2861_v52, %s4488_s6 }
 0x45a   :  { %v2772_v43 = vpop.permute.xlu1 %2771 }
 0x45b   :  { %v2859_v62 = vmul.f32 %v2772_v43, %v6674_v45 }
 0x45d   :  { %2945 = vrot.lane.b32.xlu1 %v2866_v13, %s4488_s6  ;;  %2931 = vrot.lane.b32.xlu0 %v2859_v62, %s4488_s6 }
 0x45e   :  { %v2782_v20 = vpop.permute.xlu0 %2781 }
 0x45f   :  { %v2792_v48 = vpop.permute.xlu2 %2791  ;;  %v2864_v23 = vmul.f32 %v2782_v20, %v6906_v40 }
 0x460   :  { %v2869_v25 = vmul.f32 %v2792_v48, %v6934_v44 }
 0x461   :  { %2941 = vrot.lane.b32.xlu2 %v2864_v23, %s4488_s6 }
 0x462   :  { %v2778_v14 = vpop.permute.xlu1 %2777 }
 0x463   :  { %v2862_v13 = vmul.f32 %v2778_v14, %v6729_v21 }
 0x465   :  { %2951 = vrot.lane.b32.xlu1 %v2869_v25, %s4488_s6  ;;  %2937 = vrot.lane.b32.xlu0 %v2862_v13, %s4488_s6 }
 0x466   :  { %v2788_v52 = vpop.permute.xlu0 %2787 }
 0x467   :  { %v2798_v32 = vpop.permute.xlu2 %2797  ;;  %v2867_v43 = vmul.f32 %v2788_v52, %v6949_v24 }
 0x468   :  { %v2872_v2 = vmul.f32 %v2798_v32, %v6975_v37 }
 0x469   :  { %2947 = vrot.lane.b32.xlu2 %v2867_v43, %s4488_s6 }
 0x46a   :  { %v2784_v48 = vpop.permute.xlu1 %2783 }
 0x46b   :  { %v2865_v25 = vmul.f32 %v2784_v48, %v6779_v30 }
 0x46d   :  { %2957 = vrot.lane.b32.xlu1 %v2872_v2, %s4488_s6  ;;  %2943 = vrot.lane.b32.xlu0 %v2865_v25, %s4488_s6 }
 0x46e   :  { %v2794_v23 = vpop.permute.xlu0 %2793 }
 0x46f   :  { %v2804_v62 = vpop.permute.xlu2 %2803  ;;  %v2870_v14 = vmul.f32 %v2794_v23, %v6988_v42 }
 0x470   :  { %v2875_v20 = vmul.f32 %v2804_v62, %v7016_v35 }
 0x471   :  { %2953 = vrot.lane.b32.xlu2 %v2870_v14, %s4488_s6 }
 0x472   :  { %v2790_v32 = vpop.permute.xlu1 %2789 }
 0x473   :  { %v2868_v2 = vmul.f32 %v2790_v32, %v6827_v49 }
 0x475   :  { %2963 = vrot.lane.b32.xlu1 %v2875_v20, %s4488_s6  ;;  %2949 = vrot.lane.b32.xlu0 %v2868_v2, %s4488_s6 }
 0x476   :  { %v2800_v43 = vpop.permute.xlu0 %2799 }
 0x477   :  { %v2810_v13 = vpop.permute.xlu2 %2809  ;;  %v2873_v48 = vmul.f32 %v2800_v43, %v7030_v10 }
 0x478   :  { %v2878_v52 = vmul.f32 %v2810_v13, %v7044_v54 }
 0x479   :  { %2959 = vrot.lane.b32.xlu2 %v2873_v48, %s4488_s6 }
 0x47a   :  { %v2796_v62 = vpop.permute.xlu1 %2795 }
 0x47b   :  { %v2871_v20 = vmul.f32 %v2796_v62, %v6874_v15 }
 0x47d   :  { %2969 = vrot.lane.b32.xlu1 %v2878_v52, %s4488_s6  ;;  %2955 = vrot.lane.b32.xlu0 %v2871_v20, %s4488_s6  ;;  %v3045_v52 = vmax.f32 %v6611_v39, 1.0  ;;  %v3048_v20 = vmax.f32 %v6637_v28, 1.0 }
 0x47e   :  { %v2806_v14 = vpop.permute.xlu0 %2805 }
 0x47f   :  { %v2816_v25 = vpop.permute.xlu2 %2815  ;;  %v2876_v32 = vmul.f32 %v2806_v14, %v7057_v6  ;;  %v3043_v14 = vmax.f32 %v6709_v27, 1.0 }
 0x480   :  { %v2881_v23 = vmul.f32 %v2816_v25, %v7071_v0 }
 0x481   :  { %2965 = vrot.lane.b32.xlu2 %v2876_v32, %s4488_s6 }
 0x482   :  { %v2802_v13 = vpop.permute.xlu1 %2801 }
 0x483   :  { %v2874_v2 = vmul.f32 %v2802_v13, %v6919_v26  ;;  %v3051_v13 = vmax.f32 %v6674_v45, 1.0 }
 0x485   :  { %2975 = vrot.lane.b32.xlu1 %v2881_v23, %s4488_s6  ;;  %2961 = vrot.lane.b32.xlu0 %v2874_v2, %s4488_s6  ;;  %v3046_v2 = vmax.f32 %v6696_v29, 1.0 }
 0x486   :  { %v2812_v43 = vpop.permute.xlu0 %2811 }
 0x487   :  { %v2879_v48 = vmul.f32 %v2812_v43, %v7085_v59  ;;  %v3054_v43 = vmax.f32 %v6729_v21, 1.0  ;;  %v3056_v21 = vmax.f32 %v6906_v40, 1.0  ;;  %v3069_v40 = vmax.f32 %v6962_v50, 1.0 }
 0x489   :  { %2971 = vrot.lane.b32.xlu2 %v2879_v48, %s4488_s6 }
 0x48a   :  { %v2808_v62 = vpop.permute.xlu1 %2807 }
 0x48b   :  { %v2877_v25 = vmul.f32 %v2808_v62, %v6962_v50  ;;  %v3067_v50 = vmax.f32 %v7016_v35, 1.0 }
 0x48d   :  { %3111 = vrot.lane.b32.xlu1 %v3045_v52, %s4488_s6  ;;  %2967 = vrot.lane.b32.xlu0 %v2877_v25, %s4488_s6  ;;  %v3044_v52 = vmax.f32 %v6659_v16, 1.0  ;;  %v3049_v25 = vmax.f32 %v6744_v60, 1.0 }
 0x491   :  { %3107 = vrot.lane.b32.xlu2 %v3043_v14, %s4488_s6 }
 0x492   :  { %v2814_v23 = vpop.permute.xlu1 %2813 }
 0x493   :  { %v2880_v32 = vmul.f32 %v2814_v23, %v7003_v12  ;;  %v3057_v23 = vmax.f32 %v6779_v30, 1.0  ;;  %v3063_v30 = vmax.f32 %v6874_v15, 1.0  ;;  %v3061_v15 = vmax.f32 %v6934_v44, 1.0 }
 0x494   :  { %v3062_v44 = vmax.f32 %v6988_v42, 1.0  ;;  %v3068_v42 = vmax.f32 %v7057_v6, 1.0 }
 0x495   :  { %3117 = vrot.lane.b32.xlu1 %v3048_v20, %s4488_s6  ;;  %2973 = vrot.lane.b32.xlu0 %v2880_v32, %s4488_s6  ;;  %v3047_v20 = vmax.f32 %v6759_v5, 1.0 }
 0x499   :  { %3113 = vrot.lane.b32.xlu2 %v3046_v2, %s4488_s6  ;;  %v3050_v2 = vmax.f32 %v6809_v47, 1.0  ;;  %v3071_v47 = vmax.f32 %v7085_v59, 1.0 }
 0x49a   :  { %v7177_v62 = vpop.permute.xlu1 %2915 }
 0x49b   :  { %v7175_v48 = vpop.permute.xlu2 %2917 }
 0x49d   :  { %3123 = vrot.lane.b32.xlu1 %v3051_v13, %s4488_s6  ;;  %3109 = vrot.lane.b32.xlu0 %v3044_v52, %s4488_s6  ;;  %v3052_v13 = vmax.f32 %v6792_v22, 1.0  ;;  %v3060_v52 = vmax.f32 %v6827_v49, 1.0  ;;  %v3058_v49 = vmax.f32 %v6889_v9, 1.0  ;;  %v3059_v22 = vmax.f32 %v6949_v24, 1.0 }
 0x49e   :  { %v3072_v24 = vmax.f32 %v7003_v12, 1.0 }
 0x4a1   :  { %3119 = vrot.lane.b32.xlu2 %v3049_v25, %s4488_s6 }
 0x4a2   :  { %v7187_v32 = vpop.permute.xlu1 %2921 }
 0x4a3   :  { %v7185_v14 = vpop.permute.xlu2 %2923 }
 0x4a5   :  { %3129 = vrot.lane.b32.xlu1 %v3054_v43, %s4488_s6  ;;  %3115 = vrot.lane.b32.xlu0 %v3047_v20, %s4488_s6  ;;  %v3055_v20 = vmax.f32 %v6840_v63, 1.0 }
 0x4a9   :  { %3125 = vrot.lane.b32.xlu2 %v3052_v13, %s4488_s6 }
 0x4ab   :  { %v7195_v43 = vpop.permute.xlu2 %2929 }
 0x4ad   :  { %3135 = vrot.lane.b32.xlu1 %v3057_v23, %s4488_s6  ;;  %3121 = vrot.lane.b32.xlu0 %v3050_v2, %s4488_s6  ;;  %v3053_v23 = vmax.f32 %v6859_v7, 1.0  ;;  %v7207_v2 = vpop.permute.xlu0 %2817  ;;  %v3066_v7 = vmax.f32 %v6919_v26, 1.0  ;;  %v3064_v26 = vmax.f32 %v6975_v37, 1.0  ;;  %v3065_v37 = vmax.f32 %v7030_v10, 1.0 }
 0x4b0   :  { %v7197_v25 = vpop.permute.xlu1 %2927 }
 0x4b1   :  { %3131 = vrot.lane.b32.xlu2 %v3055_v20, %s4488_s6 }
 0x4b3   :  { %v7205_v13 = vpop.permute.xlu2 %2935 }
 0x4b5   :  { %3141 = vrot.lane.b32.xlu1 %v3060_v52, %s4488_s6  ;;  %3127 = vrot.lane.b32.xlu0 %v3053_v23, %s4488_s6 }
 0x4b9   :  { %3137 = vrot.lane.b32.xlu2 %v3058_v49, %s4488_s6 }
 0x4bb   :  { %v7217_v20 = vpop.permute.xlu2 %2941 }
 0x4bd   :  { %3147 = vrot.lane.b32.xlu1 %v3063_v30, %s4488_s6  ;;  %3133 = vrot.lane.b32.xlu0 %v3056_v21, %s4488_s6 }
 0x4bf   :  { %v7209_v52 = vpop.permute.xlu1 %2933  ;;  %v7219_v30 = vpop.permute.xlu0 %2919 }
 0x4c1   :  { %3143 = vrot.lane.b32.xlu2 %v3061_v15, %s4488_s6 }
 0x4c3   :  { %v7229_v21 = vpop.permute.xlu2 %2947 }
 0x4c5   :  { %3153 = vrot.lane.b32.xlu1 %v3066_v7, %s4488_s6  ;;  %3139 = vrot.lane.b32.xlu0 %v3059_v22, %s4488_s6 }
 0x4c7   :  { %v7221_v23 = vpop.permute.xlu1 %2939  ;;  %v7231_v49 = vpop.permute.xlu0 %2925 }
 0x4c9   :  { %3149 = vrot.lane.b32.xlu2 %v3064_v26, %s4488_s6 }
 0x4cb   :  { %v7241_v22 = vpop.permute.xlu2 %2953 }
 0x4cd   :  { %3159 = vrot.lane.b32.xlu1 %v3069_v40, %s4488_s6  ;;  %3145 = vrot.lane.b32.xlu0 %v3062_v44, %s4488_s6 }
 0x4cf   :  { %v7233_v7 = vpop.permute.xlu1 %2945  ;;  %v7243_v15 = vpop.permute.xlu0 %2931 }
 0x4d1   :  { %3155 = vrot.lane.b32.xlu2 %v3067_v50, %s4488_s6 }
 0x4d3   :  { %v7251_v12 = vpop.permute.xlu2 %2959 }
 0x4d4   :  { %8904 = vst [vmem:[#allocation155_spill] sm:$0xff] %v7251_v12 }
 0x4d5   :  { %3165 = vrot.lane.b32.xlu1 %v3072_v24, %s4488_s6  ;;  %3151 = vrot.lane.b32.xlu0 %v3065_v37, %s4488_s6  ;;  %v3070_v24 = vmax.f32 %v7044_v54, 1.0  ;;  %v3073_v37 = vmax.f32 %v7071_v0, 1.0 }
 0x4d7   :  { %v7245_v40 = vpop.permute.xlu1 %2951  ;;  %v7253_v26 = vpop.permute.xlu0 %2937 }
 0x4d8   :  { %8903 = vst [vmem:[#allocation122_spill] sm:$0xff] %v7245_v40 }
 0x4d9   :  { %3161 = vrot.lane.b32.xlu2 %v3070_v24, %s4488_s6 }
 0x4db   :  { %v7261_v35 = vpop.permute.xlu2 %2965 }
 0x4dc   :  { %8906 = vst [vmem:[#allocation145_spill] sm:$0xff] %v7261_v35 }
 0x4dd   :  { %3157 = vrot.lane.b32.xlu0 %v3068_v42, %s4488_s6  ;;  %v3074_v42 = vmax.f32 %v7099_v34, 1.0 }
 0x4df   :  { %v7255_v44 = vpop.permute.xlu1 %2957  ;;  %v7263_v10 = vpop.permute.xlu0 %2943 }
 0x4e0   :  { %8905 = vst [vmem:[#allocation166_spill] sm:$0xff] %v7255_v44 }
 0x4e1   :  { %3167 = vrot.lane.b32.xlu2 %v3073_v37, %s4488_s6 }
 0x4e3   :  { %v7271_v54 = vpop.permute.xlu2 %2971 }
 0x4e4   :  { %8908 = vst [vmem:[#allocation162_spill] sm:$0xff] %v7271_v54 }
 0x4e5   :  { %3163 = vrot.lane.b32.xlu0 %v3071_v47, %s4488_s6 }
 0x4e7   :  { %v7265_v50 = vpop.permute.xlu1 %2963  ;;  %v7273_v6 = vpop.permute.xlu0 %2949 }
 0x4e8   :  { %8907 = vst [vmem:[#allocation147_spill] sm:$0xff] %v7265_v50 }
 0x4e9   :  { %3169 = vrot.lane.b32.xlu2 %v3074_v42, %s4488_s6 }
 0x4eb   :  { %v3108_v9 = vpop.permute.xlu2 %3107 }
 0x4ec   :  { %4366 = vrcp.f32 %v3108_v9  ;;  %vm3208_vm7 = vweird.f32 %v3108_v9  ;;  %v3212_v42 = vand.u32 2147483647, %v3108_v9 }
 0x4ee   :  { %vm3213_vm6 = vcmp.eq.f32.partialorder %v3212_v42, 8.507059e+37 }
 0x4ef   :  { %v7275_v24 = vpop.permute.xlu1 %2969  ;;  %v7279_v60 = vpop.permute.xlu0 %2955 }
 0x4f0   :  { %8909 = vst [vmem:[#allocation49_spill] sm:$0xff] %v7275_v24  ;;  %v3214_v24 = vand.u32 2147483648, %v3108_v9 }
 0x4f1   :  { %8910 = vst [vmem:[#allocation167_spill] sm:$0xff] %v7279_v60 }
 0x4f2   :  { %v4367_v59 = vpop.eup %4366  ;;  %v3215_v36 = vor.u32 1.1754944e-38, %v3214_v24 }
 0x4f3   :  { %v3204_v37 = vmul.f32 %v4367_v59, %v3108_v9  ;;  %vm3209_vm2 = vweird.f32 %v4367_v59 }
 0x4f4   :  { %vm3210_vm8 = vmor %vm3208_vm7, %vm3209_vm2 }
 0x4f5   :  { %v3205_v5 = vsub.f32 1.0, %v3204_v37  ;;  %v3011_v37 = vsub.f32 %v6703_v46, %v7177_v62 }
 0x4f7   :  { %v7281_v0 = vpop.permute.xlu1 %2975  ;;  %v7283_v63 = vpop.permute.xlu0 %2961  ;;  %v3206_v50 = vmul.f32 %v4367_v59, %v3205_v5 }
 0x4f8   :  { %8911 = vst [vmem:[#allocation156_spill] sm:$0xff] %v7281_v0 }
 0x4f9   :  { %8912 = vst [vmem:[#allocation165_spill] sm:$0xff] %v7283_v63  ;;  %v3207_v29 = vadd.f32 %v4367_v59, %v3206_v50 }
 0x4fb   :  { %v3211_v0 = vsel %vm3210_vm8, %v4367_v59, %v3207_v29 }
 0x4fc   :  { %v3216_v50 = vsel %vm3213_vm6, %v3215_v36, %v3211_v0 }
 0x4fd   :  { %v3217_v39 = vmul.f32 %v3216_v50, %v3011_v37 }
 0x4ff   :  { %v3112_v47 = vpop.permute.xlu1 %3111  ;;  %v7285_v54 = vpop.permute.xlu0 %2967  ;;  %3715 = vrot.lane.b32.xlu0 %v3217_v39, %s4489_s3  ;;  %v3013_v39 = vsub.f32 %v6607_v1, %v7219_v30 }
 0x500   :  { %4368 = vrcp.f32 %v3112_v47  ;;  %8913 = vst [vmem:[#allocation154_spill] sm:$0xff] %v7285_v54  ;;  %v3244_v63 = vand.u32 2147483648, %v3112_v47  ;;  %v3242_v29 = vand.u32 2147483647, %v3112_v47  ;;  %vm3238_vm13 = vweird.f32 %v3112_v47 }
 0x502   :  { %vm3243_vm5 = vcmp.eq.f32.partialorder %v3242_v29, 8.507059e+37 }
 0x506   :  { %v4369_v45 = vpop.eup %4368 }
 0x507   :  { %v3234_v16 = vmul.f32 %v4369_v45, %v3112_v47  ;;  %v3118_v28 = vpop.permute.xlu1 %3117  ;;  %vm3239_vm4 = vweird.f32 %v4369_v45  ;;  %v7290_v44 = vpop.permute.xlu0 %2973 }
 0x508   :  { %4370 = vrcp.f32 %v3118_v28  ;;  %8914 = vst [vmem:[#allocation55_spill] sm:$0xff] %v7290_v44  ;;  %vm3240_vm9 = vmor %vm3238_vm13, %vm3239_vm4  ;;  %v3287_v37 = vand.u32 2147483647, %v3118_v28  ;;  %vm3283_vm10 = vweird.f32 %v3118_v28 }
 0x509   :  { %v3235_v35 = vsub.f32 1.0, %v3234_v16  ;;  %v7292_v16 = vpop.permute.xlu2 %3113 }
 0x50a   :  { %vm3288_vm11 = vcmp.eq.f32.partialorder %v3287_v37, 8.507059e+37 }
 0x50b   :  { %v3236_v5 = vmul.f32 %v4369_v45, %v3235_v35  ;;  %v3245_v35 = vor.u32 1.1754944e-38, %v3244_v63 }
 0x50d   :  { %v3237_v9 = vadd.f32 %v4369_v45, %v3236_v5  ;;  %v3289_v5 = vand.u32 2147483648, %v3118_v28 }
 0x50e   :  { %v4371_v27 = vpop.eup %4370 }
 0x50f   :  { %v3124_v54 = vpop.permute.xlu1 %3123  ;;  %v3279_v59 = vmul.f32 %v4371_v27, %v3118_v28  ;;  %v3241_v36 = vsel %vm3240_vm9, %v4369_v45, %v3237_v9  ;;  %v7296_v50 = vpop.permute.xlu0 %3109  ;;  %vm3284_vm15 = vweird.f32 %v4371_v27  ;;  %v3290_v1 = vor.u32 1.1754944e-38, %v3289_v5 }
 0x510   :  { %4372 = vrcp.f32 %v3124_v54  ;;  %v3246_v62 = vsel %vm3243_vm5, %v3245_v35, %v3241_v36  ;;  %vm3285_vm12 = vmor %vm3283_vm10, %vm3284_vm15  ;;  %v3016_v9 = vsub.f32 %v6633_v3, %v7231_v49  ;;  %vm3328_vm14 = vweird.f32 %v3124_v54 }
 0x511   :  { %v3280_v46 = vsub.f32 1.0, %v3279_v59  ;;  %v3247_v24 = vmul.f32 %v3246_v62, %v3013_v39  ;;  %4374 = vrcp.f32 %v7296_v50  ;;  %v7301_v63 = vpop.permute.xlu2 %3119  ;;  %vm3223_vm8 = vweird.f32 %v7296_v50 }
 0x512   :  { %4376 = vrcp.f32 %v7292_v16  ;;  %vm3253_vm9 = vweird.f32 %v7292_v16 }
 0x513   :  { %v3281_v0 = vmul.f32 %v4371_v27, %v3280_v46  ;;  %3719 = vrot.lane.b32.xlu0 %v3247_v24, %s4489_s3 }
 0x515   :  { %v3282_v47 = vadd.f32 %v4371_v27, %v3281_v0  ;;  %v3332_v0 = vand.u32 2147483647, %v3124_v54 }
 0x516   :  { %v4373_v42 = vpop.eup %4372 }
 0x517   :  { %v3324_v44 = vmul.f32 %v4373_v42, %v3124_v54  ;;  %v3286_v30 = vsel %vm3285_vm12, %v4371_v27, %v3282_v47  ;;  %v4375_v59 = vpop.eup %4374  ;;  %v7306_v39 = vpop.permute.xlu0 %3115  ;;  %vm3329_vm3 = vweird.f32 %v4373_v42  ;;  %v3334_v27 = vand.u32 2147483648, %v3124_v54 }
 0x518   :  { %v3291_v29 = vsel %vm3288_vm11, %v3290_v1, %v3286_v30  ;;  %v3219_v35 = vmul.f32 %v4375_v59, %v7296_v50  ;;  %4378 = vrcp.f32 %v7306_v39  ;;  %v7309_v28 = vpop.eup %4376  ;;  %vm3330_vm0 = vmor %vm3328_vm14, %vm3329_vm3  ;;  %v3019_v47 = vsub.f32 %v6668_v11, %v7243_v15 }
 0x519   :  { %v3325_v45 = vsub.f32 1.0, %v3324_v44  ;;  %v3292_v36 = vmul.f32 %v3291_v29, %v3016_v9  ;;  %v3249_v3 = vmul.f32 %v7309_v28, %v7292_v16  ;;  %4380 = vrcp.f32 %v7301_v63  ;;  %v7317_v24 = vpop.permute.xlu2 %3125 }
 0x51a   :  { %v3220_v62 = vsub.f32 1.0, %v3219_v35  ;;  %v3335_v37 = vor.u32 1.1754944e-38, %v3334_v27  ;;  %vm3333_vm2 = vcmp.eq.f32.partialorder %v3332_v0, 8.507059e+37  ;;  %vm3224_vm7 = vweird.f32 %v4375_v59 }
 0x51b   :  { %v3326_v46 = vmul.f32 %v4373_v42, %v3325_v45  ;;  %3725 = vrot.lane.b32.xlu0 %v3292_v36, %s4489_s3  ;;  %v3250_v30 = vsub.f32 1.0, %v3249_v3  ;;  %v7328_v36 = vpop.permute.xlu1 %3129  ;;  %v3012_v0 = vsub.f32 %v6654_v8, %v7175_v48  ;;  %v3014_v3 = vsub.f32 %v6692_v38, %v7187_v32  ;;  %vm3225_vm6 = vmor %vm3223_vm8, %vm3224_vm7 }
 0x51c   :  { %v3221_v45 = vmul.f32 %v4375_v59, %v3220_v62  ;;  %vm3254_vm13 = vweird.f32 %v7309_v28  ;;  %vm3268_vm12 = vweird.f32 %v7306_v39 }
 0x51d   :  { %v3327_v44 = vadd.f32 %v4373_v42, %v3326_v46  ;;  %v3229_v46 = vand.u32 2147483648, %v7296_v50  ;;  %v3251_v15 = vmul.f32 %v7309_v28, %v3250_v30  ;;  %v3259_v30 = vand.u32 2147483648, %v7292_v16  ;;  %vm7375_vm5 = vmor %vm3253_vm9, %vm3254_vm13 }
 0x51e   :  { %v7314_v49 = vpop.eup %4378  ;;  %v3222_v35 = vadd.f32 %v4375_v59, %v3221_v45 }
 0x51f   :  { %v3331_v5 = vsel %vm3330_vm0, %v4373_v42, %v3327_v44  ;;  %v7321_v1 = vpop.permute.xlu0 %3121  ;;  %v3264_v54 = vmul.f32 %v7314_v49, %v7306_v39  ;;  %v3227_v42 = vand.u32 2147483647, %v7296_v50  ;;  %v7331_v11 = vpop.eup %4380  ;;  %v7336_v44 = vmul.f32 %v7207_v2, %v7099_v34 }
 0x520   :  { %v3336_v9 = vsel %vm3333_vm2, %v3335_v37, %v3331_v5  ;;  %4382 = vrcp.f32 %v7321_v1  ;;  %v3230_v37 = vor.u32 1.1754944e-38, %v3229_v46  ;;  %v3294_v50 = vmul.f32 %v7331_v11, %v7301_v63 }
 0x521   :  { %v3337_v29 = vmul.f32 %v3336_v9, %v3019_v47  ;;  %v3265_v27 = vsub.f32 1.0, %v3264_v54  ;;  %vm3228_vm4 = vcmp.eq.f32.partialorder %v3227_v42, 8.507059e+37  ;;  %v3226_v47 = vsel %vm3225_vm6, %v4375_v59, %v3222_v35  ;;  %v7356_v38 = vpop.permute.xlu2 %3131 }
 0x522   :  { %v3252_v8 = vadd.f32 %v7309_v28, %v3251_v15  ;;  %4384 = vrcp.f32 %v7317_v24  ;;  %v3231_v48 = vsel %vm3228_vm4, %v3230_v37, %v3226_v47  ;;  %v3257_v9 = vand.u32 2147483647, %v7292_v16 }
 0x523   :  { %3731 = vrot.lane.b32.xlu0 %v3337_v29, %s4489_s3  ;;  %v3266_v59 = vmul.f32 %v7314_v49, %v3265_v27  ;;  %v3232_v29 = vmul.f32 %v3231_v48, %v3012_v0  ;;  %v3295_v16 = vsub.f32 1.0, %v3294_v50  ;;  %v3260_v47 = vor.u32 1.1754944e-38, %v3259_v30  ;;  %v7391_v42 = vpop.permute.xlu1 %3135 }
 0x524   :  { %v3256_v37 = vsel %vm7375_vm5, %v7309_v28, %v3252_v8  ;;  %vm3269_vm15 = vweird.f32 %v7314_v49  ;;  %v3274_v50 = vand.u32 2147483648, %v7306_v39  ;;  %vm3258_vm10 = vcmp.eq.f32.partialorder %v3257_v9, 8.507059e+37 }
 0x525   :  { %3717 = vrot.lane.b32.xlu1 %v3232_v29, %s4489_s3  ;;  %v3267_v48 = vadd.f32 %v7314_v49, %v3266_v59  ;;  %v3272_v29 = vand.u32 2147483647, %v7306_v39  ;;  %v3296_v8 = vmul.f32 %v7331_v11, %v3295_v16  ;;  %v3261_v30 = vsel %vm3258_vm10, %v3260_v47, %v3256_v37  ;;  %vm3270_vm11 = vmor %vm3268_vm12, %vm3269_vm15 }
 0x526   :  { %v7345_v5 = vpop.eup %4382  ;;  %v3302_v28 = vand.u32 2147483647, %v7301_v63  ;;  %v3275_v16 = vor.u32 1.1754944e-38, %v3274_v50  ;;  %vm3299_vm3 = vweird.f32 %v7331_v11  ;;  %v3262_v46 = vmul.f32 %v3261_v30, %v3014_v3 }
 0x527   :  { %v7351_v45 = vpop.permute.xlu0 %3127  ;;  %v3309_v54 = vmul.f32 %v7345_v5, %v7321_v1  ;;  %v3271_v37 = vsel %vm3270_vm11, %v7314_v49, %v3267_v48  ;;  %vm3273_vm14 = vcmp.eq.f32.partialorder %v3272_v29, 8.507059e+37  ;;  %v3297_v2 = vadd.f32 %v7331_v11, %v3296_v8 }
 0x528   :  { %4386 = vrcp.f32 %v7351_v45  ;;  %v7393_v27 = vpop.eup %4384  ;;  %v3276_v62 = vsel %vm3273_vm14, %v3275_v16, %v3271_v37  ;;  %vm3298_vm0 = vweird.f32 %v7301_v63  ;;  %v3304_v49 = vand.u32 2147483648, %v7301_v63 }
 0x529   :  { %4388 = vrcp.f32 %v7356_v38  ;;  %v3310_v35 = vsub.f32 1.0, %v3309_v54  ;;  %v8917_v54 = vld [vmem:[#allocation32_spill] sm:$0xff]  ;;  %v3339_v39 = vmul.f32 %v7393_v27, %v7317_v24  ;;  %v7422_v9 = vpop.permute.xlu2 %3137  ;;  %v3349_v48 = vand.u32 2147483648, %v7317_v24  ;;  %vm7445_vm7 = vmor %vm3298_vm0, %vm3299_vm3 }
 0x52a   :  { %4390 = vrcp.f32 %v7328_v36  ;;  %v8918_v50 = vsub.f32 %v6751_v58, %v7185_v14  ;;  %vm7436_vm2 = vcmp.eq.f32.partialorder %v3302_v28, 8.507059e+37  ;;  %vm3314_vm8 = vweird.f32 %v7345_v5 }
 0x52b   :  { %v3311_v0 = vmul.f32 %v7345_v5, %v3310_v35  ;;  %v3340_v35 = vsub.f32 1.0, %v3339_v39  ;;  %v3319_v14 = vand.u32 2147483648, %v7321_v1  ;;  %v3317_v28 = vand.u32 2147483647, %v7321_v1  ;;  %v7458_v30 = vpop.permute.xlu1 %3141 }
 0x52c   :  { %v3277_v29 = vmul.f32 %v3276_v62, %v8918_v50  ;;  %v3301_v16 = vsel %vm7445_vm7, %v7331_v11, %v3297_v2  ;;  %vm3343_vm6 = vweird.f32 %v7317_v24  ;;  %v7464_v37 = vor.u32 1.1754944e-38, %v3349_v48 }
 0x52d   :  { %3721 = vrot.lane.b32.xlu1 %v3262_v46, %s4489_s3  ;;  %v3312_v58 = vadd.f32 %v7345_v5, %v3311_v0  ;;  %v3347_v46 = vand.u32 2147483647, %v7317_v24  ;;  %v3305_v0 = vor.u32 1.1754944e-38, %v3304_v49  ;;  %vm3313_vm4 = vweird.f32 %v7321_v1 }
 0x52e   :  { %v7404_v15 = vpop.eup %4386  ;;  %3723 = vrot.lane.b32.xlu2 %v3277_v29, %s4489_s3  ;;  %v3341_v34 = vmul.f32 %v7393_v27, %v3340_v35  ;;  %vm3344_vm13 = vweird.f32 %v7393_v27  ;;  %v3394_v60 = vand.u32 2147483648, %v7356_v38  ;;  %vm7476_vm9 = vmor %vm3313_vm4, %vm3314_vm8  ;;  %v3320_v2 = vor.u32 1.1754944e-38, %v3319_v14 }
 0x52f   :  { %v7402_v59 = vpop.permute.xlu0 %3133  ;;  %v7419_v47 = vpop.eup %4388  ;;  %v3354_v32 = vmul.f32 %v7404_v15, %v7351_v45  ;;  %v3316_v49 = vsel %vm7476_vm9, %v7345_v5, %v3312_v58  ;;  %v3306_v48 = vsel %vm7436_vm2, %v3305_v0, %v3301_v16  ;;  %vm7489_vm5 = vcmp.eq.f32.partialorder %v3347_v46, 8.507059e+37  ;;  %vm7534_vm12 = vmor %vm3343_vm6, %vm3344_vm13 }
 0x530   :  { %4392 = vrcp.f32 %v7402_v59  ;;  %v3384_v8 = vmul.f32 %v7419_v47, %v7356_v38  ;;  %v7454_v62 = vpop.eup %4390  ;;  %v3379_v63 = vand.u32 2147483648, %v7328_v36  ;;  %vm3318_vm15 = vcmp.eq.f32.partialorder %v3317_v28, 8.507059e+37 }
 0x531   :  { %4394 = vrcp.f32 %v7422_v9  ;;  %v3355_v39 = vsub.f32 1.0, %v3354_v32  ;;  %v3369_v1 = vmul.f32 %v7454_v62, %v7328_v36  ;;  %v7498_v11 = vpop.permute.xlu2 %3143  ;;  %v3321_v3 = vsel %vm3318_vm15, %v3320_v2, %v3316_v49 }
 0x532   :  { %4396 = vrcp.f32 %v7391_v42  ;;  %v3385_v32 = vsub.f32 1.0, %v3384_v8  ;;  %v8927_v58 = vsub.f32 %v6738_v41, %v7197_v25  ;;  %v3342_v28 = vadd.f32 %v7393_v27, %v3341_v34 }
 0x533   :  { %v3356_v18 = vmul.f32 %v7404_v15, %v3355_v39  ;;  %v3392_v39 = vand.u32 2147483647, %v7356_v38  ;;  %v7508_v16 = vor.u32 1.1754944e-38, %v3394_v60  ;;  %v8928_v0 = vsub.f32 %v6801_v33, %v7195_v43 }
 0x534   :  { %v3307_v46 = vmul.f32 %v3306_v48, %v8927_v58  ;;  %v3386_v17 = vmul.f32 %v7419_v47, %v3385_v32  ;;  %v3370_v40 = vsub.f32 1.0, %v3369_v1  ;;  %v3364_v49 = vand.u32 2147483648, %v7351_v45  ;;  %v7543_v48 = vpop.permute.xlu1 %3147 }
 0x535   :  { %v3322_v12 = vmul.f32 %v3321_v3, %v8928_v0  ;;  %v3357_v60 = vadd.f32 %v7404_v15, %v3356_v18  ;;  %vm3359_vm10 = vweird.f32 %v7404_v15  ;;  %v3362_v33 = vand.u32 2147483647, %v7351_v45 }
 0x536   :  { %v7469_v29 = vpop.eup %4392  ;;  %3727 = vrot.lane.b32.xlu1 %v3307_v46, %s4489_s3  ;;  %v3377_v34 = vand.u32 2147483647, %v7328_v36  ;;  %v7525_v43 = vor.u32 1.1754944e-38, %v3379_v63  ;;  %vm3373_vm11 = vweird.f32 %v7328_v36  ;;  %vm3374_vm3 = vweird.f32 %v7454_v62 }
 0x537   :  { %v7467_v50 = vpop.permute.xlu0 %3139  ;;  %v7487_v35 = vpop.eup %4394  ;;  %v3399_v5 = vmul.f32 %v7469_v29, %v7402_v59  ;;  %3729 = vrot.lane.b32.xlu2 %v3322_v12, %s4489_s3  ;;  %v3439_v1 = vand.u32 2147483648, %v7422_v9  ;;  %vm3358_vm14 = vweird.f32 %v7351_v45  ;;  %v7548_v24 = vadd.f32 %v7419_v47, %v3386_v17 }
 0x538   :  { %4398 = vrcp.f32 %v7467_v50  ;;  %v7496_v14 = vpop.eup %4396  ;;  %v3429_v2 = vmul.f32 %v7487_v35, %v7422_v9  ;;  %vm3360_vm0 = vmor %vm3358_vm14, %vm3359_vm10  ;;  %v3365_v58 = vor.u32 1.1754944e-38, %v3364_v49  ;;  %vm3363_vm2 = vcmp.eq.f32.partialorder %v3362_v33, 8.507059e+37 }
 0x539   :  { %4400 = vrcp.f32 %v7458_v30  ;;  %v3414_v41 = vmul.f32 %v7496_v14, %v7391_v42  ;;  %v3400_v25 = vsub.f32 1.0, %v3399_v5  ;;  %v3371_v5 = vmul.f32 %v7454_v62, %v3370_v40 }
 0x53a   :  { %4402 = vrcp.f32 %v7498_v11  ;;  %v3430_v3 = vsub.f32 1.0, %v3429_v2  ;;  %v3361_v0 = vsel %vm3360_vm0, %v7404_v15, %v3357_v60  ;;  %v3346_v45 = vsel %vm7534_vm12, %v7393_v27, %v3342_v28 }
 0x53b   :  { %v3415_v46 = vsub.f32 1.0, %v3414_v41  ;;  %vm3389_vm7 = vweird.f32 %v7419_v47  ;;  %v3401_v17 = vmul.f32 %v7469_v29, %v3400_v25  ;;  %v3366_v2 = vsel %vm3363_vm2, %v3365_v58, %v3361_v0 }
 0x53c   :  { %v3351_v49 = vsel %vm7489_vm5, %v7464_v37, %v3346_v45  ;;  %vm7566_vm8 = vcmp.eq.f32.partialorder %v3377_v34, 8.507059e+37  ;;  %v7570_v41 = vor.u32 1.1754944e-38, %v3439_v1  ;;  %v3424_v27 = vand.u32 2147483648, %v7391_v42  ;;  %v7580_v37 = vpop.permute.xlu2 %3149  ;;  %vm7616_vm5 = vmor %vm3373_vm11, %vm3374_vm3 }
 0x53d   :  { %4404 = vrcp.f32 %v7543_v48  ;;  %vm3388_vm6 = vweird.f32 %v7356_v38  ;;  %v3431_v8 = vmul.f32 %v7487_v35, %v3430_v3  ;;  %v8933_v33 = vsub.f32 %v6850_v57, %v7205_v13 }
 0x53e   :  { %v7528_v32 = vpop.eup %4398  ;;  %v8934_v25 = vsub.f32 %v6786_v55, %v7209_v52  ;;  %v3372_v1 = vadd.f32 %v7454_v62, %v3371_v5  ;;  %v3416_v58 = vmul.f32 %v7496_v14, %v3415_v46  ;;  %v3422_v0 = vand.u32 2147483647, %v7391_v42 }
 0x53f   :  { %v7545_v63 = vpop.eup %4400  ;;  %v7557_v12 = vpop.permute.xlu0 %3145  ;;  %v3444_v40 = vmul.f32 %v7528_v32, %v7467_v50  ;;  %v3367_v34 = vmul.f32 %v3366_v2, %v8933_v33  ;;  %v3409_v3 = vand.u32 2147483648, %v7402_v59  ;;  %2977 = vrot.lane.b32.xlu2 %v7336_v44, %s4488_s6  ;;  %v3402_v57 = vadd.f32 %v7469_v29, %v3401_v17  ;;  %s4491_s6 = smov 125  }
 0x540   :  { %v3459_v28 = vmul.f32 %v7545_v63, %v7458_v30  ;;  %v7576_v60 = vpop.eup %4402  ;;  %v3352_v18 = vmul.f32 %v3351_v49, %v8934_v25  ;;  %4406 = vrcp.f32 %v7557_v12  ;;  %vm3404_vm4 = vweird.f32 %v7469_v29 }
 0x541   :  { %v3407_v55 = vand.u32 2147483647, %v7402_v59  ;;  %v3445_v13 = vsub.f32 1.0, %v3444_v40  ;;  %3735 = vrot.lane.b32.xlu0 %v3367_v34, %s4489_s3  ;;  %vm7602_vm13 = vcmp.eq.f32.partialorder %v3392_v39, 8.507059e+37  ;;  %vm3418_vm9 = vweird.f32 %v7391_v42 }
 0x542   :  { %3733 = vrot.lane.b32.xlu1 %v3352_v18, %s4489_s3  ;;  %v7607_v44 = vor.u32 1.1754944e-38, %v3424_v27  ;;  %v3474_v5 = vmul.f32 %v7576_v60, %v7498_v11  ;;  %v3460_v46 = vsub.f32 1.0, %v3459_v28  ;;  %4408 = vrcp.f32 %v7580_v37  ;;  %v7636_v28 = vpop.permute.xlu1 %3153 }
 0x543   :  { %v7621_v39 = vadd.f32 %v7487_v35, %v3431_v8  ;;  %vm3434_vm15 = vweird.f32 %v7487_v35  ;;  %vm3419_vm10 = vweird.f32 %v7496_v14  ;;  %v3482_v17 = vand.u32 2147483647, %v7498_v11  ;;  %v7627_v40 = vpop.eup %4404 }
 0x544   :  { %vm3403_vm12 = vweird.f32 %v7402_v59  ;;  %v7630_v2 = vadd.f32 %v7496_v14, %v3416_v58  ;;  %v3467_v49 = vand.u32 2147483647, %v7458_v30  ;;  %v3410_v27 = vor.u32 1.1754944e-38, %v3409_v3 }
 0x545   :  { %vm3405_vm11 = vmor %vm3403_vm12, %vm3404_vm4  ;;  %vm3433_vm3 = vweird.f32 %v7422_v9  ;;  %vm7641_vm14 = vcmp.eq.f32.partialorder %v3422_v0, 8.507059e+37  ;;  %vm3408_vm0 = vcmp.eq.f32.partialorder %v3407_v55, 8.507059e+37  ;;  %v3446_v33 = vmul.f32 %v7528_v32, %v3445_v13 }
 0x546   :  { %v7638_v8 = vpop.eup %4406  ;;  %v3406_v34 = vsel %vm3405_vm11, %v7469_v29, %v3402_v57  ;;  %v3376_v25 = vsel %vm7616_vm5, %v7454_v62, %v3372_v1  ;;  %v3475_v18 = vsub.f32 1.0, %v3474_v5  ;;  %v3461_v58 = vmul.f32 %v7545_v63, %v3460_v46  ;;  %vm7671_vm4 = vmor %vm3388_vm6, %vm3389_vm7 }
 0x547   :  { %v3489_v3 = vmul.f32 %v7638_v8, %v7557_v12  ;;  %v3411_v36 = vsel %vm3408_vm0, %v3410_v27, %v3406_v34  ;;  %v7653_v0 = vpop.permute.xlu0 %3151  ;;  %vm3463_vm2 = vweird.f32 %v7458_v30  ;;  %v3504_v55 = vmul.f32 %v7627_v40, %v7543_v48  ;;  %vm7703_vm6 = vmor %vm3418_vm9, %vm3419_vm10 }
 0x548   :  { %4410 = vrcp.f32 %v7636_v28  ;;  %v8941_v29 = vsub.f32 %v6899_v31, %v7217_v20  ;;  %v3381_v1 = vsel %vm7566_vm8, %v7525_v43, %v3376_v25  ;;  %v7665_v57 = vpop.eup %4408  ;;  %v8944_v5 = vand.u32 2147483647, %v7422_v9  ;;  %v8965_v25 = vld [vmem:[#allocation122_spill] sm:$0xff] }
 0x549   :  { %v3452_v31 = vand.u32 2147483647, %v7467_v50  ;;  %v3454_v20 = vand.u32 2147483648, %v7467_v50  ;;  %v3490_v43 = vsub.f32 1.0, %v3489_v3  ;;  %v8947_v15 = vsub.f32 %v6720_v61, %v7253_v26 }
 0x54a   :  { %v3412_v62 = vmul.f32 %v3411_v36, %v8941_v29  ;;  %vm7677_vm5 = vcmp.eq.f32.partialorder %v8944_v5, 8.507059e+37  ;;  %v3447_v38 = vadd.f32 %v7528_v32, %v3446_v33  ;;  %vm3449_vm7 = vweird.f32 %v7528_v32 }
 0x54b   :  { %v3382_v45 = vmul.f32 %v3381_v1, %v8947_v15  ;;  %v3391_v36 = vsel %vm7671_vm4, %v7419_v47, %v7548_v24  ;;  %4412 = vrcp.f32 %v7653_v0  ;;  %v3476_v27 = vmul.f32 %v7576_v60, %v3475_v18 }
 0x54c   :  { %3741 = vrot.lane.b32.xlu0 %v3412_v62, %s4489_s3  ;;  %vm3464_vm8 = vweird.f32 %v7545_v63  ;;  %v3469_v61 = vand.u32 2147483648, %v7458_v30  ;;  %v3491_v26 = vmul.f32 %v7638_v8, %v3490_v43  ;;  %v3462_v47 = vadd.f32 %v7545_v63, %v3461_v58 }
 0x54d   :  { %3737 = vrot.lane.b32.xlu1 %v3382_v45, %s4489_s3  ;;  %v3519_v24 = vmul.f32 %v7665_v57, %v7580_v37  ;;  %vm3448_vm12 = vweird.f32 %v7467_v50  ;;  %v3396_v34 = vsel %vm7602_vm13, %v7508_v16, %v3391_v36  ;;  %vm3478_vm11 = vweird.f32 %v7498_v11  ;;  %vm7737_vm13 = vmor %vm3433_vm3, %vm3434_vm15 }
 0x54e   :  { %vm7715_vm0 = vcmp.eq.f32.partialorder %v3467_v49, 8.507059e+37  ;;  %v3505_v42 = vsub.f32 1.0, %v3504_v55  ;;  %vm3450_vm9 = vmor %vm3448_vm12, %vm3449_vm7  ;;  %vm3453_vm10 = vcmp.eq.f32.partialorder %v3452_v31, 8.507059e+37  ;;  %v3455_v18 = vor.u32 1.1754944e-38, %v3454_v20  ;;  %v7724_v3 = vpop.eup %4410 }
 0x54f   :  { %v8952_v58 = vsub.f32 %v6834_v4, %v7221_v23  ;;  %v3497_v16 = vand.u32 2147483647, %v7557_v12  ;;  %v3499_v52 = vand.u32 2147483648, %v7557_v12  ;;  %v3451_v49 = vsel %vm3450_vm9, %v7528_v32, %v3447_v38  ;;  %vm7760_vm15 = vmor %vm3463_vm2, %vm3464_vm8 }
 0x550   :  { %v3421_v55 = vsel %vm7703_vm6, %v7496_v14, %v7630_v2  ;;  %v3492_v23 = vadd.f32 %v7638_v8, %v3491_v26  ;;  %vm3494_vm4 = vweird.f32 %v7638_v8  ;;  %v3456_v32 = vsel %vm3453_vm10, %v3455_v18, %v3451_v49 }
 0x551   :  { %v3397_v50 = vmul.f32 %v3396_v34, %v8952_v58  ;;  %v3426_v29 = vsel %vm7641_vm14, %v7607_v44, %v3421_v55  ;;  %v4413_v14 = vpop.eup %4412  ;;  %vm3479_vm7 = vweird.f32 %v7576_v60  ;;  %v3520_v2 = vsub.f32 1.0, %v3519_v24 }
 0x552   :  { %v8955_v9 = vsub.f32 %v6943_v56, %v7229_v21  ;;  %v3436_v1 = vsel %vm7737_vm13, %v7487_v35, %v7621_v39  ;;  %v3477_v13 = vadd.f32 %v7576_v60, %v3476_v27  ;;  %vm3493_vm3 = vweird.f32 %v7557_v12 }
 0x553   :  { %3739 = vrot.lane.b32.xlu2 %v3397_v50, %s4489_s3  ;;  %v3534_v56 = vmul.f32 %v4413_v14, %v7653_v0  ;;  %v8958_v21 = vsub.f32 %v6771_v53, %v7263_v10  ;;  %v3506_v35 = vmul.f32 %v7627_v40, %v3505_v42  ;;  %v3549_v39 = vmul.f32 %v7724_v3, %v7636_v28  ;;  %vm3495_vm14 = vmor %vm3493_vm3, %vm3494_vm4  ;;  %v8966_v42 = vld [vmem:[#allocation70_spill] sm:$0xff]  ;;  %v8969_v50 = vld [vmem:[#allocation155_spill] sm:$0xff] }
 0x554   :  { %v3457_v62 = vmul.f32 %v3456_v32, %v8955_v9  ;;  %v3500_v30 = vor.u32 1.1754944e-38, %v3499_v52  ;;  %v3441_v12 = vsel %vm7677_vm5, %v7570_v41, %v3436_v1  ;;  %vm3498_vm2 = vcmp.eq.f32.partialorder %v3497_v16, 8.507059e+37  ;;  %vm7793_vm5 = vmor %vm3478_vm11, %vm3479_vm7  ;;  %v8970_v16 = vld [vmem:[#allocation102_spill] sm:$0xff]  ;;  %v8974_v9 = vld [vmem:[#allocation115_spill] sm:$0xff] }
 0x555   :  { %v3427_v59 = vmul.f32 %v3426_v29, %v8958_v21  ;;  %v3535_v5 = vsub.f32 1.0, %v3534_v56  ;;  %v3496_v53 = vsel %vm3495_vm14, %v7638_v8, %v3492_v23  ;;  %v3466_v10 = vsel %vm7760_vm15, %v7545_v63, %v3462_v47  ;;  %v3158_v56 = vpop.permute.xlu0 %3157 }
 0x556   :  { %3747 = vrot.lane.b32.xlu0 %v3457_v62, %s4489_s3  ;;  %v3470_v31 = vor.u32 1.1754944e-38, %v3469_v61  ;;  %v3521_v20 = vmul.f32 %v7665_v57, %v3520_v2  ;;  %vm3509_vm8 = vweird.f32 %v7627_v40  ;;  %v3501_v43 = vsel %vm3498_vm2, %v3500_v30, %v3496_v53  ;;  %v8973_v2 = vld [vmem:[#allocation167_spill] sm:$0xff]  ;;  %v8976_v30 = vld [vmem:[#allocation76_spill] sm:$0xff] }
 0x557   :  { %3743 = vrot.lane.b32.xlu1 %v3427_v59, %s4489_s3  ;;  %v3536_v15 = vmul.f32 %v4413_v14, %v3535_v5  ;;  %vm3539_vm6 = vweird.f32 %v4413_v14  ;;  %v3544_v41 = vand.u32 2147483648, %v7653_v0  ;;  %v8959_v46 = vsub.f32 %v6881_v51, %v7233_v7 }
 0x558   :  { %v3550_v8 = vsub.f32 1.0, %v3549_v39  ;;  %v3542_v38 = vand.u32 2147483647, %v7653_v0  ;;  %v8962_v36 = vsub.f32 %v6982_v19, %v7241_v22  ;;  %v3471_v61 = vsel %vm7715_vm0, %v3470_v31, %v3466_v10  ;;  %v8975_v39 = vld [vmem:[#allocation166_spill] sm:$0xff]  ;;  %v8977_v10 = vld [vmem:[#allocation165_spill] sm:$0xff] }
 0x559   :  { %v3442_v45 = vmul.f32 %v3441_v12, %v8959_v46  ;;  %v3507_v51 = vadd.f32 %v7627_v40, %v3506_v35  ;;  %v3537_v7 = vadd.f32 %v4413_v14, %v3536_v15  ;;  %vm3538_vm12 = vweird.f32 %v7653_v0  ;;  %v8978_v31 = vld [vmem:[#allocation134_spill] sm:$0xff] }
 0x55a   :  { %v3502_v27 = vmul.f32 %v3501_v43, %v8962_v36  ;;  %v3481_v26 = vsel %vm7793_vm5, %v7576_v60, %v3477_v13  ;;  %vm3483_vm11 = vcmp.eq.f32.partialorder %v3482_v17, 8.507059e+37  ;;  %v8963_v19 = vand.u32 2147483648, %v7498_v11  ;;  %vm3540_vm0 = vmor %vm3538_vm12, %vm3539_vm6  ;;  %v8982_v11 = vld [vmem:[#allocation108_spill] sm:$0xff] }
 0x55b   :  { %3745 = vrot.lane.b32.xlu2 %v3442_v45, %s4489_s3  ;;  %vm3508_vm9 = vweird.f32 %v7543_v48  ;;  %v3514_v33 = vand.u32 2147483648, %v7543_v48  ;;  %v3512_v0 = vand.u32 2147483647, %v7543_v48  ;;  %v3545_v47 = vor.u32 1.1754944e-38, %v3544_v41  ;;  %v8979_v45 = vld [vmem:[#allocation136_spill] sm:$0xff] }
 0x55c   :  { %v3485_v22 = vor.u32 1.1754944e-38, %v8963_v19  ;;  %v8964_v24 = vsub.f32 %v8917_v54, %v7273_v6  ;;  %v3541_v60 = vsel %vm3540_vm0, %v4413_v14, %v3537_v7  ;;  %v3029_v17 = vsub.f32 %v8966_v42, %v8965_v25  ;;  %vm7824_vm10 = vmor %vm3508_vm9, %vm3509_vm8  ;;  %v8980_v7 = vld [vmem:[#allocation61_spill] sm:$0xff] }
 0x55d   :  { %v3551_v18 = vmul.f32 %v7724_v3, %v3550_v8  ;;  %vm3543_vm13 = vcmp.eq.f32.partialorder %v3542_v38, 8.507059e+37  ;;  %v3522_v58 = vadd.f32 %v7665_v57, %v3521_v20  ;;  %vm3524_vm4 = vweird.f32 %v7665_v57  ;;  %v7866_v15 = vpop.permute.xlu0 %3163 }
 0x55e   :  { %v3472_v34 = vmul.f32 %v3471_v61, %v8964_v24  ;;  %3753 = vrot.lane.b32.xlu0 %v3502_v27, %s4489_s3  ;;  %v3486_v48 = vsel %vm3483_vm11, %v3485_v22, %v3481_v26  ;;  %v3546_v6 = vsel %vm3543_vm13, %v3545_v47, %v3541_v60  ;;  %v3511_v54 = vsel %vm7824_vm10, %v7627_v40, %v3507_v51 }
 0x55f   :  { %v3033_v52 = vsub.f32 %v8970_v16, %v8969_v50  ;;  %v3529_v49 = vand.u32 2147483648, %v7580_v37  ;;  %v3515_v55 = vor.u32 1.1754944e-38, %v3514_v33  ;;  %vm3523_vm7 = vweird.f32 %v7580_v37 }
 0x560   :  { %3749 = vrot.lane.b32.xlu1 %v3472_v34, %s4489_s3  ;;  %v3527_v4 = vand.u32 2147483647, %v7580_v37  ;;  %vm3513_vm15 = vcmp.eq.f32.partialorder %v3512_v0, 8.507059e+37  ;;  %v3487_v23 = vmul.f32 %v3486_v48, %v3029_v17  ;;  %vm7841_vm3 = vmor %vm3523_vm7, %vm3524_vm4  ;;  %v3552_v29 = vadd.f32 %v7724_v3, %v3551_v18  ;;  %v8981_v17 = vld [vmem:[#allocation145_spill] sm:$0xff] }
 0x561   :  { %vm3554_vm14 = vweird.f32 %v7724_v3  ;;  %v3547_v40 = vmul.f32 %v3546_v6, %v3033_v52  ;;  %v3516_v14 = vsel %vm3513_vm15, %v3515_v55, %v3511_v54  ;;  %v3031_v62 = vsub.f32 %v8974_v9, %v8973_v2  ;;  %v8983_v52 = vld [vmem:[#allocation110_spill] sm:$0xff] }
 0x562   :  { %v3559_v1 = vand.u32 2147483648, %v7636_v28  ;;  %v3526_v37 = vsel %vm7841_vm3, %v7665_v57, %v3522_v58  ;;  %v3530_v13 = vor.u32 1.1754944e-38, %v3529_v49  ;;  %vm3553_vm2 = vweird.f32 %v7636_v28  ;;  %v7861_v57 = vpop.permute.xlu2 %3155  ;;  %v7884_v58 = vpop.permute.xlu1 %3159 }
 0x563   :  { %3751 = vrot.lane.b32.xlu2 %v3487_v23, %s4489_s3  ;;  %v3557_v44 = vand.u32 2147483647, %v7636_v28  ;;  %vm3528_vm8 = vcmp.eq.f32.partialorder %v3527_v4, 8.507059e+37  ;;  %vm3555_vm6 = vmor %vm3553_vm2, %vm3554_vm14  ;;  %v3517_v21 = vmul.f32 %v3516_v14, %v3031_v62  ;;  %v3032_v12 = vsub.f32 %v8976_v30, %v8975_v39 }
 0x564   :  { %v3531_v59 = vsel %vm3528_vm8, %v3530_v13, %v3526_v37  ;;  %v3556_v35 = vsel %vm3555_vm6, %v7724_v3, %v3552_v29  ;;  %v3560_v5 = vor.u32 1.1754944e-38, %v3559_v1  ;;  %v3034_v20 = vsub.f32 %v8978_v31, %v8977_v10 }
 0x565   :  { %vm3558_vm5 = vcmp.eq.f32.partialorder %v3557_v44, 8.507059e+37  ;;  %v3532_v53 = vmul.f32 %v3531_v59, %v3032_v12  ;;  %4414 = vrcp.f32 %v3158_v56  ;;  %vm2691_vm12 = vcmp.gt.f32.partialorder %v8979_v45, 0.5 }
 0x566   :  { %3759 = vrot.lane.b32.xlu0 %v3547_v40, %s4489_s3  ;;  %v3561_v28 = vsel %vm3558_vm5, %v3560_v5, %v3556_v35  ;;  %4416 = vrcp.f32 %v7866_v15  ;;  %vm2693_vm9 = vcmp.gt.f32.partialorder %v8980_v7, 0.5  ;;  %v3589_v22 = vand.u32 2147483648, %v3158_v56 }
 0x567   :  { %v3562_v43 = vmul.f32 %v3561_v28, %v3034_v20  ;;  %vm3583_vm0 = vweird.f32 %v3158_v56  ;;  %v3587_v0 = vand.u32 2147483647, %v3158_v56  ;;  %4418 = vrcp.f32 %v7861_v57  ;;  %v8986_v20 = vld [vmem:[#allocation71_spill] sm:$0xff] }
 0x568   :  { %3755 = vrot.lane.b32.xlu1 %v3517_v21, %s4489_s3  ;;  %v3590_v60 = vor.u32 1.1754944e-38, %v3589_v22  ;;  %v3036_v18 = vsub.f32 %v8982_v11, %v8981_v17  ;;  %vm2696_vm4 = vcmp.gt.f32.partialorder %v8983_v52, 0.5  ;;  %v3634_v32 = vand.u32 2147483648, %v7866_v15  ;;  %v8985_v21 = vld [vmem:[#allocation101_spill] sm:$0xff]  ;;  %v8995_v52 = vld [vmem:[#allocation158_spill] sm:$0xff] }
 0x569   :  { %vm3588_vm13 = vcmp.eq.f32.partialorder %v3587_v0, 8.507059e+37  ;;  %vm3628_vm15 = vweird.f32 %v7866_v15  ;;  %v3632_v29 = vand.u32 2147483647, %v7866_v15  ;;  %vm2692_vm8 = vcmp.gt.f32.partialorder %v8986_v20, 0.5  ;;  %v8992_v0 = vld [vmem:[#allocation92_spill] sm:$0xff] }
 0x56a   :  { %v7869_v41 = vpop.permute.xlu2 %3161  ;;  %v7901_v9 = vpop.permute.xlu1 %3165  ;;  %v3635_v37 = vor.u32 1.1754944e-38, %v3634_v32  ;;  %vm3568_vm5 = vweird.f32 %v7861_v57  ;;  %v3572_v45 = vand.u32 2147483647, %v7861_v57 }
 0x56b   :  { %3757 = vrot.lane.b32.xlu2 %v3532_v53, %s4489_s3  ;;  %v4415_v3 = vpop.eup %4414  ;;  %vm3633_vm14 = vcmp.eq.f32.partialorder %v3632_v29, 8.507059e+37 }
 0x56c   :  { %v3579_v46 = vmul.f32 %v4415_v3, %v3158_v56  ;;  %vm3584_vm11 = vweird.f32 %v4415_v3  ;;  %v4417_v19 = vpop.eup %4416  ;;  %v8984_v56 = vld [vmem:[#allocation162_spill] sm:$0xff] }
 0x56d   :  { %vm3585_vm10 = vmor %vm3583_vm0, %vm3584_vm11  ;;  %v3624_v24 = vmul.f32 %v4417_v19, %v7866_v15  ;;  %v7887_v16 = vpop.eup %4418  ;;  %vm3629_vm7 = vweird.f32 %v4417_v19  ;;  %v3039_v59 = vsub.f32 %v8985_v21, %v8984_v56  ;;  %v3574_v15 = vand.u32 2147483648, %v7861_v57  ;;  %v8999_v21 = vld [vmem:[#allocation154_spill] sm:$0xff] }
 0x56e   :  { %3761 = vrot.lane.b32.xlu0 %v3562_v43, %s4489_s3  ;;  %v3580_v38 = vsub.f32 1.0, %v3579_v46  ;;  %v3564_v4 = vmul.f32 %v7887_v16, %v7861_v57  ;;  %vm3630_vm3 = vmor %vm3628_vm15, %vm3629_vm7  ;;  %vm3569_vm2 = vweird.f32 %v7887_v16 }
 0x56f   :  { %v3625_v48 = vsub.f32 1.0, %v3624_v24  ;;  %v3575_v7 = vor.u32 1.1754944e-38, %v3574_v15 }
 0x570   :  { %v3581_v27 = vmul.f32 %v4415_v3, %v3580_v38  ;;  %v3565_v2 = vsub.f32 1.0, %v3564_v4 }
 0x571   :  { %v3716_v63 = vpop.permute.xlu0 %3715  ;;  %v3626_v54 = vmul.f32 %v4417_v19, %v3625_v48 }
 0x572   :  { %v3811_v8 = vsel %vm2691_vm12, %v3716_v63, 0.0  ;;  %v7874_v61 = vpop.permute.xlu2 %3167  ;;  %v3582_v51 = vadd.f32 %v4415_v3, %v3581_v27  ;;  %v3566_v35 = vmul.f32 %v7887_v16, %v3565_v2  ;;  %vm7927_vm12 = vmor %vm3568_vm5, %vm3569_vm2  ;;  %vm3613_vm5 = vweird.f32 %v7869_v41 }
 0x573   :  { %v3843_v36 = vmul.f32 -1.0, %v3811_v8  ;;  %v3627_v23 = vadd.f32 %v4417_v19, %v3626_v54  ;;  %v3604_v54 = vand.u32 2147483648, %v7884_v58 }
 0x574   :  { %v3586_v34 = vsel %vm3585_vm10, %v4415_v3, %v3582_v51  ;;  %v3567_v28 = vadd.f32 %v7887_v16, %v3566_v35  ;;  %v8987_v3 = vld [vmem:[#allocation133_spill] sm:$0xff] }
 0x575   :  { %3907 = vrot.lane.b32.xlu1 %v3843_v36, %s4491_s6  ;;  %v3591_v42 = vsel %vm3588_vm13, %v3590_v60, %v3586_v34  ;;  %v3631_v62 = vsel %vm3630_vm3, %v4417_v19, %v3627_v23  ;;  %vm2699_vm6 = vcmp.gt.f32.partialorder %v8987_v3, 0.5  ;;  %v3605_v2 = vor.u32 1.1754944e-38, %v3604_v54 }
 0x576   :  { %v3592_v6 = vmul.f32 %v3591_v42, %v3036_v18  ;;  %v3636_v44 = vsel %vm3633_vm14, %v3635_v37, %v3631_v62  ;;  %v3571_v57 = vsel %vm7927_vm12, %v7887_v16, %v3567_v28  ;;  %v8998_v37 = vld [vmem:[#allocation138_spill] sm:$0xff]  ;;  %v9001_v28 = vld [vmem:[#allocation27_spill] sm:$0xff] }
 0x577   :  { %v3637_v5 = vmul.f32 %v3636_v44, %v3039_v59  ;;  %vm2695_vm2 = vcmp.gt.f32.partialorder %v8998_v37, 0.5  ;;  %v9000_v59 = vld [vmem:[#allocation83_spill] sm:$0xff] }
 0x578   :  { %v3037_v35 = vsub.f32 %v9000_v59, %v8999_v21 }
 0x57a   :  { %v7880_v25 = vpop.permute.xlu2 %3169 }
 0x57b   :  { %4420 = vrcp.f32 %v7880_v25  ;;  %v3679_v34 = vand.u32 2147483648, %v7880_v25  ;;  %vm3673_vm13 = vweird.f32 %v7880_v25  ;;  %v3677_v11 = vand.u32 2147483647, %v7880_v25 }
 0x57c   :  { %4422 = vrcp.f32 %v7884_v58 }
 0x57d   :  { %4424 = vrcp.f32 %v7869_v41  ;;  %v3680_v32 = vor.u32 1.1754944e-38, %v3679_v34  ;;  %vm3678_vm3 = vcmp.eq.f32.partialorder %v3677_v11, 8.507059e+37 }
 0x57e   :  { %4426 = vrcp.f32 %v7901_v9 }
 0x57f   :  { %4428 = vrcp.f32 %v7874_v61 }
 0x581   :  { %v7899_v14 = vpop.eup %4420 }
 0x582   :  { %v7904_v1 = vpop.eup %4422  ;;  %v3669_v13 = vmul.f32 %v7899_v14, %v7880_v25  ;;  %vm3674_vm0 = vweird.f32 %v7899_v14 }
 0x583   :  { %v3594_v39 = vmul.f32 %v7904_v1, %v7884_v58  ;;  %v7916_v53 = vpop.eup %4424  ;;  %vm3599_vm10 = vweird.f32 %v7904_v1  ;;  %vm7957_vm7 = vmor %vm3673_vm13, %vm3674_vm0  ;;  %vm3643_vm13 = vweird.f32 %v7901_v9 }
 0x584   :  { %v3670_v12 = vsub.f32 1.0, %v3669_v13  ;;  %v3609_v36 = vmul.f32 %v7916_v53, %v7869_v41  ;;  %v7950_v48 = vpop.eup %4426 }
 0x585   :  { %v3720_v26 = vpop.permute.xlu0 %3719  ;;  %v3595_v10 = vsub.f32 1.0, %v3594_v39  ;;  %vm3644_vm0 = vweird.f32 %v7950_v48 }
 0x586   :  { %v3813_v33 = vsel %vm2693_vm9, %v3720_v26, 0.0  ;;  %v3671_v63 = vmul.f32 %v7899_v14, %v3670_v12  ;;  %v8990_v26 = vld [vmem:[#allocation66_spill] sm:$0xff]  ;;  %vm3573_vm9 = vcmp.eq.f32.partialorder %v3572_v45, 8.507059e+37  ;;  %v3610_v24 = vsub.f32 1.0, %v3609_v36 }
 0x587   :  { %v3845_v47 = vmul.f32 -1.0, %v3813_v33  ;;  %v3596_v51 = vmul.f32 %v7904_v1, %v3595_v10  ;;  %vm2694_vm11 = vcmp.gt.f32.partialorder %v8990_v26, 0.5  ;;  %v8991_v33 = vld [vmem:[#allocation147_spill] sm:$0xff]  ;;  %v3576_v42 = vsel %vm3573_vm9, %v3575_v7, %v3571_v57 }
 0x588   :  { %v7892_v49 = vpop.permute.xlu2 %3723  ;;  %v3672_v22 = vadd.f32 %v7899_v14, %v3671_v63  ;;  %v3611_v29 = vmul.f32 %v7916_v53, %v3610_v24 }
 0x589   :  { %3911 = vrot.lane.b32.xlu1 %v3845_v47, %s4491_s6  ;;  %v3035_v47 = vsub.f32 %v8992_v0, %v8991_v33  ;;  %v3597_v17 = vadd.f32 %v7904_v1, %v3596_v51  ;;  %v3815_v44 = vsel %vm2695_vm2, %v7892_v49, 0.0  ;;  %v3617_v49 = vand.u32 2147483647, %v7869_v41  ;;  %v9004_v51 = vld [vmem:[#allocation90_spill] sm:$0xff] }
 0x58a   :  { %v3676_v16 = vsel %vm7957_vm7, %v7899_v14, %v3672_v22  ;;  %v3612_v39 = vadd.f32 %v7916_v53, %v3611_v29  ;;  %v3647_v33 = vand.u32 2147483647, %v7901_v9  ;;  %vm3658_vm2 = vweird.f32 %v7874_v61 }
 0x58b   :  { %v3577_v23 = vmul.f32 %v3576_v42, %v3035_v47  ;;  %v3681_v62 = vsel %vm3678_vm3, %v3680_v32, %v3676_v16 }
 0x58c   :  { %vm3648_vm7 = vcmp.eq.f32.partialorder %v3647_v33, 8.507059e+37 }
 0x58d   :  { %v3726_v50 = vpop.permute.xlu0 %3725 }
 0x58e   :  { %v3816_v55 = vsel %vm2696_vm4, %v3726_v50, 0.0  ;;  %vm3598_vm4 = vweird.f32 %v7884_v58  ;;  %v9007_v50 = vld [vmem:[#allocation55_spill] sm:$0xff] }
 0x58f   :  { %v3848_v40 = vmul.f32 -1.0, %v3816_v55  ;;  %vm7969_vm15 = vmor %vm3598_vm4, %vm3599_vm10 }
 0x590   :  { %v3601_v14 = vsel %vm7969_vm15, %v7904_v1, %v3597_v17  ;;  %v7989_v1 = vpop.eup %4428  ;;  %vm3645_vm4 = vmor %vm3643_vm13, %vm3644_vm0 }
 0x591   :  { %3765 = vrot.lane.b32.xlu1 %v3592_v6, %s4489_s3  ;;  %v7914_v30 = vpop.permute.xlu2 %3729  ;;  %v3602_v6 = vand.u32 2147483647, %v7884_v58  ;;  %v3654_v3 = vmul.f32 %v7989_v1, %v7874_v61  ;;  %vm3659_vm3 = vweird.f32 %v7989_v1 }
 0x593   :  { %vm3603_vm14 = vcmp.eq.f32.partialorder %v3602_v6, 8.507059e+37  ;;  %v3655_v7 = vsub.f32 1.0, %v3654_v3 }
 0x594   :  { %v3606_v56 = vsel %vm3603_vm14, %v3605_v2, %v3601_v14  ;;  %v9010_v2 = vld [vmem:[#allocation69_spill] sm:$0xff] }
 0x595   :  { %v3732_v31 = vpop.permute.xlu0 %3731  ;;  %v3656_v34 = vmul.f32 %v7989_v1, %v3655_v7 }
 0x596   :  { %v3819_v27 = vsel %vm2699_vm6, %v3732_v31, 0.0  ;;  %vm2703_vm6 = vcmp.gt.f32.partialorder %v9001_v28, 0.5  ;;  %v3847_v31 = vmul.f32 -1.0, %v3815_v44  ;;  %v9015_v28 = vld [vmem:[#allocation65_spill] sm:$0xff] }
 0x597   :  { %v3718_v43 = vpop.permute.xlu1 %3717  ;;  %v3851_v19 = vmul.f32 -1.0, %v3819_v27  ;;  %v9003_v27 = vld [vmem:[#allocation49_spill] sm:$0xff] }
 0x598   :  { %v3812_v46 = vsel %vm2692_vm8, %v3718_v43, 0.0  ;;  %vm3614_vm8 = vweird.f32 %v7916_v53  ;;  %v3607_v43 = vmul.f32 %v3606_v56, %v3037_v35  ;;  %v3038_v57 = vsub.f32 %v9004_v51, %v9003_v27  ;;  %v9012_v56 = vld [vmem:[#allocation125_spill] sm:$0xff]  ;;  %v9018_v51 = vld [vmem:[#allocation152_spill] sm:$0xff] }
 0x599   :  { %3917 = vrot.lane.b32.xlu1 %v3848_v40, %s4491_s6  ;;  %v3844_v8 = vmul.f32 -1.0, %v3812_v46  ;;  %v2978_v60 = vpop.permute.xlu2 %2977  ;;  %v3639_v40 = vmul.f32 %v7950_v48, %v7901_v9  ;;  %vm3615_vm12 = vmor %vm3613_vm5, %vm3614_vm8  ;;  %vm2700_vm5 = vcmp.gt.f32.partialorder %v9010_v2, 0.5  ;;  %vm2707_vm13 = vcmp.gt.f32.partialorder %v9018_v51, 0.5 }
 0x59a   :  { %v3042_v55 = vsub.f32 %v8995_v52, %v2978_v60  ;;  %v3616_v45 = vsel %vm3615_vm12, %v7916_v53, %v3612_v39  ;;  %v9005_v53 = vld [vmem:[#allocation126_spill] sm:$0xff]  ;;  %v3657_v52 = vadd.f32 %v7989_v1, %v3656_v34  ;;  %vm3660_vm8 = vmor %vm3658_vm2, %vm3659_vm3  ;;  %v9013_v39 = vld [vmem:[#allocation91_spill] sm:$0xff] }
 0x59b   :  { %3909 = vrot.lane.b32.xlu2 %v3844_v8, %s4491_s6  ;;  %v3640_v12 = vsub.f32 1.0, %v3639_v40  ;;  %vm2706_vm10 = vcmp.gt.f32.partialorder %v9005_v53, 0.5  ;;  %vm2712_vm12 = vcmp.gt.f32.partialorder %v9013_v39, 0.5 }
 0x59c   :  { %v3682_v13 = vmul.f32 %v3681_v62, %v3042_v55  ;;  %v3664_v55 = vand.u32 2147483648, %v7874_v61  ;;  %v3661_v40 = vsel %vm3660_vm8, %v7989_v1, %v3657_v52  ;;  %v9014_v1 = vld [vmem:[#allocation114_spill] sm:$0xff] }
 0x59d   :  { %v3641_v46 = vmul.f32 %v7950_v48, %v3640_v12 }
 0x59e   :  { %v3665_v14 = vor.u32 1.1754944e-38, %v3664_v55 }
 0x59f   :  { %v3722_v18 = vpop.permute.xlu1 %3721  ;;  %v3642_v26 = vadd.f32 %v7950_v48, %v3641_v46  ;;  %v9016_v46 = vld [vmem:[#allocation107_spill] sm:$0xff] }
 0x5a0   :  { %v3814_v25 = vsel %vm2694_vm11, %v3722_v18, 0.0  ;;  %vm3618_vm11 = vcmp.eq.f32.partialorder %v3617_v49, 8.507059e+37  ;;  %v9006_v18 = vld [vmem:[#allocation78_spill] sm:$0xff]  ;;  %vm2704_vm0 = vcmp.gt.f32.partialorder %v9016_v46, 0.5 }
 0x5a1   :  { %3771 = vrot.lane.b32.xlu1 %v3637_v5, %s4489_s3  ;;  %v3846_v4 = vmul.f32 -1.0, %v3814_v25  ;;  %v3619_v5 = vand.u32 2147483648, %v7869_v41  ;;  %v9002_v41 = vld [vmem:[#allocation116_spill] sm:$0xff]  ;;  %v3646_v17 = vsel %vm3645_vm4, %v7950_v48, %v3642_v26  ;;  %vm2698_vm15 = vcmp.gt.f32.partialorder %v9006_v18, 0.5  ;;  %v9008_v25 = vld [vmem:[#allocation73_spill] sm:$0xff]  ;;  %v9023_v18 = vld [vmem:[#allocation131_spill] sm:$0xff] }
 0x5a2   :  { %vm2697_vm9 = vcmp.gt.f32.partialorder %v9002_v41, 0.5  ;;  %v3040_v16 = vsub.f32 %v9008_v25, %v9007_v50  ;;  %v9009_v48 = vld [vmem:[#allocation72_spill] sm:$0xff] }
 0x5a3   :  { %3913 = vrot.lane.b32.xlu0 %v3846_v4, %s4491_s6  ;;  %3763 = vrot.lane.b32.xlu2 %v3577_v23, %s4489_s3  ;;  %v3620_v63 = vor.u32 1.1754944e-38, %v3619_v5  ;;  %vm2709_vm14 = vcmp.gt.f32.partialorder %v9009_v48, 0.5  ;;  %v3662_v23 = vand.u32 2147483647, %v7874_v61  ;;  %v9011_v61 = vld [vmem:[#allocation156_spill] sm:$0xff] }
 0x5a4   :  { %v3041_v21 = vsub.f32 %v9012_v56, %v9011_v61  ;;  %v9026_v61 = vld [vmem:[#allocation146_spill] sm:$0xff] }
 0x5a5   :  { %v3621_v36 = vsel %vm3618_vm11, %v3620_v63, %v3616_v45  ;;  %vm2701_vm11 = vcmp.gt.f32.partialorder %v9014_v1, 0.5  ;;  %v9017_v45 = vld [vmem:[#allocation140_spill] sm:$0xff] }
 0x5a6   :  { %v3622_v47 = vmul.f32 %v3621_v36, %v3038_v57  ;;  %v9019_v57 = vld [vmem:[#allocation84_spill] sm:$0xff] }
 0x5a7   :  { %vm2708_vm4 = vcmp.gt.f32.partialorder %v9019_v57, 0.5 }
 0x5a8   :  { %v3728_v20 = vpop.permute.xlu1 %3727 }
 0x5a9   :  { %3923 = vrot.lane.b32.xlu1 %v3851_v19, %s4491_s6  ;;  %v3817_v38 = vsel %vm2697_vm9, %v3728_v20, 0.0  ;;  %v3649_v19 = vand.u32 2147483648, %v7901_v9  ;;  %v3818_v9 = vsel %vm2698_vm15, %v7914_v30, 0.0  ;;  %vm2702_vm9 = vcmp.gt.f32.partialorder %v9015_v28, 0.5 }
 0x5aa   :  { %v3849_v0 = vmul.f32 -1.0, %v3817_v38  ;;  %v3850_v30 = vmul.f32 -1.0, %v3818_v9 }
 0x5ab   :  { %3767 = vrot.lane.b32.xlu0 %v3607_v43, %s4489_s3  ;;  %3915 = vrot.lane.b32.xlu2 %v3847_v31, %s4491_s6  ;;  %v3650_v11 = vor.u32 1.1754944e-38, %v3649_v19 }
 0x5ad   :  { %v3740_v10 = vpop.permute.xlu2 %3739  ;;  %v3651_v54 = vsel %vm3648_vm7, %v3650_v11, %v3646_v17  ;;  %v9022_v11 = vld [vmem:[#allocation99_spill] sm:$0xff] }
 0x5ae   :  { %v3823_v15 = vsel %vm2703_vm6, %v3740_v10, 0.0  ;;  %v3652_v58 = vmul.f32 %v3651_v54, %v3040_v16  ;;  %vm3663_vm6 = vcmp.eq.f32.partialorder %v3662_v23, 8.507059e+37  ;;  %vm2713_vm3 = vcmp.gt.f32.partialorder %v9022_v11, 0.5 }
 0x5af   :  { %v3855_v8 = vmul.f32 -1.0, %v3823_v15  ;;  %v3666_v44 = vsel %vm3663_vm6, %v3665_v14, %v3661_v40  ;;  %v9025_v14 = vld [vmem:[#allocation82_spill] sm:$0xff]  ;;  %vm2719_vm6 = vcmp.gt.f32.partialorder %v9026_v61, 0.5 }
 0x5b0   :  { %v3667_v12 = vmul.f32 %v3666_v44, %v3041_v21  ;;  %vm2715_vm8 = vcmp.gt.f32.partialorder %v9025_v14, 0.5 }
 0x5b1   :  { %3777 = vrot.lane.b32.xlu1 %v3682_v13, %s4489_s3 }
 0x5b3   :  { %v3736_v60 = vpop.permute.xlu0 %3735  ;;  %3919 = vrot.lane.b32.xlu0 %v3849_v0, %s4491_s6  ;;  %3769 = vrot.lane.b32.xlu2 %v3622_v47, %s4489_s3  ;;  %v9020_v0 = vld [vmem:[#allocation86_spill] sm:$0xff] }
 0x5b4   :  { %v3734_v42 = vpop.permute.xlu1 %3733  ;;  %v3821_v31 = vsel %vm2701_vm11, %v3736_v60, 0.0  ;;  %vm2710_vm7 = vcmp.gt.f32.partialorder %v9020_v0, 0.5  ;;  %v9021_v47 = vld [vmem:[#allocation10_spill] sm:$0xff] }
 0x5b5   :  { %v3746_v22 = vpop.permute.xlu2 %3745  ;;  %v3820_v13 = vsel %vm2700_vm5, %v3734_v42, 0.0  ;;  %v3853_v15 = vmul.f32 -1.0, %v3821_v31  ;;  %vm2711_vm15 = vcmp.gt.f32.partialorder %v9021_v47, 0.5 }
 0x5b6   :  { %v3826_v24 = vsel %vm2706_vm10, %v3746_v22, 0.0  ;;  %v3852_v35 = vmul.f32 -1.0, %v3820_v13  ;;  %vm2705_vm10 = vcmp.gt.f32.partialorder %v9017_v45, 0.5 }
 0x5b7   :  { %v3858_v6 = vmul.f32 -1.0, %v3826_v24 }
 0x5b9   :  { %3931 = vrot.lane.b32.xlu1 %v3855_v8, %s4491_s6 }
 0x5bb   :  { %3773 = vrot.lane.b32.xlu0 %v3652_v58, %s4489_s3  ;;  %3921 = vrot.lane.b32.xlu2 %v3850_v30, %s4491_s6  ;;  %v9024_v58 = vld [vmem:[#allocation95_spill] sm:$0xff] }
 0x5bc   :  { %vm2716_vm2 = vcmp.gt.f32.partialorder %v9024_v58, 0.5 }
 0x5bd   :  { %v3752_v4 = vpop.permute.xlu2 %3751 }
 0x5be   :  { %v3829_v32 = vsel %vm2709_vm14, %v3752_v4, 0.0  ;;  %v3742_v29 = vpop.permute.xlu0 %3741  ;;  %vm2714_vm14 = vcmp.gt.f32.partialorder %v9023_v18, 0.5 }
 0x5bf   :  { %v3861_v62 = vmul.f32 -1.0, %v3829_v32  ;;  %v3738_v37 = vpop.permute.xlu1 %3737  ;;  %v3824_v63 = vsel %vm2704_vm0, %v3742_v29, 0.0 }
 0x5c0   :  { %v3822_v20 = vsel %vm2702_vm9, %v3738_v37, 0.0  ;;  %v3856_v38 = vmul.f32 -1.0, %v3824_v63 }
 0x5c1   :  { %3937 = vrot.lane.b32.xlu1 %v3858_v6, %s4491_s6  ;;  %v3854_v3 = vmul.f32 -1.0, %v3822_v20 }
 0x5c3   :  { %3925 = vrot.lane.b32.xlu0 %v3852_v35, %s4491_s6  ;;  %3775 = vrot.lane.b32.xlu2 %v3667_v12, %s4489_s3  ;;  %v9027_v35 = vld [vmem:[#allocation106_spill] sm:$0xff] }
 0x5c4   :  { %vm2718_vm5 = vcmp.gt.f32.partialorder %v9027_v35, 0.5 }
 0x5c5   :  { %v3758_v59 = vpop.permute.xlu2 %3757 }
 0x5c6   :  { %v3832_v5 = vsel %vm2712_vm12, %v3758_v59, 0.0 }
 0x5c7   :  { %v3864_v10 = vmul.f32 -1.0, %v3832_v5 }
 0x5c8   :  { %v3748_v49 = vpop.permute.xlu0 %3747 }
 0x5c9   :  { %3943 = vrot.lane.b32.xlu1 %v3861_v62, %s4491_s6  ;;  %v3744_v43 = vpop.permute.xlu1 %3743  ;;  %v3827_v7 = vsel %vm2707_vm13, %v3748_v49, 0.0 }
 0x5ca   :  { %v3825_v8 = vsel %vm2705_vm10, %v3744_v43, 0.0  ;;  %v3859_v19 = vmul.f32 -1.0, %v3827_v7 }
 0x5cb   :  { %3929 = vrot.lane.b32.xlu0 %v3854_v3, %s4491_s6  ;;  %3927 = vrot.lane.b32.xlu2 %v3853_v15, %s4491_s6  ;;  %v3857_v36 = vmul.f32 -1.0, %v3825_v8  ;;  %v9028_v15 = vld [vmem:[#allocation129_spill] sm:$0xff] }
 0x5cc   :  { %vm2722_vm12 = vcmp.gt.f32.partialorder %v9028_v15, 0.5 }
 0x5d0   :  { %v3754_v41 = vpop.permute.xlu0 %3753 }
 0x5d1   :  { %3949 = vrot.lane.b32.xlu1 %v3864_v10, %s4491_s6  ;;  %v3830_v24 = vsel %vm2710_vm7, %v3754_v41, 0.0  ;;  %v9029_v41 = vld [vmem:[#allocation77_spill] sm:$0xff] }
 0x5d2   :  { %v3750_v27 = vpop.permute.xlu1 %3749  ;;  %v3862_v60 = vmul.f32 -1.0, %v3830_v24  ;;  %vm2717_vm11 = vcmp.gt.f32.partialorder %v9029_v41, 0.5 }
 0x5d3   :  { %3935 = vrot.lane.b32.xlu0 %v3857_v36, %s4491_s6  ;;  %3933 = vrot.lane.b32.xlu2 %v3856_v38, %s4491_s6  ;;  %v3828_v26 = vsel %vm2708_vm4, %v3750_v27, 0.0  ;;  %v9030_v36 = vld [vmem:[#allocation111_spill] sm:$0xff] }
 0x5d4   :  { %v3860_v53 = vmul.f32 -1.0, %v3828_v26  ;;  %vm2721_vm9 = vcmp.gt.f32.partialorder %v9030_v36, 0.5 }
 0x5d8   :  { %v3760_v22 = vpop.permute.xlu0 %3759 }
 0x5d9   :  { %v3833_v6 = vsel %vm2713_vm3, %v3760_v22, 0.0 }
 0x5da   :  { %v3756_v33 = vpop.permute.xlu1 %3755  ;;  %v3865_v50 = vmul.f32 -1.0, %v3833_v6 }
 0x5db   :  { %3941 = vrot.lane.b32.xlu0 %v3860_v53, %s4491_s6  ;;  %3939 = vrot.lane.b32.xlu2 %v3859_v19, %s4491_s6  ;;  %v3831_v34 = vsel %vm2711_vm15, %v3756_v33, 0.0 }
 0x5dc   :  { %v3863_v42 = vmul.f32 -1.0, %v3831_v34  ;;  %v9031_v34 = vld [vmem:[#allocation96_spill] sm:$0xff] }
 0x5dd   :  { %vm2720_vm0 = vcmp.gt.f32.partialorder %v9031_v34, 0.5 }
 0x5e0   :  { %v3762_v17 = vpop.permute.xlu0 %3761 }
 0x5e1   :  { %v3834_v9 = vsel %vm2714_vm14, %v3762_v17, 0.0 }
 0x5e2   :  { %v3866_v25 = vmul.f32 -1.0, %v3834_v9 }
 0x5e3   :  { %3947 = vrot.lane.b32.xlu0 %v3863_v42, %s4491_s6  ;;  %3945 = vrot.lane.b32.xlu2 %v3862_v60, %s4491_s6 }
 0x5e7   :  { %v3908_v54 = vpop.permute.xlu1 %3907 }
 0x5e8   :  { %v4003_v55 = vsel %vm71_vm1, %v3908_v54, 0.0 }
 0x5eb   :  { %3953 = vrot.lane.b32.xlu0 %v3866_v25, %s4491_s6  ;;  %3951 = vrot.lane.b32.xlu2 %v3865_v50, %s4491_s6 }
 0x5f5   :  { %v3910_v52 = vpop.permute.xlu2 %3909 }
 0x5f6   :  { %v4004_v48 = vsel %vm71_vm1, %v3910_v52, 0.0 }
 0x5f7   :  { %v4005_v23 = vadd.f32 %v4004_v48, %v4003_v55 }
 0x5fb   :  { %v3912_v16 = vpop.permute.xlu1 %3911 }
 0x5fc   :  { %v4006_v4 = vsel %vm71_vm1, %v3912_v16, 0.0 }
 0x5fd   :  { %v4007_v30 = vadd.f32 %v4006_v4, %v4005_v23  ;;  %v3764_v2 = vpop.permute.xlu2 %3763 }
 0x5fe   :  { %v3835_v62 = vsel %vm2715_vm8, %v3764_v2, 0.0 }
 0x5ff   :  { %v3867_v37 = vmul.f32 -1.0, %v3835_v62 }
 0x601   :  { %3955 = vrot.lane.b32.xlu1 %v3867_v37, %s4491_s6 }
 0x603   :  { %v3766_v32 = vpop.permute.xlu1 %3765 }
 0x604   :  { %v3836_v29 = vsel %vm2716_vm2, %v3766_v32, 0.0 }
 0x605   :  { %v3868_v40 = vmul.f32 -1.0, %v3836_v29  ;;  %v3916_v44 = vpop.permute.xlu2 %3915 }
 0x606   :  { %v4010_v20 = vsel %vm71_vm1, %v3916_v44, 0.0 }
 0x607   :  { %3957 = vrot.lane.b32.xlu2 %v3868_v40, %s4491_s6 }
 0x60b   :  { %v3918_v13 = vpop.permute.xlu1 %3917 }
 0x60c   :  { %v4012_v46 = vsel %vm71_vm1, %v3918_v13, 0.0 }
 0x60d   :  { %v3770_v39 = vpop.permute.xlu2 %3769 }
 0x60e   :  { %v3838_v12 = vsel %vm2718_vm5, %v3770_v39, 0.0 }
 0x60f   :  { %v3870_v5 = vmul.f32 -1.0, %v3838_v12 }
 0x611   :  { %3961 = vrot.lane.b32.xlu1 %v3870_v5, %s4491_s6 }
 0x613   :  { %v3772_v56 = vpop.permute.xlu1 %3771 }
 0x614   :  { %v3839_v21 = vsel %vm2719_vm6, %v3772_v56, 0.0 }
 0x615   :  { %v3871_v59 = vmul.f32 -1.0, %v3839_v21  ;;  %v3914_v28 = vpop.permute.xlu0 %3913  ;;  %v3922_v10 = vpop.permute.xlu2 %3921 }
 0x616   :  { %v4008_v49 = vsel %vm71_vm1, %v3914_v28, 0.0  ;;  %v4016_v33 = vsel %vm71_vm1, %v3922_v10, 0.0 }
 0x617   :  { %3963 = vrot.lane.b32.xlu2 %v3871_v59, %s4491_s6  ;;  %v4009_v31 = vadd.f32 %v4008_v49, %v4007_v30 }
 0x619   :  { %v4011_v43 = vadd.f32 %v4010_v20, %v4009_v31 }
 0x61b   :  { %v3924_v1 = vpop.permute.xlu1 %3923  ;;  %v4013_v8 = vadd.f32 %v4012_v46, %v4011_v43 }
 0x61c   :  { %v4018_v47 = vsel %vm71_vm1, %v3924_v1, 0.0 }
 0x61d   :  { %v3768_v38 = vpop.permute.xlu0 %3767  ;;  %v3776_v27 = vpop.permute.xlu2 %3775 }
 0x61e   :  { %v3837_v51 = vsel %vm2717_vm11, %v3768_v38, 0.0  ;;  %v3841_v57 = vsel %vm2721_vm9, %v3776_v27, 0.0 }
 0x61f   :  { %v3869_v7 = vmul.f32 -1.0, %v3837_v51  ;;  %v3873_v26 = vmul.f32 -1.0, %v3841_v57 }
 0x621   :  { %3959 = vrot.lane.b32.xlu0 %v3869_v7, %s4491_s6  ;;  %3967 = vrot.lane.b32.xlu1 %v3873_v26, %s4491_s6 }
 0x623   :  { %v3778_v3 = vpop.permute.xlu1 %3777 }
 0x624   :  { %v3842_v45 = vsel %vm2722_vm12, %v3778_v3, 0.0 }
 0x625   :  { %v3874_v63 = vmul.f32 -1.0, %v3842_v45  ;;  %v3920_v19 = vpop.permute.xlu0 %3919  ;;  %v3928_v6 = vpop.permute.xlu2 %3927 }
 0x626   :  { %v4014_v53 = vsel %vm71_vm1, %v3920_v19, 0.0  ;;  %v4022_v50 = vsel %vm71_vm1, %v3928_v6, 0.0 }
 0x627   :  { %3969 = vrot.lane.b32.xlu2 %v3874_v63, %s4491_s6  ;;  %v4015_v22 = vadd.f32 %v4014_v53, %v4013_v8 }
 0x629   :  { %v4017_v0 = vadd.f32 %v4016_v33, %v4015_v22 }
 0x62b   :  { %v4019_v24 = vadd.f32 %v4018_v47, %v4017_v0  ;;  %v3932_v16 = vpop.permute.xlu1 %3931 }
 0x62c   :  { %v4026_v48 = vsel %vm71_vm1, %v3932_v16, 0.0 }
 0x62d   :  { %v3774_v60 = vpop.permute.xlu0 %3773  ;;  %v3934_v4 = vpop.permute.xlu2 %3933 }
 0x62e   :  { %v3840_v42 = vsel %vm2720_vm0, %v3774_v60, 0.0  ;;  %v4028_v58 = vsel %vm71_vm1, %v3934_v4, 0.0 }
 0x62f   :  { %v3872_v17 = vmul.f32 -1.0, %v3840_v42 }
 0x631   :  { %3965 = vrot.lane.b32.xlu0 %v3872_v17, %s4491_s6 }
 0x633   :  { %v3938_v29 = vpop.permute.xlu1 %3937 }
 0x634   :  { %v4032_v2 = vsel %vm71_vm1, %v3938_v29, 0.0 }
 0x635   :  { %v3926_v11 = vpop.permute.xlu0 %3925  ;;  %v3940_v62 = vpop.permute.xlu2 %3939 }
 0x636   :  { %v4020_v18 = vsel %vm71_vm1, %v3926_v11, 0.0  ;;  %v4034_v44 = vsel %vm71_vm1, %v3940_v62, 0.0 }
 0x637   :  { %v4021_v9 = vadd.f32 %v4020_v18, %v4019_v24 }
 0x639   :  { %v4023_v52 = vadd.f32 %v4022_v50, %v4021_v9 }
 0x63b   :  { %v3944_v56 = vpop.permute.xlu1 %3943 }
 0x63c   :  { %v4038_v35 = vsel %vm71_vm1, %v3944_v56, 0.0 }
 0x63d   :  { %v3930_v54 = vpop.permute.xlu0 %3929  ;;  %v3946_v39 = vpop.permute.xlu2 %3945 }
 0x63e   :  { %v4024_v25 = vsel %vm71_vm1, %v3930_v54, 0.0  ;;  %v4040_v1 = vsel %vm71_vm1, %v3946_v39, 0.0 }
 0x63f   :  { %v4025_v55 = vadd.f32 %v4024_v25, %v4023_v52 }
 0x641   :  { %v4027_v23 = vadd.f32 %v4026_v48, %v4025_v55 }
 0x643   :  { %v4029_v40 = vadd.f32 %v4028_v58, %v4027_v23  ;;  %v3950_v10 = vpop.permute.xlu1 %3949 }
 0x644   :  { %v4044_v20 = vsel %vm71_vm1, %v3950_v10, 0.0 }
 0x645   :  { %v3936_v30 = vpop.permute.xlu0 %3935  ;;  %v3952_v43 = vpop.permute.xlu2 %3951 }
 0x646   :  { %v4030_v32 = vsel %vm71_vm1, %v3936_v30, 0.0  ;;  %v4046_v45 = vsel %vm71_vm1, %v3952_v43, 0.0 }
 0x647   :  { %v4031_v14 = vadd.f32 %v4030_v32, %v4029_v40 }
 0x649   :  { %v4033_v37 = vadd.f32 %v4032_v2, %v4031_v14 }
 0x64b   :  { %v4035_v21 = vadd.f32 %v4034_v44, %v4033_v37 }
 0x64d   :  { %v3942_v13 = vpop.permute.xlu0 %3941 }
 0x64e   :  { %v4036_v61 = vsel %vm71_vm1, %v3942_v13, 0.0 }
 0x64f   :  { %v4037_v59 = vadd.f32 %v4036_v61, %v4035_v21 }
 0x651   :  { %v4039_v12 = vadd.f32 %v4038_v35, %v4037_v59 }
 0x653   :  { %v4041_v49 = vadd.f32 %v4040_v1, %v4039_v12 }
 0x655   :  { %v3948_v5 = vpop.permute.xlu0 %3947 }
 0x656   :  { %v4042_v28 = vsel %vm71_vm1, %v3948_v5, 0.0 }
 0x657   :  { %v4043_v31 = vadd.f32 %v4042_v28, %v4041_v49 }
 0x659   :  { %v4045_v15 = vadd.f32 %v4044_v20, %v4043_v31 }
 0x65b   :  { %v4047_v8 = vadd.f32 %v4046_v45, %v4045_v15 }
 0x65d   :  { %v3954_v3 = vpop.permute.xlu0 %3953 }
 0x65e   :  { %v4048_v63 = vsel %vm71_vm1, %v3954_v3, 0.0 }
 0x65f   :  { %v4049_v38 = vadd.f32 %v4048_v63, %v4047_v8 }
 0x661   :  { %v3958_v36 = vpop.permute.xlu2 %3957 }
 0x662   :  { %v4052_v57 = vsel %vm71_vm1, %v3958_v36, 0.0 }
 0x671   :  { %v3964_v22 = vpop.permute.xlu2 %3963 }
 0x672   :  { %v4058_v47 = vsel %vm71_vm1, %v3964_v22, 0.0 }
 0x673   :  { %v3956_v46 = vpop.permute.xlu1 %3955 }
 0x674   :  { %v4050_v41 = vsel %vm71_vm1, %v3956_v46, 0.0 }
 0x675   :  { %v4051_v27 = vadd.f32 %v4050_v41, %v4049_v38 }
 0x677   :  { %v4053_v26 = vadd.f32 %v4052_v57, %v4051_v27 }
 0x681   :  { %v3970_v17 = vpop.permute.xlu2 %3969 }
 0x682   :  { %v4064_v9 = vsel %vm71_vm1, %v3970_v17, 0.0 }
 0x683   :  { %v3962_v19 = vpop.permute.xlu1 %3961 }
 0x684   :  { %v4056_v33 = vsel %vm71_vm1, %v3962_v19, 0.0 }
 0x693   :  { %v3960_v51 = vpop.permute.xlu0 %3959  ;;  %v3968_v24 = vpop.permute.xlu1 %3967 }
 0x694   :  { %v4054_v7 = vsel %vm71_vm1, %v3960_v51, 0.0  ;;  %v4062_v18 = vsel %vm71_vm1, %v3968_v24, 0.0 }
 0x695   :  { %v4055_v53 = vadd.f32 %v4054_v7, %v4053_v26 }
 0x697   :  { %v4057_v0 = vadd.f32 %v4056_v33, %v4055_v53 }
 0x699   :  { %v4059_v60 = vadd.f32 %v4058_v47, %v4057_v0 }
 0x6a3   :  { %v3966_v34 = vpop.permute.xlu0 %3965 }
 0x6a4   :  { %v4060_v42 = vsel %vm71_vm1, %v3966_v34, 0.0 }
 0x6a5   :  { %v4061_v11 = vadd.f32 %v4060_v42, %v4059_v60 }
 0x6a7   :  { %v4063_v6 = vadd.f32 %v4062_v18, %v4061_v11 }
 0x6a9   :  { %v4065_v54 = vadd.f32 %v4064_v9, %v4063_v6 }
 0x6ab   :  { %4066 = vadd.xlane.f32.xlu0 %v4065_v54 }
 0x71e   :  { %v4067_v50 = vpop.xlane.xlu0 %4066 }
 0x71f   :  { %v4068_v25 = vrot.slane %v4067_v50, 4 }
 0x721   :  { %v4069_v16 = vadd.f32 %v4068_v25, %v4067_v50 }
 0x723   :  { %v4070_v52 = vrot.slane %v4069_v16, 2 }
 0x725   :  { %v4071_v55 = vadd.f32 %v4070_v52, %v4069_v16 }
 0x727   :  { %v4072_v48 = vrot.slane %v4071_v55, 1 }
 0x729   :  { %v4073_v4 = vadd.f32 %v4072_v48, %v4071_v55 }
 0x72b   :  { %4158 = vpush %v4073_v4 }
 0x75c   :  { %s4159_s22 = spop %4158 }
 0x75d   :  { %v4075_v23 = vstv %s4159_s22 }
 0x75e   :  { %4076 = vst [vmem:[#allocation6] sm:$0xff] %v4075_v23 }
 0x75f   :  { %4087 = dma.vmem_to_hbm [thread:$0]  %s4083_s21, 128, %s4085_s19, [#allocation5]  }
 0x760   :  { %4480 = dma.done.wait [#allocation5], 128  }
 0x761   :  { %4481 = vsyncadd [#allocation5], 4294967168 }
 0x762   :  { %4092 = vsyncpa [#allocation4], 1 }
 0x763   :  { %4093 = vsyncpa [#allocation5], 1 }

</bundles_post_ra>
